<compile_context>
chip_gen: v6e
topology: v6e:2x2x1
jax: 0.10.0
libtpu: 0.0.40
codegen_flags: <defaults>
</compile_context>

<pallas_src>
import functools

import jax
import jax.numpy as jnp
from jax import lax
from jax.experimental import pallas as pl
from jax.experimental.pallas import tpu as pltpu


def _round_up(x, m):
    return (x + m - 1) // m * m


# ----------------------------- parameter packing (host side) -----------------------------

class _ParamPacker:
    """Packs all weight matrices into one [R, 128] slab (each matrix row-padded to a
    multiple of 8 sublanes, zero lane-padded to 128 lanes) and all bias/gamma/beta
    vectors into one [NV, 128] slab (one row each).  Offsets are static metadata."""

    LANES = 128

    def __init__(self):
        self._mats, self._vecs = [], []
        self.mat_off, self.vec_off = {}, {}
        self._rows = 0

    def add_mat(self, name, w):
        w = jnp.asarray(w, jnp.float32)
        rin, cout = w.shape
        rpad = _round_up(rin, 8)
        buf = jnp.zeros((rpad, self.LANES), jnp.float32).at[:rin, :cout].set(w)
        self._mats.append(buf)
        self.mat_off[name] = (self._rows, rpad, cout)
        self._rows += rpad

    def add_vec(self, name, v):
        v = jnp.asarray(v, jnp.float32).reshape(-1)
        n = v.shape[0]
        buf = jnp.zeros((1, self.LANES), jnp.float32).at[0, :n].set(v)
        self.vec_off[name] = (len(self._vecs), n)
        self._vecs.append(buf)

    def finalize(self):
        w_slab = jnp.concatenate(self._mats, axis=0)
        v_slab = jnp.concatenate(self._vecs, axis=0)
        pad = _round_up(v_slab.shape[0], 8) - v_slab.shape[0]
        if pad:
            v_slab = jnp.concatenate(
                [v_slab, jnp.zeros((pad, self.LANES), jnp.float32)], axis=0)
        return w_slab, v_slab


def _pack_params(p, cfg):
    D = cfg["d_model"]
    nH = cfg["n_heads"]
    hd = D // nH
    pk = _ParamPacker()

    for i in range(cfg["lstm_layers"]):
        lp = p["lstm"][i]
        pk.add_mat(f"lstm{i}_wih", lp["wih"])
        pk.add_mat(f"lstm{i}_whh", lp["whh"])
        pk.add_vec(f"lstm{i}_b", lp["b"])
        if cfg["skip_co"]:
            pk.add_mat(f"skip{i}_w", p["skip"][i]["w"])
            pk.add_vec(f"skip{i}_b", p["skip"][i]["b"])
        if cfg["use_norm"]:
            pk.add_vec(f"ln{i}_g", p["ln"][i]["g"])
            pk.add_vec(f"ln{i}_b", p["ln"][i]["b"])

    pk.add_mat("proj_w", p["proj"]["w"])
    pk.add_vec("proj_b", p["proj"]["b"])

    for l in range(cfg["e_layers"]):
        tp = p["tr"][l]
        in_w = jnp.asarray(tp["in_w"], jnp.float32)            # [D, 3D]
        in_b = jnp.asarray(tp["in_b"], jnp.float32).reshape(-1)  # [3D]
        out_w = jnp.asarray(tp["out_w"], jnp.float32)          # [D, D]
        for hh in range(nH):
            for s, nm in enumerate(("q", "k", "v")):
                c0 = s * D + hh * hd
                pk.add_mat(f"tr{l}_{nm}{hh}_w", in_w[:, c0:c0 + hd])
                pk.add_vec(f"tr{l}_{nm}{hh}_b", in_b[c0:c0 + hd])
            pk.add_mat(f"tr{l}_out{hh}_w", out_w[hh * hd:(hh + 1) * hd, :])
        pk.add_vec(f"tr{l}_out_b", tp["out_b"])
        pk.add_vec(f"tr{l}_ln1_g", tp["ln1_g"])
        pk.add_vec(f"tr{l}_ln1_b", tp["ln1_b"])
        pk.add_mat(f"tr{l}_ff1_w", tp["ff1_w"])
        pk.add_vec(f"tr{l}_ff1_b", tp["ff1_b"])
        pk.add_mat(f"tr{l}_ff2_w", tp["ff2_w"])
        pk.add_vec(f"tr{l}_ff2_b", tp["ff2_b"])
        pk.add_vec(f"tr{l}_ln2_g", tp["ln2_g"])
        pk.add_vec(f"tr{l}_ln2_b", tp["ln2_b"])

    for i in range(cfg["d_layers"]):
        pk.add_mat(f"fc{i}_w", p["fc"][i]["w"])
        pk.add_vec(f"fc{i}_b", p["fc"][i]["b"])
        if cfg["use_norm"]:
            lnp = p["ln"][cfg["lstm_layers"] + i]
            pk.add_vec(f"lnd{i}_g", lnp["g"])
            pk.add_vec(f"lnd{i}_b", lnp["b"])

    pk.add_mat("out_w", p["out"]["w"])   # lane-padded to 128 -> unmasked output stores
    pk.add_vec("out_b", p["out"]["b"])

    w_slab, v_slab = pk.finalize()
    return w_slab, v_slab, pk.mat_off, pk.vec_off


# ----------------------------- the fused forward kernel -----------------------------

def _forward_kernel(x_ref, w_ref, v_ref, o_ref, tm_ref, *,
                    cfg, mat_off, vec_off, batch, b_pad, seq):
    """Whole-model forward.

    x_ref  : [T * BP, E_pad]  time-major, batch padded to BP=8 sublanes (row t*BP + b)
    w_ref  : [R, 128]         packed weight-matrix slab
    v_ref  : [NV, 128]        packed bias / gamma / beta slab
    o_ref  : [B*T, 128]       batch-major, lane-dense output head (cols >= pred_len are 0)
    tm_ref : VMEM scratch [T*BP, H] for LSTM hidden states / relayout staging
    """
    B, BP, T = batch, b_pad, seq
    H = cfg["d_lstm"]
    D = cfg["d_model"]
    nH = cfg["n_heads"]
    hd = D // nH
    f32 = jnp.float32

    def W(name):
        r0, rp, c = mat_off[name]
        return w_ref[r0:r0 + rp, :c]

    def Wfull(name):                      # full 128 lanes (zero-padded columns)
        r0, rp, _ = mat_off[name]
        return w_ref[r0:r0 + rp, :]

    def V(name):
        r, n = vec_off[name]
        return v_ref[r:r + 1, :n]

    def Vfull(name):
        r, _ = vec_off[name]
        return v_ref[r:r + 1, :]

    def lin(x, wname, bname, relu=False):
        y = jnp.dot(x, W(wname), preferred_element_type=f32) + V(bname)
        return jnp.maximum(y, 0.0) if relu else y

    def layer_norm(x, gname, bname, relu=False, eps=1e-5):
        m = jnp.mean(x, axis=-1, keepdims=True)
        var = jnp.maximum(jnp.mean(x * x, axis=-1, keepdims=True) - m * m, 0.0)
        y = (x - m) * lax.rsqrt(var + eps) * V(gname) + V(bname)
        return jnp.maximum(y, 0.0) if relu else y

    # -------- LSTM stack (time-major, batch-vectorized; dropout = identity) --------
    x2 = x_ref[...].astype(f32)                                # [T*BP, E_pad]
    for i in range(cfg["lstm_layers"]):
        res = x2
        # Hoisted input projection for ALL time steps: one matmul, 4H = 128 lanes.
        xg = lin(x2, f"lstm{i}_wih", f"lstm{i}_b")             # [T*BP, 4H]
        whh = W(f"lstm{i}_whh")                                # [H, 4H], loaded once
        h = jnp.zeros((BP, H), f32)
        c = jnp.zeros((BP, H), f32)
        for t in range(T):                                     # unrolled recurrence
            g = xg[t * BP:(t + 1) * BP, :] + jnp.dot(h, whh,
                                                     preferred_element_type=f32)
            ig = jax.nn.sigmoid(g[:, 0 * H:1 * H])
            fg = jax.nn.sigmoid(g[:, 1 * H:2 * H])
            gg = jnp.tanh(g[:, 2 * H:3 * H])
            og = jax.nn.sigmoid(g[:, 3 * H:4 * H])
            c = fg * c + ig * gg
            h = og * jnp.tanh(c)
            tm_ref[t * BP:(t + 1) * BP, :] = h                 # aligned 8-row store
        x2 = tm_ref[...]                                       # [T*BP, H]
        if cfg["skip_co"]:
            x2 = x2 + lin(res, f"skip{i}_w", f"skip{i}_b")     # fused residual add
        if cfg["use_norm"]:
            x2 = layer_norm(x2, f"ln{i}_g", f"ln{i}_b")

    # -------- relayout: time-major [T, BP, H] -> batch-major [B*T, H] (drop pad) ----
    tm_ref[...] = x2
    x2 = jnp.concatenate(
        [tm_ref[pl.ds(b, T, stride=BP), :] for b in range(B)], axis=0)   # [B*T, H]

    # -------- projection to d_model --------
    x2 = lin(x2, "proj_w", "proj_b")                           # [B*T, D]

    # -------- transformer encoder (PyTorch defaults: post-norm, ReLU, no mask) ------
    scale = 1.0 / float(hd) ** 0.5
    for l in range(cfg["e_layers"]):
        # Per-head Q/K/V via weight blocks pre-split at pack time: every activation
        # slice below is sublane-aligned at lane offset 0.
        qh = [lin(x2, f"tr{l}_q{hh}_w", f"tr{l}_q{hh}_b") for hh in range(nH)]
        kh = [lin(x2, f"tr{l}_k{hh}_w", f"tr{l}_k{hh}_b") for hh in range(nH)]
        vh = [lin(x2, f"tr{l}_v{hh}_w", f"tr{l}_v{hh}_b") for hh in range(nH)]
        wo = [W(f"tr{l}_out{hh}_w") for hh in range(nH)]       # [hd, D] each
        blocks = []
        for b in range(B):
            r0 = b * T
            acc = None
            for hh in range(nH):
                q = qh[hh][r0:r0 + T, :]                       # [T, hd]
                k = kh[hh][r0:r0 + T, :]
                v = vh[hh][r0:r0 + T, :]
                s = lax.dot_general(q, k, (((1,), (1,)), ((), ())),
                                    preferred_element_type=f32) * scale   # [T, T]
                s = s - jnp.max(s, axis=-1, keepdims=True)
                e = jnp.exp(s)
                pr = e * pl.reciprocal(jnp.sum(e, axis=-1, keepdims=True),
                                       approx=True)
                hv = jnp.dot(pr, v, preferred_element_type=f32)           # [T, hd]
                part = jnp.dot(hv, wo[hh], preferred_element_type=f32)    # [T, D]
                acc = part if acc is None else acc + part
            blocks.append(acc)
        a2 = jnp.concatenate(blocks, axis=0) + V(f"tr{l}_out_b")          # [B*T, D]
        x2 = layer_norm(x2 + a2, f"tr{l}_ln1_g", f"tr{l}_ln1_b")
        ff = lin(x2, f"tr{l}_ff1_w", f"tr{l}_ff1_b", relu=True)
        x2 = layer_norm(x2 + lin(ff, f"tr{l}_ff2_w", f"tr{l}_ff2_b"),
                        f"tr{l}_ln2_g", f"tr{l}_ln2_b")

    # -------- decoder FC stack: linear -> (+skip) -> LayerNorm -> ReLU --------
    for i in range(cfg["d_layers"]):
        res = x2
        y = lin(x2, f"fc{i}_w", f"fc{i}_b")
        if cfg["skip_co"] and res.shape[-1] == y.shape[-1]:
            y = y + res
        if cfg["use_norm"]:
            y = layer_norm(y, f"lnd{i}_g", f"lnd{i}_b", relu=True)
        else:
            y = jnp.maximum(y, 0.0)
        x2 = y

    # -------- output head (lane-dense: weight zero-padded to 128 columns) --------
    o_ref[...] = jnp.dot(x2, Wfull("out_w"), preferred_element_type=f32) + Vfull("out_b")


# ----------------------------- model wrapper (one pallas_call) -----------------------------

def model_forward(x_enc, x_mark_enc, x_dec, x_mark_dec, params, cfg):
    # task_name == 'long_term_forecast' branch (x_mark_enc / x_dec / x_mark_dec unused).
    B, T, E = x_enc.shape
    BP = max(8, _round_up(B, 8))           # batch padded to 8 sublanes
    EP = _round_up(E, 8)                   # input features padded (matches padded W_ih rows)
    H = cfg["d_lstm"]
    f32 = jnp.float32

    # Time-major, zero-padded input: row t*BP + b holds x_enc[b, t].
    xt = jnp.transpose(x_enc.astype(f32), (1, 0, 2))           # [T, B, E]
    xt = jnp.pad(xt, ((0, 0), (0, BP - B), (0, EP - E)))
    x_tm = xt.reshape(T * BP, EP)

    w_slab, v_slab, mat_off, vec_off = _pack_params(params, cfg)

    kernel = functools.partial(_forward_kernel, cfg=cfg, mat_off=mat_off,
                               vec_off=vec_off, batch=B, b_pad=BP, seq=T)

    y2 = pl.pallas_call(
        kernel,
        out_shape=jax.ShapeDtypeStruct((B * T, 128), f32),
        scratch_shapes=[pltpu.VMEM((T * BP, H), f32)],
    )(x_tm, w_slab, v_slab)

    # output_layer result -> permute(0, 2, 1)[:, -pred_len:, :c_out]
    # (the trailing [:, -pred_len:, :] of Model.forward is the identity and is dropped;
    #  ':c_out' slices the TIME axis, which requires c_out <= seq_len).
    y = y2[:, :cfg["pred_len"]].reshape(B, T, cfg["pred_len"])
    return jnp.swapaxes(y, 1, 2)[:, :, :cfg["c_out"]]


# ----------------------------- deterministic parameter init -----------------------------

def init_params(key, cfg):
    """Parameters in kernel-ready layout: weights [in, out], vectors as [1, N]."""
    keys = iter(jax.random.split(key, 256))

    def nrm(shape, scale=0.1):
        return scale * jax.random.normal(next(keys), shape, dtype=jnp.float32)

    H, D = cfg["d_lstm"], cfg["d_model"]
    Dff, Dfc, P = cfg["d_ff"], cfg["d_fc"], cfg["pred_len"]
    p = {"lstm": [], "skip": [], "ln": [], "tr": [], "fc": []}

    prev = cfg["enc_in"]
    for _ in range(cfg["lstm_layers"]):
        # nn.LSTM: weight_ih/hh stored pre-transposed; bias = b_ih + b_hh combined.
        p["lstm"].append({"wih": nrm((prev, 4 * H)), "whh": nrm((H, 4 * H)),
                          "b": nrm((1, 4 * H))})
        if cfg["skip_co"]:
            p["skip"].append({"w": nrm((prev, H)), "b": nrm((1, H))})
        if cfg["use_norm"]:
            p["ln"].append({"g": jnp.ones((1, H), jnp.float32),
                            "b": jnp.zeros((1, H), jnp.float32)})
        prev = H

    p["proj"] = {"w": nrm((H, D)), "b": nrm((1, D))}

    for _ in range(cfg["e_layers"]):
        p["tr"].append({
            "in_w": nrm((D, 3 * D)), "in_b": nrm((1, 3 * D)),
            "out_w": nrm((D, D)), "out_b": nrm((1, D)),
            "ln1_g": jnp.ones((1, D), jnp.float32), "ln1_b": jnp.zeros((1, D), jnp.float32),
            "ff1_w": nrm((D, Dff)), "ff1_b": nrm((1, Dff)),
            "ff2_w": nrm((Dff, D)), "ff2_b": nrm((1, D)),
            "ln2_g": jnp.ones((1, D), jnp.float32), "ln2_b": jnp.zeros((1, D), jnp.float32),
        })

    prev = D
    for _ in range(cfg["d_layers"]):
        p["fc"].append({"w": nrm((prev, Dfc)), "b": nrm((1, Dfc))})
        if cfg["use_norm"]:
            p["ln"].append({"g": jnp.ones((1, Dfc), jnp.float32),
                            "b": jnp.zeros((1, Dfc), jnp.float32)})
        prev = Dfc

    p["out"] = {"w": nrm((Dfc, P)), "b": nrm((1, P))}
    return p


# ----------------------------- main -----------------------------

if __name__ == "__main__":
    cfg = dict(
        task_name="long_term_forecast",
        seq_len=8, pred_len=4, c_out=4, enc_in=4,
        d_lstm=32, lstm_layers=2,
        d_model=32, n_heads=2, d_ff=64, e_layers=1,
        d_layers=2, d_fc=32,
        dropout=0.0, skip_co=True, use_norm=True,
    )
    B = 2
    key = jax.random.PRNGKey(0)
    kx, kp = jax.random.split(key)
    x_enc = jax.random.normal(kx, (B, cfg["seq_len"], cfg["enc_in"]), jnp.float32)
    x_mark_enc = jnp.zeros((B, cfg["seq_len"], 4), jnp.float32)   # unused in forecast
    x_dec = jnp.zeros((B, cfg["pred_len"], cfg["enc_in"]), jnp.float32)
    x_mark_dec = jnp.zeros((B, cfg["pred_len"], 4), jnp.float32)

    params = init_params(kp, cfg)
    out = model_forward(x_enc, x_mark_enc, x_dec, x_mark_dec, params, cfg)
    out = jax.block_until_ready(out)

    assert out.shape == (B, cfg["pred_len"], cfg["c_out"]), out.shape
    assert bool(jnp.all(jnp.isfinite(out)))
    print("KERNEL_OK")
</pallas_src>

<mosaic_0001>
module attributes {stable_mosaic.version = 11 : i64} {
  func.func @_forward_kernel(%arg0: memref<64x8xf32, #tpu.memory_space<vmem>>, %arg1: memref<592x128xf32, #tpu.memory_space<vmem>>, %arg2: memref<32x128xf32, #tpu.memory_space<vmem>>, %arg3: memref<16x128xf32, #tpu.memory_space<vmem>>, %arg4: memref<64x32xf32, #tpu.memory_space<vmem>>) attributes {dimension_semantics = [], scalar_prefetch = 0 : i64, scratch_operands = 1 : i64, tpu.core_type = #tpu.core_type<tc>} {
    %c0 = arith.constant 0 : index
    %c0_0 = arith.constant 0 : index
    %0 = vector.load %arg0[%c0, %c0_0] : memref<64x8xf32, #tpu.memory_space<vmem>>, vector<64x8xf32>
    %c0_1 = arith.constant 0 : index
    %c0_2 = arith.constant 0 : index
    %1 = vector.load %arg1[%c0_1, %c0_2] : memref<592x128xf32, #tpu.memory_space<vmem>>, vector<8x128xf32>
    %cst = arith.constant dense<0.000000e+00> : vector<64x128xf32>
    %2 = tpu.matmul %0, %1, %cst {dimension_numbers = #tpu.dot_dimension_numbers<[1], [0], [0], [1], [0, 0, 1, 1], [], []>} : vector<64x8xf32>, vector<8x128xf32>, vector<64x128xf32> -> vector<64x128xf32>
    %c0_3 = arith.constant 0 : index
    %c0_4 = arith.constant 0 : index
    %3 = vector.load %arg2[%c0_3, %c0_4] : memref<32x128xf32, #tpu.memory_space<vmem>>, vector<1x128xf32>
    %4 = vector.broadcast %3 : vector<1x128xf32> to vector<64x128xf32>
    %5 = arith.addf %2, %4 : vector<64x128xf32>
    %c8 = arith.constant 8 : index
    %c0_5 = arith.constant 0 : index
    %6 = vector.load %arg1[%c8, %c0_5] : memref<592x128xf32, #tpu.memory_space<vmem>>, vector<32x128xf32>
    %cst_6 = arith.constant 0.000000e+00 : f32
    %7 = vector.broadcast %cst_6 : f32 to vector<8x32xf32>
    %cst_7 = arith.constant 0.000000e+00 : f32
    %8 = vector.broadcast %cst_7 : f32 to vector<8x32xf32>
    %9 = vector.extract_strided_slice %5 {offsets = [0, 0], sizes = [8, 128], strides = [1, 1]} : vector<64x128xf32> to vector<8x128xf32>
    %cst_8 = arith.constant dense<0.000000e+00> : vector<8x128xf32>
    %10 = tpu.matmul %7, %6, %cst_8 {dimension_numbers = #tpu.dot_dimension_numbers<[1], [0], [0], [1], [0, 0, 1, 1], [], []>} : vector<8x32xf32>, vector<32x128xf32>, vector<8x128xf32> -> vector<8x128xf32>
    %11 = arith.addf %9, %10 : vector<8x128xf32>
    %12 = vector.extract_strided_slice %11 {offsets = [0, 0], sizes = [8, 32], strides = [1, 1]} : vector<8x128xf32> to vector<8x32xf32>
    %13 = arith.negf %12 : vector<8x32xf32>
    %14 = math.exp %13 : vector<8x32xf32>
    %cst_9 = arith.constant 1.000000e+00 : f32
    %15 = vector.broadcast %cst_9 : f32 to vector<8x32xf32>
    %16 = arith.addf %15, %14 : vector<8x32xf32>
    %17 = arith.divf %15, %16 : vector<8x32xf32>
    %18 = vector.extract_strided_slice %11 {offsets = [0, 32], sizes = [8, 32], strides = [1, 1]} : vector<8x128xf32> to vector<8x32xf32>
    %19 = arith.negf %18 : vector<8x32xf32>
    %20 = math.exp %19 : vector<8x32xf32>
    %cst_10 = arith.constant 1.000000e+00 : f32
    %21 = vector.broadcast %cst_10 : f32 to vector<8x32xf32>
    %22 = arith.addf %21, %20 : vector<8x32xf32>
    %23 = arith.divf %21, %22 : vector<8x32xf32>
    %24 = vector.extract_strided_slice %11 {offsets = [0, 64], sizes = [8, 32], strides = [1, 1]} : vector<8x128xf32> to vector<8x32xf32>
    %25 = math.tanh %24 : vector<8x32xf32>
    %26 = vector.extract_strided_slice %11 {offsets = [0, 96], sizes = [8, 32], strides = [1, 1]} : vector<8x128xf32> to vector<8x32xf32>
    %27 = arith.negf %26 : vector<8x32xf32>
    %28 = math.exp %27 : vector<8x32xf32>
    %cst_11 = arith.constant 1.000000e+00 : f32
    %29 = vector.broadcast %cst_11 : f32 to vector<8x32xf32>
    %30 = arith.addf %29, %28 : vector<8x32xf32>
    %31 = arith.divf %29, %30 : vector<8x32xf32>
    %32 = arith.mulf %23, %8 : vector<8x32xf32>
    %33 = arith.mulf %17, %25 : vector<8x32xf32>
    %34 = arith.addf %32, %33 : vector<8x32xf32>
    %35 = math.tanh %34 : vector<8x32xf32>
    %36 = arith.mulf %31, %35 : vector<8x32xf32>
    %c0_12 = arith.constant 0 : index
    %c0_13 = arith.constant 0 : index
    %37 = vector.load %arg4[%c0_12, %c0_13] : memref<64x32xf32, #tpu.memory_space<vmem>>, vector<8x32xf32>
    tpu.vector_store %arg4[%c0_12, %c0_13], %36 {strides = array<i32>} : memref<64x32xf32, #tpu.memory_space<vmem>>, vector<8x32xf32>,
    %38 = vector.extract_strided_slice %5 {offsets = [8, 0], sizes = [8, 128], strides = [1, 1]} : vector<64x128xf32> to vector<8x128xf32>
    %cst_14 = arith.constant dense<0.000000e+00> : vector<8x128xf32>
    %39 = tpu.matmul %36, %6, %cst_14 {dimension_numbers = #tpu.dot_dimension_numbers<[1], [0], [0], [1], [0, 0, 1, 1], [], []>} : vector<8x32xf32>, vector<32x128xf32>, vector<8x128xf32> -> vector<8x128xf32>
    %40 = arith.addf %38, %39 : vector<8x128xf32>
    %41 = vector.extract_strided_slice %40 {offsets = [0, 0], sizes = [8, 32], strides = [1, 1]} : vector<8x128xf32> to vector<8x32xf32>
    %42 = arith.negf %41 : vector<8x32xf32>
    %43 = math.exp %42 : vector<8x32xf32>
    %cst_15 = arith.constant 1.000000e+00 : f32
    %44 = vector.broadcast %cst_15 : f32 to vector<8x32xf32>
    %45 = arith.addf %44, %43 : vector<8x32xf32>
    %46 = arith.divf %44, %45 : vector<8x32xf32>
    %47 = vector.extract_strided_slice %40 {offsets = [0, 32], sizes = [8, 32], strides = [1, 1]} : vector<8x128xf32> to vector<8x32xf32>
    %48 = arith.negf %47 : vector<8x32xf32>
    %49 = math.exp %48 : vector<8x32xf32>
    %cst_16 = arith.constant 1.000000e+00 : f32
    %50 = vector.broadcast %cst_16 : f32 to vector<8x32xf32>
    %51 = arith.addf %50, %49 : vector<8x32xf32>
    %52 = arith.divf %50, %51 : vector<8x32xf32>
    %53 = vector.extract_strided_slice %40 {offsets = [0, 64], sizes = [8, 32], strides = [1, 1]} : vector<8x128xf32> to vector<8x32xf32>
    %54 = math.tanh %53 : vector<8x32xf32>
    %55 = vector.extract_strided_slice %40 {offsets = [0, 96], sizes = [8, 32], strides = [1, 1]} : vector<8x128xf32> to vector<8x32xf32>
    %56 = arith.negf %55 : vector<8x32xf32>
    %57 = math.exp %56 : vector<8x32xf32>
    %cst_17 = arith.constant 1.000000e+00 : f32
    %58 = vector.broadcast %cst_17 : f32 to vector<8x32xf32>
    %59 = arith.addf %58, %57 : vector<8x32xf32>
    %60 = arith.divf %58, %59 : vector<8x32xf32>
    %61 = arith.mulf %52, %34 : vector<8x32xf32>
    %62 = arith.mulf %46, %54 : vector<8x32xf32>
    %63 = arith.addf %61, %62 : vector<8x32xf32>
    %64 = math.tanh %63 : vector<8x32xf32>
    %65 = arith.mulf %60, %64 : vector<8x32xf32>
    %c8_18 = arith.constant 8 : index
    %c0_19 = arith.constant 0 : index
    %66 = vector.load %arg4[%c8_18, %c0_19] : memref<64x32xf32, #tpu.memory_space<vmem>>, vector<8x32xf32>
    tpu.vector_store %arg4[%c8_18, %c0_19], %65 {strides = array<i32>} : memref<64x32xf32, #tpu.memory_space<vmem>>, vector<8x32xf32>,
    %67 = vector.extract_strided_slice %5 {offsets = [16, 0], sizes = [8, 128], strides = [1, 1]} : vector<64x128xf32> to vector<8x128xf32>
    %cst_20 = arith.constant dense<0.000000e+00> : vector<8x128xf32>
    %68 = tpu.matmul %65, %6, %cst_20 {dimension_numbers = #tpu.dot_dimension_numbers<[1], [0], [0], [1], [0, 0, 1, 1], [], []>} : vector<8x32xf32>, vector<32x128xf32>, vector<8x128xf32> -> vector<8x128xf32>
    %69 = arith.addf %67, %68 : vector<8x128xf32>
    %70 = vector.extract_strided_slice %69 {offsets = [0, 0], sizes = [8, 32], strides = [1, 1]} : vector<8x128xf32> to vector<8x32xf32>
    %71 = arith.negf %70 : vector<8x32xf32>
    %72 = math.exp %71 : vector<8x32xf32>
    %cst_21 = arith.constant 1.000000e+00 : f32
    %73 = vector.broadcast %cst_21 : f32 to vector<8x32xf32>
    %74 = arith.addf %73, %72 : vector<8x32xf32>
    %75 = arith.divf %73, %74 : vector<8x32xf32>
    %76 = vector.extract_strided_slice %69 {offsets = [0, 32], sizes = [8, 32], strides = [1, 1]} : vector<8x128xf32> to vector<8x32xf32>
    %77 = arith.negf %76 : vector<8x32xf32>
    %78 = math.exp %77 : vector<8x32xf32>
    %cst_22 = arith.constant 1.000000e+00 : f32
    %79 = vector.broadcast %cst_22 : f32 to vector<8x32xf32>
    %80 = arith.addf %79, %78 : vector<8x32xf32>
    %81 = arith.divf %79, %80 : vector<8x32xf32>
    %82 = vector.extract_strided_slice %69 {offsets = [0, 64], sizes = [8, 32], strides = [1, 1]} : vector<8x128xf32> to vector<8x32xf32>
    %83 = math.tanh %82 : vector<8x32xf32>
    %84 = vector.extract_strided_slice %69 {offsets = [0, 96], sizes = [8, 32], strides = [1, 1]} : vector<8x128xf32> to vector<8x32xf32>
    %85 = arith.negf %84 : vector<8x32xf32>
    %86 = math.exp %85 : vector<8x32xf32>
    %cst_23 = arith.constant 1.000000e+00 : f32
    %87 = vector.broadcast %cst_23 : f32 to vector<8x32xf32>
    %88 = arith.addf %87, %86 : vector<8x32xf32>
    %89 = arith.divf %87, %88 : vector<8x32xf32>
    %90 = arith.mulf %81, %63 : vector<8x32xf32>
    %91 = arith.mulf %75, %83 : vector<8x32xf32>
    %92 = arith.addf %90, %91 : vector<8x32xf32>
    %93 = math.tanh %92 : vector<8x32xf32>
    %94 = arith.mulf %89, %93 : vector<8x32xf32>
    %c16 = arith.constant 16 : index
    %c0_24 = arith.constant 0 : index
    %95 = vector.load %arg4[%c16, %c0_24] : memref<64x32xf32, #tpu.memory_space<vmem>>, vector<8x32xf32>
    tpu.vector_store %arg4[%c16, %c0_24], %94 {strides = array<i32>} : memref<64x32xf32, #tpu.memory_space<vmem>>, vector<8x32xf32>,
    %96 = vector.extract_strided_slice %5 {offsets = [24, 0], sizes = [8, 128], strides = [1, 1]} : vector<64x128xf32> to vector<8x128xf32>
    %cst_25 = arith.constant dense<0.000000e+00> : vector<8x128xf32>
    %97 = tpu.matmul %94, %6, %cst_25 {dimension_numbers = #tpu.dot_dimension_numbers<[1], [0], [0], [1], [0, 0, 1, 1], [], []>} : vector<8x32xf32>, vector<32x128xf32>, vector<8x128xf32> -> vector<8x128xf32>
    %98 = arith.addf %96, %97 : vector<8x128xf32>
    %99 = vector.extract_strided_slice %98 {offsets = [0, 0], sizes = [8, 32], strides = [1, 1]} : vector<8x128xf32> to vector<8x32xf32>
    %100 = arith.negf %99 : vector<8x32xf32>
    %101 = math.exp %100 : vector<8x32xf32>
    %cst_26 = arith.constant 1.000000e+00 : f32
    %102 = vector.broadcast %cst_26 : f32 to vector<8x32xf32>
    %103 = arith.addf %102, %101 : vector<8x32xf32>
    %104 = arith.divf %102, %103 : vector<8x32xf32>
    %105 = vector.extract_strided_slice %98 {offsets = [0, 32], sizes = [8, 32], strides = [1, 1]} : vector<8x128xf32> to vector<8x32xf32>
    %106 = arith.negf %105 : vector<8x32xf32>
    %107 = math.exp %106 : vector<8x32xf32>
    %cst_27 = arith.constant 1.000000e+00 : f32
    %108 = vector.broadcast %cst_27 : f32 to vector<8x32xf32>
    %109 = arith.addf %108, %107 : vector<8x32xf32>
    %110 = arith.divf %108, %109 : vector<8x32xf32>
    %111 = vector.extract_strided_slice %98 {offsets = [0, 64], sizes = [8, 32], strides = [1, 1]} : vector<8x128xf32> to vector<8x32xf32>
    %112 = math.tanh %111 : vector<8x32xf32>
    %113 = vector.extract_strided_slice %98 {offsets = [0, 96], sizes = [8, 32], strides = [1, 1]} : vector<8x128xf32> to vector<8x32xf32>
    %114 = arith.negf %113 : vector<8x32xf32>
    %115 = math.exp %114 : vector<8x32xf32>
    %cst_28 = arith.constant 1.000000e+00 : f32
    %116 = vector.broadcast %cst_28 : f32 to vector<8x32xf32>
    %117 = arith.addf %116, %115 : vector<8x32xf32>
    %118 = arith.divf %116, %117 : vector<8x32xf32>
    %119 = arith.mulf %110, %92 : vector<8x32xf32>
    %120 = arith.mulf %104, %112 : vector<8x32xf32>
    %121 = arith.addf %119, %120 : vector<8x32xf32>
    %122 = math.tanh %121 : vector<8x32xf32>
    %123 = arith.mulf %118, %122 : vector<8x32xf32>
    %c24 = arith.constant 24 : index
    %c0_29 = arith.constant 0 : index
    %124 = vector.load %arg4[%c24, %c0_29] : memref<64x32xf32, #tpu.memory_space<vmem>>, vector<8x32xf32>
    tpu.vector_store %arg4[%c24, %c0_29], %123 {strides = array<i32>} : memref<64x32xf32, #tpu.memory_space<vmem>>, vector<8x32xf32>,
    %125 = vector.extract_strided_slice %5 {offsets = [32, 0], sizes = [8, 128], strides = [1, 1]} : vector<64x128xf32> to vector<8x128xf32>
    %cst_30 = arith.constant dense<0.000000e+00> : vector<8x128xf32>
    %126 = tpu.matmul %123, %6, %cst_30 {dimension_numbers = #tpu.dot_dimension_numbers<[1], [0], [0], [1], [0, 0, 1, 1], [], []>} : vector<8x32xf32>, vector<32x128xf32>, vector<8x128xf32> -> vector<8x128xf32>
    %127 = arith.addf %125, %126 : vector<8x128xf32>
    %128 = vector.extract_strided_slice %127 {offsets = [0, 0], sizes = [8, 32], strides = [1, 1]} : vector<8x128xf32> to vector<8x32xf32>
    %129 = arith.negf %128 : vector<8x32xf32>
    %130 = math.exp %129 : vector<8x32xf32>
    %cst_31 = arith.constant 1.000000e+00 : f32
    %131 = vector.broadcast %cst_31 : f32 to vector<8x32xf32>
    %132 = arith.addf %131, %130 : vector<8x32xf32>
    %133 = arith.divf %131, %132 : vector<8x32xf32>
    %134 = vector.extract_strided_slice %127 {offsets = [0, 32], sizes = [8, 32], strides = [1, 1]} : vector<8x128xf32> to vector<8x32xf32>
    %135 = arith.negf %134 : vector<8x32xf32>
    %136 = math.exp %135 : vector<8x32xf32>
    %cst_32 = arith.constant 1.000000e+00 : f32
    %137 = vector.broadcast %cst_32 : f32 to vector<8x32xf32>
    %138 = arith.addf %137, %136 : vector<8x32xf32>
    %139 = arith.divf %137, %138 : vector<8x32xf32>
    %140 = vector.extract_strided_slice %127 {offsets = [0, 64], sizes = [8, 32], strides = [1, 1]} : vector<8x128xf32> to vector<8x32xf32>
    %141 = math.tanh %140 : vector<8x32xf32>
    %142 = vector.extract_strided_slice %127 {offsets = [0, 96], sizes = [8, 32], strides = [1, 1]} : vector<8x128xf32> to vector<8x32xf32>
    %143 = arith.negf %142 : vector<8x32xf32>
    %144 = math.exp %143 : vector<8x32xf32>
    %cst_33 = arith.constant 1.000000e+00 : f32
    %145 = vector.broadcast %cst_33 : f32 to vector<8x32xf32>
    %146 = arith.addf %145, %144 : vector<8x32xf32>
    %147 = arith.divf %145, %146 : vector<8x32xf32>
    %148 = arith.mulf %139, %121 : vector<8x32xf32>
    %149 = arith.mulf %133, %141 : vector<8x32xf32>
    %150 = arith.addf %148, %149 : vector<8x32xf32>
    %151 = math.tanh %150 : vector<8x32xf32>
    %152 = arith.mulf %147, %151 : vector<8x32xf32>
    %c32 = arith.constant 32 : index
    %c0_34 = arith.constant 0 : index
    %153 = vector.load %arg4[%c32, %c0_34] : memref<64x32xf32, #tpu.memory_space<vmem>>, vector<8x32xf32>
    tpu.vector_store %arg4[%c32, %c0_34], %152 {strides = array<i32>} : memref<64x32xf32, #tpu.memory_space<vmem>>, vector<8x32xf32>,
    %154 = vector.extract_strided_slice %5 {offsets = [40, 0], sizes = [8, 128], strides = [1, 1]} : vector<64x128xf32> to vector<8x128xf32>
    %cst_35 = arith.constant dense<0.000000e+00> : vector<8x128xf32>
    %155 = tpu.matmul %152, %6, %cst_35 {dimension_numbers = #tpu.dot_dimension_numbers<[1], [0], [0], [1], [0, 0, 1, 1], [], []>} : vector<8x32xf32>, vector<32x128xf32>, vector<8x128xf32> -> vector<8x128xf32>
    %156 = arith.addf %154, %155 : vector<8x128xf32>
    %157 = vector.extract_strided_slice %156 {offsets = [0, 0], sizes = [8, 32], strides = [1, 1]} : vector<8x128xf32> to vector<8x32xf32>
    %158 = arith.negf %157 : vector<8x32xf32>
    %159 = math.exp %158 : vector<8x32xf32>
    %cst_36 = arith.constant 1.000000e+00 : f32
    %160 = vector.broadcast %cst_36 : f32 to vector<8x32xf32>
    %161 = arith.addf %160, %159 : vector<8x32xf32>
    %162 = arith.divf %160, %161 : vector<8x32xf32>
    %163 = vector.extract_strided_slice %156 {offsets = [0, 32], sizes = [8, 32], strides = [1, 1]} : vector<8x128xf32> to vector<8x32xf32>
    %164 = arith.negf %163 : vector<8x32xf32>
    %165 = math.exp %164 : vector<8x32xf32>
    %cst_37 = arith.constant 1.000000e+00 : f32
    %166 = vector.broadcast %cst_37 : f32 to vector<8x32xf32>
    %167 = arith.addf %166, %165 : vector<8x32xf32>
    %168 = arith.divf %166, %167 : vector<8x32xf32>
    %169 = vector.extract_strided_slice %156 {offsets = [0, 64], sizes = [8, 32], strides = [1, 1]} : vector<8x128xf32> to vector<8x32xf32>
    %170 = math.tanh %169 : vector<8x32xf32>
    %171 = vector.extract_strided_slice %156 {offsets = [0, 96], sizes = [8, 32], strides = [1, 1]} : vector<8x128xf32> to vector<8x32xf32>
    %172 = arith.negf %171 : vector<8x32xf32>
    %173 = math.exp %172 : vector<8x32xf32>
    %cst_38 = arith.constant 1.000000e+00 : f32
    %174 = vector.broadcast %cst_38 : f32 to vector<8x32xf32>
    %175 = arith.addf %174, %173 : vector<8x32xf32>
    %176 = arith.divf %174, %175 : vector<8x32xf32>
    %177 = arith.mulf %168, %150 : vector<8x32xf32>
    %178 = arith.mulf %162, %170 : vector<8x32xf32>
    %179 = arith.addf %177, %178 : vector<8x32xf32>
    %180 = math.tanh %179 : vector<8x32xf32>
    %181 = arith.mulf %176, %180 : vector<8x32xf32>
    %c40 = arith.constant 40 : index
    %c0_39 = arith.constant 0 : index
    %182 = vector.load %arg4[%c40, %c0_39] : memref<64x32xf32, #tpu.memory_space<vmem>>, vector<8x32xf32>
    tpu.vector_store %arg4[%c40, %c0_39], %181 {strides = array<i32>} : memref<64x32xf32, #tpu.memory_space<vmem>>, vector<8x32xf32>,
    %183 = vector.extract_strided_slice %5 {offsets = [48, 0], sizes = [8, 128], strides = [1, 1]} : vector<64x128xf32> to vector<8x128xf32>
    %cst_40 = arith.constant dense<0.000000e+00> : vector<8x128xf32>
    %184 = tpu.matmul %181, %6, %cst_40 {dimension_numbers = #tpu.dot_dimension_numbers<[1], [0], [0], [1], [0, 0, 1, 1], [], []>} : vector<8x32xf32>, vector<32x128xf32>, vector<8x128xf32> -> vector<8x128xf32>
    %185 = arith.addf %183, %184 : vector<8x128xf32>
    %186 = vector.extract_strided_slice %185 {offsets = [0, 0], sizes = [8, 32], strides = [1, 1]} : vector<8x128xf32> to vector<8x32xf32>
    %187 = arith.negf %186 : vector<8x32xf32>
    %188 = math.exp %187 : vector<8x32xf32>
    %cst_41 = arith.constant 1.000000e+00 : f32
    %189 = vector.broadcast %cst_41 : f32 to vector<8x32xf32>
    %190 = arith.addf %189, %188 : vector<8x32xf32>
    %191 = arith.divf %189, %190 : vector<8x32xf32>
    %192 = vector.extract_strided_slice %185 {offsets = [0, 32], sizes = [8, 32], strides = [1, 1]} : vector<8x128xf32> to vector<8x32xf32>
    %193 = arith.negf %192 : vector<8x32xf32>
    %194 = math.exp %193 : vector<8x32xf32>
    %cst_42 = arith.constant 1.000000e+00 : f32
    %195 = vector.broadcast %cst_42 : f32 to vector<8x32xf32>
    %196 = arith.addf %195, %194 : vector<8x32xf32>
    %197 = arith.divf %195, %196 : vector<8x32xf32>
    %198 = vector.extract_strided_slice %185 {offsets = [0, 64], sizes = [8, 32], strides = [1, 1]} : vector<8x128xf32> to vector<8x32xf32>
    %199 = math.tanh %198 : vector<8x32xf32>
    %200 = vector.extract_strided_slice %185 {offsets = [0, 96], sizes = [8, 32], strides = [1, 1]} : vector<8x128xf32> to vector<8x32xf32>
    %201 = arith.negf %200 : vector<8x32xf32>
    %202 = math.exp %201 : vector<8x32xf32>
    %cst_43 = arith.constant 1.000000e+00 : f32
    %203 = vector.broadcast %cst_43 : f32 to vector<8x32xf32>
    %204 = arith.addf %203, %202 : vector<8x32xf32>
    %205 = arith.divf %203, %204 : vector<8x32xf32>
    %206 = arith.mulf %197, %179 : vector<8x32xf32>
    %207 = arith.mulf %191, %199 : vector<8x32xf32>
    %208 = arith.addf %206, %207 : vector<8x32xf32>
    %209 = math.tanh %208 : vector<8x32xf32>
    %210 = arith.mulf %205, %209 : vector<8x32xf32>
    %c48 = arith.constant 48 : index
    %c0_44 = arith.constant 0 : index
    %211 = vector.load %arg4[%c48, %c0_44] : memref<64x32xf32, #tpu.memory_space<vmem>>, vector<8x32xf32>
    tpu.vector_store %arg4[%c48, %c0_44], %210 {strides = array<i32>} : memref<64x32xf32, #tpu.memory_space<vmem>>, vector<8x32xf32>,
    %212 = vector.extract_strided_slice %5 {offsets = [56, 0], sizes = [8, 128], strides = [1, 1]} : vector<64x128xf32> to vector<8x128xf32>
    %cst_45 = arith.constant dense<0.000000e+00> : vector<8x128xf32>
    %213 = tpu.matmul %210, %6, %cst_45 {dimension_numbers = #tpu.dot_dimension_numbers<[1], [0], [0], [1], [0, 0, 1, 1], [], []>} : vector<8x32xf32>, vector<32x128xf32>, vector<8x128xf32> -> vector<8x128xf32>
    %214 = arith.addf %212, %213 : vector<8x128xf32>
    %215 = vector.extract_strided_slice %214 {offsets = [0, 0], sizes = [8, 32], strides = [1, 1]} : vector<8x128xf32> to vector<8x32xf32>
    %216 = arith.negf %215 : vector<8x32xf32>
    %217 = math.exp %216 : vector<8x32xf32>
    %cst_46 = arith.constant 1.000000e+00 : f32
    %218 = vector.broadcast %cst_46 : f32 to vector<8x32xf32>
    %219 = arith.addf %218, %217 : vector<8x32xf32>
    %220 = arith.divf %218, %219 : vector<8x32xf32>
    %221 = vector.extract_strided_slice %214 {offsets = [0, 32], sizes = [8, 32], strides = [1, 1]} : vector<8x128xf32> to vector<8x32xf32>
    %222 = arith.negf %221 : vector<8x32xf32>
    %223 = math.exp %222 : vector<8x32xf32>
    %cst_47 = arith.constant 1.000000e+00 : f32
    %224 = vector.broadcast %cst_47 : f32 to vector<8x32xf32>
    %225 = arith.addf %224, %223 : vector<8x32xf32>
    %226 = arith.divf %224, %225 : vector<8x32xf32>
    %227 = vector.extract_strided_slice %214 {offsets = [0, 64], sizes = [8, 32], strides = [1, 1]} : vector<8x128xf32> to vector<8x32xf32>
    %228 = math.tanh %227 : vector<8x32xf32>
    %229 = vector.extract_strided_slice %214 {offsets = [0, 96], sizes = [8, 32], strides = [1, 1]} : vector<8x128xf32> to vector<8x32xf32>
    %230 = arith.negf %229 : vector<8x32xf32>
    %231 = math.exp %230 : vector<8x32xf32>
    %cst_48 = arith.constant 1.000000e+00 : f32
    %232 = vector.broadcast %cst_48 : f32 to vector<8x32xf32>
    %233 = arith.addf %232, %231 : vector<8x32xf32>
    %234 = arith.divf %232, %233 : vector<8x32xf32>
    %235 = arith.mulf %226, %208 : vector<8x32xf32>
    %236 = arith.mulf %220, %228 : vector<8x32xf32>
    %237 = arith.addf %235, %236 : vector<8x32xf32>
    %238 = math.tanh %237 : vector<8x32xf32>
    %239 = arith.mulf %234, %238 : vector<8x32xf32>
    %c56 = arith.constant 56 : index
    %c0_49 = arith.constant 0 : index
    %240 = vector.load %arg4[%c56, %c0_49] : memref<64x32xf32, #tpu.memory_space<vmem>>, vector<8x32xf32>
    tpu.vector_store %arg4[%c56, %c0_49], %239 {strides = array<i32>} : memref<64x32xf32, #tpu.memory_space<vmem>>, vector<8x32xf32>,
    %c0_50 = arith.constant 0 : index
    %c0_51 = arith.constant 0 : index
    %241 = vector.load %arg4[%c0_50, %c0_51] : memref<64x32xf32, #tpu.memory_space<vmem>>, vector<64x32xf32>
    %c40_52 = arith.constant 40 : index
    %c0_53 = arith.constant 0 : index
    %242 = vector.load %arg1[%c40_52, %c0_53] : memref<592x128xf32, #tpu.memory_space<vmem>>, vector<8x32xf32>
    %cst_54 = arith.constant dense<0.000000e+00> : vector<64x32xf32>
    %243 = tpu.matmul %0, %242, %cst_54 {dimension_numbers = #tpu.dot_dimension_numbers<[1], [0], [0], [1], [0, 0, 1, 1], [], []>} : vector<64x8xf32>, vector<8x32xf32>, vector<64x32xf32> -> vector<64x32xf32>
    %c1 = arith.constant 1 : index
    %c0_55 = arith.constant 0 : index
    %244 = vector.load %arg2[%c1, %c0_55] : memref<32x128xf32, #tpu.memory_space<vmem>>, vector<1x32xf32>
    %245 = vector.broadcast %244 : vector<1x32xf32> to vector<64x32xf32>
    %246 = arith.addf %243, %245 : vector<64x32xf32>
    %247 = arith.addf %241, %246 : vector<64x32xf32>
    %cst_56 = arith.constant dense<0.000000e+00> : vector<64xf32>
    %248 = vector.multi_reduction <add>, %247, %cst_56 [1] : vector<64x32xf32> to vector<64xf32>
    %249 = vector.shape_cast %248 : vector<64xf32> to vector<64x1xf32>
    %cst_57 = arith.constant 3.200000e+01 : f32
    %250 = vector.broadcast %cst_57 : f32 to vector<64x1xf32>
    %251 = arith.divf %249, %250 : vector<64x1xf32>
    %252 = arith.mulf %247, %247 : vector<64x32xf32>
    %cst_58 = arith.constant dense<0.000000e+00> : vector<64xf32>
    %253 = vector.multi_reduction <add>, %252, %cst_58 [1] : vector<64x32xf32> to vector<64xf32>
    %254 = vector.shape_cast %253 : vector<64xf32> to vector<64x1xf32>
    %cst_59 = arith.constant 3.200000e+01 : f32
    %255 = vector.broadcast %cst_59 : f32 to vector<64x1xf32>
    %256 = arith.divf %254, %255 : vector<64x1xf32>
    %257 = arith.mulf %251, %251 : vector<64x1xf32>
    %258 = arith.subf %256, %257 : vector<64x1xf32>
    %cst_60 = arith.constant 0.000000e+00 : f32
    %259 = vector.broadcast %cst_60 : f32 to vector<64x1xf32>
    %260 = arith.maximumf %258, %259 : vector<64x1xf32>
    %261 = vector.broadcast %251 : vector<64x1xf32> to vector<64x32xf32>
    %262 = arith.subf %247, %261 : vector<64x32xf32>
    %cst_61 = arith.constant 9.99999974E-6 : f32
    %263 = vector.broadcast %cst_61 : f32 to vector<64x1xf32>
    %264 = arith.addf %260, %263 : vector<64x1xf32>
    %265 = math.rsqrt %264 : vector<64x1xf32>
    %266 = vector.broadcast %265 : vector<64x1xf32> to vector<64x32xf32>
    %267 = arith.mulf %262, %266 : vector<64x32xf32>
    %c2 = arith.constant 2 : index
    %c0_62 = arith.constant 0 : index
    %268 = vector.load %arg2[%c2, %c0_62] : memref<32x128xf32, #tpu.memory_space<vmem>>, vector<1x32xf32>
    %269 = vector.broadcast %268 : vector<1x32xf32> to vector<64x32xf32>
    %270 = arith.mulf %267, %269 : vector<64x32xf32>
    %c3 = arith.constant 3 : index
    %c0_63 = arith.constant 0 : index
    %271 = vector.load %arg2[%c3, %c0_63] : memref<32x128xf32, #tpu.memory_space<vmem>>, vector<1x32xf32>
    %272 = vector.broadcast %271 : vector<1x32xf32> to vector<64x32xf32>
    %273 = arith.addf %270, %272 : vector<64x32xf32>
    %c48_64 = arith.constant 48 : index
    %c0_65 = arith.constant 0 : index
    %274 = vector.load %arg1[%c48_64, %c0_65] : memref<592x128xf32, #tpu.memory_space<vmem>>, vector<32x128xf32>
    %cst_66 = arith.constant dense<0.000000e+00> : vector<64x128xf32>
    %275 = tpu.matmul %273, %274, %cst_66 {dimension_numbers = #tpu.dot_dimension_numbers<[1], [0], [0], [1], [0, 0, 1, 1], [], []>} : vector<64x32xf32>, vector<32x128xf32>, vector<64x128xf32> -> vector<64x128xf32>
    %c4 = arith.constant 4 : index
    %c0_67 = arith.constant 0 : index
    %276 = vector.load %arg2[%c4, %c0_67] : memref<32x128xf32, #tpu.memory_space<vmem>>, vector<1x128xf32>
    %277 = vector.broadcast %276 : vector<1x128xf32> to vector<64x128xf32>
    %278 = arith.addf %275, %277 : vector<64x128xf32>
    %c80 = arith.constant 80 : index
    %c0_68 = arith.constant 0 : index
    %279 = vector.load %arg1[%c80, %c0_68] : memref<592x128xf32, #tpu.memory_space<vmem>>, vector<32x128xf32>
    %cst_69 = arith.constant 0.000000e+00 : f32
    %280 = vector.broadcast %cst_69 : f32 to vector<8x32xf32>
    %cst_70 = arith.constant 0.000000e+00 : f32
    %281 = vector.broadcast %cst_70 : f32 to vector<8x32xf32>
    %282 = vector.extract_strided_slice %278 {offsets = [0, 0], sizes = [8, 128], strides = [1, 1]} : vector<64x128xf32> to vector<8x128xf32>
    %cst_71 = arith.constant dense<0.000000e+00> : vector<8x128xf32>
    %283 = tpu.matmul %280, %279, %cst_71 {dimension_numbers = #tpu.dot_dimension_numbers<[1], [0], [0], [1], [0, 0, 1, 1], [], []>} : vector<8x32xf32>, vector<32x128xf32>, vector<8x128xf32> -> vector<8x128xf32>
    %284 = arith.addf %282, %283 : vector<8x128xf32>
    %285 = vector.extract_strided_slice %284 {offsets = [0, 0], sizes = [8, 32], strides = [1, 1]} : vector<8x128xf32> to vector<8x32xf32>
    %286 = arith.negf %285 : vector<8x32xf32>
    %287 = math.exp %286 : vector<8x32xf32>
    %cst_72 = arith.constant 1.000000e+00 : f32
    %288 = vector.broadcast %cst_72 : f32 to vector<8x32xf32>
    %289 = arith.addf %288, %287 : vector<8x32xf32>
    %290 = arith.divf %288, %289 : vector<8x32xf32>
    %291 = vector.extract_strided_slice %284 {offsets = [0, 32], sizes = [8, 32], strides = [1, 1]} : vector<8x128xf32> to vector<8x32xf32>
    %292 = arith.negf %291 : vector<8x32xf32>
    %293 = math.exp %292 : vector<8x32xf32>
    %cst_73 = arith.constant 1.000000e+00 : f32
    %294 = vector.broadcast %cst_73 : f32 to vector<8x32xf32>
    %295 = arith.addf %294, %293 : vector<8x32xf32>
    %296 = arith.divf %294, %295 : vector<8x32xf32>
    %297 = vector.extract_strided_slice %284 {offsets = [0, 64], sizes = [8, 32], strides = [1, 1]} : vector<8x128xf32> to vector<8x32xf32>
    %298 = math.tanh %297 : vector<8x32xf32>
    %299 = vector.extract_strided_slice %284 {offsets = [0, 96], sizes = [8, 32], strides = [1, 1]} : vector<8x128xf32> to vector<8x32xf32>
    %300 = arith.negf %299 : vector<8x32xf32>
    %301 = math.exp %300 : vector<8x32xf32>
    %cst_74 = arith.constant 1.000000e+00 : f32
    %302 = vector.broadcast %cst_74 : f32 to vector<8x32xf32>
    %303 = arith.addf %302, %301 : vector<8x32xf32>
    %304 = arith.divf %302, %303 : vector<8x32xf32>
    %305 = arith.mulf %296, %281 : vector<8x32xf32>
    %306 = arith.mulf %290, %298 : vector<8x32xf32>
    %307 = arith.addf %305, %306 : vector<8x32xf32>
    %308 = math.tanh %307 : vector<8x32xf32>
    %309 = arith.mulf %304, %308 : vector<8x32xf32>
    %c0_75 = arith.constant 0 : index
    %c0_76 = arith.constant 0 : index
    %310 = vector.load %arg4[%c0_75, %c0_76] : memref<64x32xf32, #tpu.memory_space<vmem>>, vector<8x32xf32>
    tpu.vector_store %arg4[%c0_75, %c0_76], %309 {strides = array<i32>} : memref<64x32xf32, #tpu.memory_space<vmem>>, vector<8x32xf32>,
    %311 = vector.extract_strided_slice %278 {offsets = [8, 0], sizes = [8, 128], strides = [1, 1]} : vector<64x128xf32> to vector<8x128xf32>
    %cst_77 = arith.constant dense<0.000000e+00> : vector<8x128xf32>
    %312 = tpu.matmul %309, %279, %cst_77 {dimension_numbers = #tpu.dot_dimension_numbers<[1], [0], [0], [1], [0, 0, 1, 1], [], []>} : vector<8x32xf32>, vector<32x128xf32>, vector<8x128xf32> -> vector<8x128xf32>
    %313 = arith.addf %311, %312 : vector<8x128xf32>
    %314 = vector.extract_strided_slice %313 {offsets = [0, 0], sizes = [8, 32], strides = [1, 1]} : vector<8x128xf32> to vector<8x32xf32>
    %315 = arith.negf %314 : vector<8x32xf32>
    %316 = math.exp %315 : vector<8x32xf32>
    %cst_78 = arith.constant 1.000000e+00 : f32
    %317 = vector.broadcast %cst_78 : f32 to vector<8x32xf32>
    %318 = arith.addf %317, %316 : vector<8x32xf32>
    %319 = arith.divf %317, %318 : vector<8x32xf32>
    %320 = vector.extract_strided_slice %313 {offsets = [0, 32], sizes = [8, 32], strides = [1, 1]} : vector<8x128xf32> to vector<8x32xf32>
    %321 = arith.negf %320 : vector<8x32xf32>
    %322 = math.exp %321 : vector<8x32xf32>
    %cst_79 = arith.constant 1.000000e+00 : f32
    %323 = vector.broadcast %cst_79 : f32 to vector<8x32xf32>
    %324 = arith.addf %323, %322 : vector<8x32xf32>
    %325 = arith.divf %323, %324 : vector<8x32xf32>
    %326 = vector.extract_strided_slice %313 {offsets = [0, 64], sizes = [8, 32], strides = [1, 1]} : vector<8x128xf32> to vector<8x32xf32>
    %327 = math.tanh %326 : vector<8x32xf32>
    %328 = vector.extract_strided_slice %313 {offsets = [0, 96], sizes = [8, 32], strides = [1, 1]} : vector<8x128xf32> to vector<8x32xf32>
    %329 = arith.negf %328 : vector<8x32xf32>
    %330 = math.exp %329 : vector<8x32xf32>
    %cst_80 = arith.constant 1.000000e+00 : f32
    %331 = vector.broadcast %cst_80 : f32 to vector<8x32xf32>
    %332 = arith.addf %331, %330 : vector<8x32xf32>
    %333 = arith.divf %331, %332 : vector<8x32xf32>
    %334 = arith.mulf %325, %307 : vector<8x32xf32>
    %335 = arith.mulf %319, %327 : vector<8x32xf32>
    %336 = arith.addf %334, %335 : vector<8x32xf32>
    %337 = math.tanh %336 : vector<8x32xf32>
    %338 = arith.mulf %333, %337 : vector<8x32xf32>
    %c8_81 = arith.constant 8 : index
    %c0_82 = arith.constant 0 : index
    %339 = vector.load %arg4[%c8_81, %c0_82] : memref<64x32xf32, #tpu.memory_space<vmem>>, vector<8x32xf32>
    tpu.vector_store %arg4[%c8_81, %c0_82], %338 {strides = array<i32>} : memref<64x32xf32, #tpu.memory_space<vmem>>, vector<8x32xf32>,
    %340 = vector.extract_strided_slice %278 {offsets = [16, 0], sizes = [8, 128], strides = [1, 1]} : vector<64x128xf32> to vector<8x128xf32>
    %cst_83 = arith.constant dense<0.000000e+00> : vector<8x128xf32>
    %341 = tpu.matmul %338, %279, %cst_83 {dimension_numbers = #tpu.dot_dimension_numbers<[1], [0], [0], [1], [0, 0, 1, 1], [], []>} : vector<8x32xf32>, vector<32x128xf32>, vector<8x128xf32> -> vector<8x128xf32>
    %342 = arith.addf %340, %341 : vector<8x128xf32>
    %343 = vector.extract_strided_slice %342 {offsets = [0, 0], sizes = [8, 32], strides = [1, 1]} : vector<8x128xf32> to vector<8x32xf32>
    %344 = arith.negf %343 : vector<8x32xf32>
    %345 = math.exp %344 : vector<8x32xf32>
    %cst_84 = arith.constant 1.000000e+00 : f32
    %346 = vector.broadcast %cst_84 : f32 to vector<8x32xf32>
    %347 = arith.addf %346, %345 : vector<8x32xf32>
    %348 = arith.divf %346, %347 : vector<8x32xf32>
    %349 = vector.extract_strided_slice %342 {offsets = [0, 32], sizes = [8, 32], strides = [1, 1]} : vector<8x128xf32> to vector<8x32xf32>
    %350 = arith.negf %349 : vector<8x32xf32>
    %351 = math.exp %350 : vector<8x32xf32>
    %cst_85 = arith.constant 1.000000e+00 : f32
    %352 = vector.broadcast %cst_85 : f32 to vector<8x32xf32>
    %353 = arith.addf %352, %351 : vector<8x32xf32>
    %354 = arith.divf %352, %353 : vector<8x32xf32>
    %355 = vector.extract_strided_slice %342 {offsets = [0, 64], sizes = [8, 32], strides = [1, 1]} : vector<8x128xf32> to vector<8x32xf32>
    %356 = math.tanh %355 : vector<8x32xf32>
    %357 = vector.extract_strided_slice %342 {offsets = [0, 96], sizes = [8, 32], strides = [1, 1]} : vector<8x128xf32> to vector<8x32xf32>
    %358 = arith.negf %357 : vector<8x32xf32>
    %359 = math.exp %358 : vector<8x32xf32>
    %cst_86 = arith.constant 1.000000e+00 : f32
    %360 = vector.broadcast %cst_86 : f32 to vector<8x32xf32>
    %361 = arith.addf %360, %359 : vector<8x32xf32>
    %362 = arith.divf %360, %361 : vector<8x32xf32>
    %363 = arith.mulf %354, %336 : vector<8x32xf32>
    %364 = arith.mulf %348, %356 : vector<8x32xf32>
    %365 = arith.addf %363, %364 : vector<8x32xf32>
    %366 = math.tanh %365 : vector<8x32xf32>
    %367 = arith.mulf %362, %366 : vector<8x32xf32>
    %c16_87 = arith.constant 16 : index
    %c0_88 = arith.constant 0 : index
    %368 = vector.load %arg4[%c16_87, %c0_88] : memref<64x32xf32, #tpu.memory_space<vmem>>, vector<8x32xf32>
    tpu.vector_store %arg4[%c16_87, %c0_88], %367 {strides = array<i32>} : memref<64x32xf32, #tpu.memory_space<vmem>>, vector<8x32xf32>,
    %369 = vector.extract_strided_slice %278 {offsets = [24, 0], sizes = [8, 128], strides = [1, 1]} : vector<64x128xf32> to vector<8x128xf32>
    %cst_89 = arith.constant dense<0.000000e+00> : vector<8x128xf32>
    %370 = tpu.matmul %367, %279, %cst_89 {dimension_numbers = #tpu.dot_dimension_numbers<[1], [0], [0], [1], [0, 0, 1, 1], [], []>} : vector<8x32xf32>, vector<32x128xf32>, vector<8x128xf32> -> vector<8x128xf32>
    %371 = arith.addf %369, %370 : vector<8x128xf32>
    %372 = vector.extract_strided_slice %371 {offsets = [0, 0], sizes = [8, 32], strides = [1, 1]} : vector<8x128xf32> to vector<8x32xf32>
    %373 = arith.negf %372 : vector<8x32xf32>
    %374 = math.exp %373 : vector<8x32xf32>
    %cst_90 = arith.constant 1.000000e+00 : f32
    %375 = vector.broadcast %cst_90 : f32 to vector<8x32xf32>
    %376 = arith.addf %375, %374 : vector<8x32xf32>
    %377 = arith.divf %375, %376 : vector<8x32xf32>
    %378 = vector.extract_strided_slice %371 {offsets = [0, 32], sizes = [8, 32], strides = [1, 1]} : vector<8x128xf32> to vector<8x32xf32>
    %379 = arith.negf %378 : vector<8x32xf32>
    %380 = math.exp %379 : vector<8x32xf32>
    %cst_91 = arith.constant 1.000000e+00 : f32
    %381 = vector.broadcast %cst_91 : f32 to vector<8x32xf32>
    %382 = arith.addf %381, %380 : vector<8x32xf32>
    %383 = arith.divf %381, %382 : vector<8x32xf32>
    %384 = vector.extract_strided_slice %371 {offsets = [0, 64], sizes = [8, 32], strides = [1, 1]} : vector<8x128xf32> to vector<8x32xf32>
    %385 = math.tanh %384 : vector<8x32xf32>
    %386 = vector.extract_strided_slice %371 {offsets = [0, 96], sizes = [8, 32], strides = [1, 1]} : vector<8x128xf32> to vector<8x32xf32>
    %387 = arith.negf %386 : vector<8x32xf32>
    %388 = math.exp %387 : vector<8x32xf32>
    %cst_92 = arith.constant 1.000000e+00 : f32
    %389 = vector.broadcast %cst_92 : f32 to vector<8x32xf32>
    %390 = arith.addf %389, %388 : vector<8x32xf32>
    %391 = arith.divf %389, %390 : vector<8x32xf32>
    %392 = arith.mulf %383, %365 : vector<8x32xf32>
    %393 = arith.mulf %377, %385 : vector<8x32xf32>
    %394 = arith.addf %392, %393 : vector<8x32xf32>
    %395 = math.tanh %394 : vector<8x32xf32>
    %396 = arith.mulf %391, %395 : vector<8x32xf32>
    %c24_93 = arith.constant 24 : index
    %c0_94 = arith.constant 0 : index
    %397 = vector.load %arg4[%c24_93, %c0_94] : memref<64x32xf32, #tpu.memory_space<vmem>>, vector<8x32xf32>
    tpu.vector_store %arg4[%c24_93, %c0_94], %396 {strides = array<i32>} : memref<64x32xf32, #tpu.memory_space<vmem>>, vector<8x32xf32>,
    %398 = vector.extract_strided_slice %278 {offsets = [32, 0], sizes = [8, 128], strides = [1, 1]} : vector<64x128xf32> to vector<8x128xf32>
    %cst_95 = arith.constant dense<0.000000e+00> : vector<8x128xf32>
    %399 = tpu.matmul %396, %279, %cst_95 {dimension_numbers = #tpu.dot_dimension_numbers<[1], [0], [0], [1], [0, 0, 1, 1], [], []>} : vector<8x32xf32>, vector<32x128xf32>, vector<8x128xf32> -> vector<8x128xf32>
    %400 = arith.addf %398, %399 : vector<8x128xf32>
    %401 = vector.extract_strided_slice %400 {offsets = [0, 0], sizes = [8, 32], strides = [1, 1]} : vector<8x128xf32> to vector<8x32xf32>
    %402 = arith.negf %401 : vector<8x32xf32>
    %403 = math.exp %402 : vector<8x32xf32>
    %cst_96 = arith.constant 1.000000e+00 : f32
    %404 = vector.broadcast %cst_96 : f32 to vector<8x32xf32>
    %405 = arith.addf %404, %403 : vector<8x32xf32>
    %406 = arith.divf %404, %405 : vector<8x32xf32>
    %407 = vector.extract_strided_slice %400 {offsets = [0, 32], sizes = [8, 32], strides = [1, 1]} : vector<8x128xf32> to vector<8x32xf32>
    %408 = arith.negf %407 : vector<8x32xf32>
    %409 = math.exp %408 : vector<8x32xf32>
    %cst_97 = arith.constant 1.000000e+00 : f32
    %410 = vector.broadcast %cst_97 : f32 to vector<8x32xf32>
    %411 = arith.addf %410, %409 : vector<8x32xf32>
    %412 = arith.divf %410, %411 : vector<8x32xf32>
    %413 = vector.extract_strided_slice %400 {offsets = [0, 64], sizes = [8, 32], strides = [1, 1]} : vector<8x128xf32> to vector<8x32xf32>
    %414 = math.tanh %413 : vector<8x32xf32>
    %415 = vector.extract_strided_slice %400 {offsets = [0, 96], sizes = [8, 32], strides = [1, 1]} : vector<8x128xf32> to vector<8x32xf32>
    %416 = arith.negf %415 : vector<8x32xf32>
    %417 = math.exp %416 : vector<8x32xf32>
    %cst_98 = arith.constant 1.000000e+00 : f32
    %418 = vector.broadcast %cst_98 : f32 to vector<8x32xf32>
    %419 = arith.addf %418, %417 : vector<8x32xf32>
    %420 = arith.divf %418, %419 : vector<8x32xf32>
    %421 = arith.mulf %412, %394 : vector<8x32xf32>
    %422 = arith.mulf %406, %414 : vector<8x32xf32>
    %423 = arith.addf %421, %422 : vector<8x32xf32>
    %424 = math.tanh %423 : vector<8x32xf32>
    %425 = arith.mulf %420, %424 : vector<8x32xf32>
    %c32_99 = arith.constant 32 : index
    %c0_100 = arith.constant 0 : index
    %426 = vector.load %arg4[%c32_99, %c0_100] : memref<64x32xf32, #tpu.memory_space<vmem>>, vector<8x32xf32>
    tpu.vector_store %arg4[%c32_99, %c0_100], %425 {strides = array<i32>} : memref<64x32xf32, #tpu.memory_space<vmem>>, vector<8x32xf32>,
    %427 = vector.extract_strided_slice %278 {offsets = [40, 0], sizes = [8, 128], strides = [1, 1]} : vector<64x128xf32> to vector<8x128xf32>
    %cst_101 = arith.constant dense<0.000000e+00> : vector<8x128xf32>
    %428 = tpu.matmul %425, %279, %cst_101 {dimension_numbers = #tpu.dot_dimension_numbers<[1], [0], [0], [1], [0, 0, 1, 1], [], []>} : vector<8x32xf32>, vector<32x128xf32>, vector<8x128xf32> -> vector<8x128xf32>
    %429 = arith.addf %427, %428 : vector<8x128xf32>
    %430 = vector.extract_strided_slice %429 {offsets = [0, 0], sizes = [8, 32], strides = [1, 1]} : vector<8x128xf32> to vector<8x32xf32>
    %431 = arith.negf %430 : vector<8x32xf32>
    %432 = math.exp %431 : vector<8x32xf32>
    %cst_102 = arith.constant 1.000000e+00 : f32
    %433 = vector.broadcast %cst_102 : f32 to vector<8x32xf32>
    %434 = arith.addf %433, %432 : vector<8x32xf32>
    %435 = arith.divf %433, %434 : vector<8x32xf32>
    %436 = vector.extract_strided_slice %429 {offsets = [0, 32], sizes = [8, 32], strides = [1, 1]} : vector<8x128xf32> to vector<8x32xf32>
    %437 = arith.negf %436 : vector<8x32xf32>
    %438 = math.exp %437 : vector<8x32xf32>
    %cst_103 = arith.constant 1.000000e+00 : f32
    %439 = vector.broadcast %cst_103 : f32 to vector<8x32xf32>
    %440 = arith.addf %439, %438 : vector<8x32xf32>
    %441 = arith.divf %439, %440 : vector<8x32xf32>
    %442 = vector.extract_strided_slice %429 {offsets = [0, 64], sizes = [8, 32], strides = [1, 1]} : vector<8x128xf32> to vector<8x32xf32>
    %443 = math.tanh %442 : vector<8x32xf32>
    %444 = vector.extract_strided_slice %429 {offsets = [0, 96], sizes = [8, 32], strides = [1, 1]} : vector<8x128xf32> to vector<8x32xf32>
    %445 = arith.negf %444 : vector<8x32xf32>
    %446 = math.exp %445 : vector<8x32xf32>
    %cst_104 = arith.constant 1.000000e+00 : f32
    %447 = vector.broadcast %cst_104 : f32 to vector<8x32xf32>
    %448 = arith.addf %447, %446 : vector<8x32xf32>
    %449 = arith.divf %447, %448 : vector<8x32xf32>
    %450 = arith.mulf %441, %423 : vector<8x32xf32>
    %451 = arith.mulf %435, %443 : vector<8x32xf32>
    %452 = arith.addf %450, %451 : vector<8x32xf32>
    %453 = math.tanh %452 : vector<8x32xf32>
    %454 = arith.mulf %449, %453 : vector<8x32xf32>
    %c40_105 = arith.constant 40 : index
    %c0_106 = arith.constant 0 : index
    %455 = vector.load %arg4[%c40_105, %c0_106] : memref<64x32xf32, #tpu.memory_space<vmem>>, vector<8x32xf32>
    tpu.vector_store %arg4[%c40_105, %c0_106], %454 {strides = array<i32>} : memref<64x32xf32, #tpu.memory_space<vmem>>, vector<8x32xf32>,
    %456 = vector.extract_strided_slice %278 {offsets = [48, 0], sizes = [8, 128], strides = [1, 1]} : vector<64x128xf32> to vector<8x128xf32>
    %cst_107 = arith.constant dense<0.000000e+00> : vector<8x128xf32>
    %457 = tpu.matmul %454, %279, %cst_107 {dimension_numbers = #tpu.dot_dimension_numbers<[1], [0], [0], [1], [0, 0, 1, 1], [], []>} : vector<8x32xf32>, vector<32x128xf32>, vector<8x128xf32> -> vector<8x128xf32>
    %458 = arith.addf %456, %457 : vector<8x128xf32>
    %459 = vector.extract_strided_slice %458 {offsets = [0, 0], sizes = [8, 32], strides = [1, 1]} : vector<8x128xf32> to vector<8x32xf32>
    %460 = arith.negf %459 : vector<8x32xf32>
    %461 = math.exp %460 : vector<8x32xf32>
    %cst_108 = arith.constant 1.000000e+00 : f32
    %462 = vector.broadcast %cst_108 : f32 to vector<8x32xf32>
    %463 = arith.addf %462, %461 : vector<8x32xf32>
    %464 = arith.divf %462, %463 : vector<8x32xf32>
    %465 = vector.extract_strided_slice %458 {offsets = [0, 32], sizes = [8, 32], strides = [1, 1]} : vector<8x128xf32> to vector<8x32xf32>
    %466 = arith.negf %465 : vector<8x32xf32>
    %467 = math.exp %466 : vector<8x32xf32>
    %cst_109 = arith.constant 1.000000e+00 : f32
    %468 = vector.broadcast %cst_109 : f32 to vector<8x32xf32>
    %469 = arith.addf %468, %467 : vector<8x32xf32>
    %470 = arith.divf %468, %469 : vector<8x32xf32>
    %471 = vector.extract_strided_slice %458 {offsets = [0, 64], sizes = [8, 32], strides = [1, 1]} : vector<8x128xf32> to vector<8x32xf32>
    %472 = math.tanh %471 : vector<8x32xf32>
    %473 = vector.extract_strided_slice %458 {offsets = [0, 96], sizes = [8, 32], strides = [1, 1]} : vector<8x128xf32> to vector<8x32xf32>
    %474 = arith.negf %473 : vector<8x32xf32>
    %475 = math.exp %474 : vector<8x32xf32>
    %cst_110 = arith.constant 1.000000e+00 : f32
    %476 = vector.broadcast %cst_110 : f32 to vector<8x32xf32>
    %477 = arith.addf %476, %475 : vector<8x32xf32>
    %478 = arith.divf %476, %477 : vector<8x32xf32>
    %479 = arith.mulf %470, %452 : vector<8x32xf32>
    %480 = arith.mulf %464, %472 : vector<8x32xf32>
    %481 = arith.addf %479, %480 : vector<8x32xf32>
    %482 = math.tanh %481 : vector<8x32xf32>
    %483 = arith.mulf %478, %482 : vector<8x32xf32>
    %c48_111 = arith.constant 48 : index
    %c0_112 = arith.constant 0 : index
    %484 = vector.load %arg4[%c48_111, %c0_112] : memref<64x32xf32, #tpu.memory_space<vmem>>, vector<8x32xf32>
    tpu.vector_store %arg4[%c48_111, %c0_112], %483 {strides = array<i32>} : memref<64x32xf32, #tpu.memory_space<vmem>>, vector<8x32xf32>,
    %485 = vector.extract_strided_slice %278 {offsets = [56, 0], sizes = [8, 128], strides = [1, 1]} : vector<64x128xf32> to vector<8x128xf32>
    %cst_113 = arith.constant dense<0.000000e+00> : vector<8x128xf32>
    %486 = tpu.matmul %483, %279, %cst_113 {dimension_numbers = #tpu.dot_dimension_numbers<[1], [0], [0], [1], [0, 0, 1, 1], [], []>} : vector<8x32xf32>, vector<32x128xf32>, vector<8x128xf32> -> vector<8x128xf32>
    %487 = arith.addf %485, %486 : vector<8x128xf32>
    %488 = vector.extract_strided_slice %487 {offsets = [0, 0], sizes = [8, 32], strides = [1, 1]} : vector<8x128xf32> to vector<8x32xf32>
    %489 = arith.negf %488 : vector<8x32xf32>
    %490 = math.exp %489 : vector<8x32xf32>
    %cst_114 = arith.constant 1.000000e+00 : f32
    %491 = vector.broadcast %cst_114 : f32 to vector<8x32xf32>
    %492 = arith.addf %491, %490 : vector<8x32xf32>
    %493 = arith.divf %491, %492 : vector<8x32xf32>
    %494 = vector.extract_strided_slice %487 {offsets = [0, 32], sizes = [8, 32], strides = [1, 1]} : vector<8x128xf32> to vector<8x32xf32>
    %495 = arith.negf %494 : vector<8x32xf32>
    %496 = math.exp %495 : vector<8x32xf32>
    %cst_115 = arith.constant 1.000000e+00 : f32
    %497 = vector.broadcast %cst_115 : f32 to vector<8x32xf32>
    %498 = arith.addf %497, %496 : vector<8x32xf32>
    %499 = arith.divf %497, %498 : vector<8x32xf32>
    %500 = vector.extract_strided_slice %487 {offsets = [0, 64], sizes = [8, 32], strides = [1, 1]} : vector<8x128xf32> to vector<8x32xf32>
    %501 = math.tanh %500 : vector<8x32xf32>
    %502 = vector.extract_strided_slice %487 {offsets = [0, 96], sizes = [8, 32], strides = [1, 1]} : vector<8x128xf32> to vector<8x32xf32>
    %503 = arith.negf %502 : vector<8x32xf32>
    %504 = math.exp %503 : vector<8x32xf32>
    %cst_116 = arith.constant 1.000000e+00 : f32
    %505 = vector.broadcast %cst_116 : f32 to vector<8x32xf32>
    %506 = arith.addf %505, %504 : vector<8x32xf32>
    %507 = arith.divf %505, %506 : vector<8x32xf32>
    %508 = arith.mulf %499, %481 : vector<8x32xf32>
    %509 = arith.mulf %493, %501 : vector<8x32xf32>
    %510 = arith.addf %508, %509 : vector<8x32xf32>
    %511 = math.tanh %510 : vector<8x32xf32>
    %512 = arith.mulf %507, %511 : vector<8x32xf32>
    %c56_117 = arith.constant 56 : index
    %c0_118 = arith.constant 0 : index
    %513 = vector.load %arg4[%c56_117, %c0_118] : memref<64x32xf32, #tpu.memory_space<vmem>>, vector<8x32xf32>
    tpu.vector_store %arg4[%c56_117, %c0_118], %512 {strides = array<i32>} : memref<64x32xf32, #tpu.memory_space<vmem>>, vector<8x32xf32>,
    %c0_119 = arith.constant 0 : index
    %c0_120 = arith.constant 0 : index
    %514 = vector.load %arg4[%c0_119, %c0_120] : memref<64x32xf32, #tpu.memory_space<vmem>>, vector<64x32xf32>
    %c112 = arith.constant 112 : index
    %c0_121 = arith.constant 0 : index
    %515 = vector.load %arg1[%c112, %c0_121] : memref<592x128xf32, #tpu.memory_space<vmem>>, vector<32x32xf32>
    %cst_122 = arith.constant dense<0.000000e+00> : vector<64x32xf32>
    %516 = tpu.matmul %273, %515, %cst_122 {dimension_numbers = #tpu.dot_dimension_numbers<[1], [0], [0], [1], [0, 0, 1, 1], [], []>} : vector<64x32xf32>, vector<32x32xf32>, vector<64x32xf32> -> vector<64x32xf32>
    %c5 = arith.constant 5 : index
    %c0_123 = arith.constant 0 : index
    %517 = vector.load %arg2[%c5, %c0_123] : memref<32x128xf32, #tpu.memory_space<vmem>>, vector<1x32xf32>
    %518 = vector.broadcast %517 : vector<1x32xf32> to vector<64x32xf32>
    %519 = arith.addf %516, %518 : vector<64x32xf32>
    %520 = arith.addf %514, %519 : vector<64x32xf32>
    %cst_124 = arith.constant dense<0.000000e+00> : vector<64xf32>
    %521 = vector.multi_reduction <add>, %520, %cst_124 [1] : vector<64x32xf32> to vector<64xf32>
    %522 = vector.shape_cast %521 : vector<64xf32> to vector<64x1xf32>
    %cst_125 = arith.constant 3.200000e+01 : f32
    %523 = vector.broadcast %cst_125 : f32 to vector<64x1xf32>
    %524 = arith.divf %522, %523 : vector<64x1xf32>
    %525 = arith.mulf %520, %520 : vector<64x32xf32>
    %cst_126 = arith.constant dense<0.000000e+00> : vector<64xf32>
    %526 = vector.multi_reduction <add>, %525, %cst_126 [1] : vector<64x32xf32> to vector<64xf32>
    %527 = vector.shape_cast %526 : vector<64xf32> to vector<64x1xf32>
    %cst_127 = arith.constant 3.200000e+01 : f32
    %528 = vector.broadcast %cst_127 : f32 to vector<64x1xf32>
    %529 = arith.divf %527, %528 : vector<64x1xf32>
    %530 = arith.mulf %524, %524 : vector<64x1xf32>
    %531 = arith.subf %529, %530 : vector<64x1xf32>
    %cst_128 = arith.constant 0.000000e+00 : f32
    %532 = vector.broadcast %cst_128 : f32 to vector<64x1xf32>
    %533 = arith.maximumf %531, %532 : vector<64x1xf32>
    %534 = vector.broadcast %524 : vector<64x1xf32> to vector<64x32xf32>
    %535 = arith.subf %520, %534 : vector<64x32xf32>
    %cst_129 = arith.constant 9.99999974E-6 : f32
    %536 = vector.broadcast %cst_129 : f32 to vector<64x1xf32>
    %537 = arith.addf %533, %536 : vector<64x1xf32>
    %538 = math.rsqrt %537 : vector<64x1xf32>
    %539 = vector.broadcast %538 : vector<64x1xf32> to vector<64x32xf32>
    %540 = arith.mulf %535, %539 : vector<64x32xf32>
    %c6 = arith.constant 6 : index
    %c0_130 = arith.constant 0 : index
    %541 = vector.load %arg2[%c6, %c0_130] : memref<32x128xf32, #tpu.memory_space<vmem>>, vector<1x32xf32>
    %542 = vector.broadcast %541 : vector<1x32xf32> to vector<64x32xf32>
    %543 = arith.mulf %540, %542 : vector<64x32xf32>
    %c7 = arith.constant 7 : index
    %c0_131 = arith.constant 0 : index
    %544 = vector.load %arg2[%c7, %c0_131] : memref<32x128xf32, #tpu.memory_space<vmem>>, vector<1x32xf32>
    %545 = vector.broadcast %544 : vector<1x32xf32> to vector<64x32xf32>
    %546 = arith.addf %543, %545 : vector<64x32xf32>
    %c0_132 = arith.constant 0 : index
    %c0_133 = arith.constant 0 : index
    %547 = vector.load %arg4[%c0_132, %c0_133] : memref<64x32xf32, #tpu.memory_space<vmem>>, vector<64x32xf32>
    tpu.vector_store %arg4[%c0_132, %c0_133], %546 {strides = array<i32>} : memref<64x32xf32, #tpu.memory_space<vmem>>, vector<64x32xf32>,
    %c0_134 = arith.constant 0 : index
    %c0_135 = arith.constant 0 : index
    %548 = tpu.strided_load %arg4[%c0_134, %c0_135] {strides = array<i32: 8, 1>} : memref<64x32xf32, #tpu.memory_space<vmem>>, vector<8x32xf32>
    %c1_136 = arith.constant 1 : index
    %c0_137 = arith.constant 0 : index
    %549 = tpu.strided_load %arg4[%c1_136, %c0_137] {strides = array<i32: 8, 1>} : memref<64x32xf32, #tpu.memory_space<vmem>>, vector<8x32xf32>
    %550 = tpu.concatenate %548, %549 in 0 : vector<8x32xf32>, vector<8x32xf32> -> vector<16x32xf32>
    %c144 = arith.constant 144 : index
    %c0_138 = arith.constant 0 : index
    %551 = vector.load %arg1[%c144, %c0_138] : memref<592x128xf32, #tpu.memory_space<vmem>>, vector<32x32xf32>
    %cst_139 = arith.constant dense<0.000000e+00> : vector<16x32xf32>
    %552 = tpu.matmul %550, %551, %cst_139 {dimension_numbers = #tpu.dot_dimension_numbers<[1], [0], [0], [1], [0, 0, 1, 1], [], []>} : vector<16x32xf32>, vector<32x32xf32>, vector<16x32xf32> -> vector<16x32xf32>
    %c8_140 = arith.constant 8 : index
    %c0_141 = arith.constant 0 : index
    %553 = vector.load %arg2[%c8_140, %c0_141] : memref<32x128xf32, #tpu.memory_space<vmem>>, vector<1x32xf32>
    %554 = vector.broadcast %553 : vector<1x32xf32> to vector<16x32xf32>
    %555 = arith.addf %552, %554 : vector<16x32xf32>
    %c176 = arith.constant 176 : index
    %c0_142 = arith.constant 0 : index
    %556 = vector.load %arg1[%c176, %c0_142] : memref<592x128xf32, #tpu.memory_space<vmem>>, vector<32x16xf32>
    %cst_143 = arith.constant dense<0.000000e+00> : vector<16x16xf32>
    %557 = tpu.matmul %555, %556, %cst_143 {dimension_numbers = #tpu.dot_dimension_numbers<[1], [0], [0], [1], [0, 0, 1, 1], [], []>} : vector<16x32xf32>, vector<32x16xf32>, vector<16x16xf32> -> vector<16x16xf32>
    %c9 = arith.constant 9 : index
    %c0_144 = arith.constant 0 : index
    %558 = vector.load %arg2[%c9, %c0_144] : memref<32x128xf32, #tpu.memory_space<vmem>>, vector<1x16xf32>
    %559 = vector.broadcast %558 : vector<1x16xf32> to vector<16x16xf32>
    %560 = arith.addf %557, %559 : vector<16x16xf32>
    %c288 = arith.constant 288 : index
    %c0_145 = arith.constant 0 : index
    %561 = vector.load %arg1[%c288, %c0_145] : memref<592x128xf32, #tpu.memory_space<vmem>>, vector<32x16xf32>
    %cst_146 = arith.constant dense<0.000000e+00> : vector<16x16xf32>
    %562 = tpu.matmul %555, %561, %cst_146 {dimension_numbers = #tpu.dot_dimension_numbers<[1], [0], [0], [1], [0, 0, 1, 1], [], []>} : vector<16x32xf32>, vector<32x16xf32>, vector<16x16xf32> -> vector<16x16xf32>
    %c12 = arith.constant 12 : index
    %c0_147 = arith.constant 0 : index
    %563 = vector.load %arg2[%c12, %c0_147] : memref<32x128xf32, #tpu.memory_space<vmem>>, vector<1x16xf32>
    %564 = vector.broadcast %563 : vector<1x16xf32> to vector<16x16xf32>
    %565 = arith.addf %562, %564 : vector<16x16xf32>
    %c208 = arith.constant 208 : index
    %c0_148 = arith.constant 0 : index
    %566 = vector.load %arg1[%c208, %c0_148] : memref<592x128xf32, #tpu.memory_space<vmem>>, vector<32x16xf32>
    %cst_149 = arith.constant dense<0.000000e+00> : vector<16x16xf32>
    %567 = tpu.matmul %555, %566, %cst_149 {dimension_numbers = #tpu.dot_dimension_numbers<[1], [0], [0], [1], [0, 0, 1, 1], [], []>} : vector<16x32xf32>, vector<32x16xf32>, vector<16x16xf32> -> vector<16x16xf32>
    %c10 = arith.constant 10 : index
    %c0_150 = arith.constant 0 : index
    %568 = vector.load %arg2[%c10, %c0_150] : memref<32x128xf32, #tpu.memory_space<vmem>>, vector<1x16xf32>
    %569 = vector.broadcast %568 : vector<1x16xf32> to vector<16x16xf32>
    %570 = arith.addf %567, %569 : vector<16x16xf32>
    %c320 = arith.constant 320 : index
    %c0_151 = arith.constant 0 : index
    %571 = vector.load %arg1[%c320, %c0_151] : memref<592x128xf32, #tpu.memory_space<vmem>>, vector<32x16xf32>
    %cst_152 = arith.constant dense<0.000000e+00> : vector<16x16xf32>
    %572 = tpu.matmul %555, %571, %cst_152 {dimension_numbers = #tpu.dot_dimension_numbers<[1], [0], [0], [1], [0, 0, 1, 1], [], []>} : vector<16x32xf32>, vector<32x16xf32>, vector<16x16xf32> -> vector<16x16xf32>
    %c13 = arith.constant 13 : index
    %c0_153 = arith.constant 0 : index
    %573 = vector.load %arg2[%c13, %c0_153] : memref<32x128xf32, #tpu.memory_space<vmem>>, vector<1x16xf32>
    %574 = vector.broadcast %573 : vector<1x16xf32> to vector<16x16xf32>
    %575 = arith.addf %572, %574 : vector<16x16xf32>
    %c240 = arith.constant 240 : index
    %c0_154 = arith.constant 0 : index
    %576 = vector.load %arg1[%c240, %c0_154] : memref<592x128xf32, #tpu.memory_space<vmem>>, vector<32x16xf32>
    %cst_155 = arith.constant dense<0.000000e+00> : vector<16x16xf32>
    %577 = tpu.matmul %555, %576, %cst_155 {dimension_numbers = #tpu.dot_dimension_numbers<[1], [0], [0], [1], [0, 0, 1, 1], [], []>} : vector<16x32xf32>, vector<32x16xf32>, vector<16x16xf32> -> vector<16x16xf32>
    %c11 = arith.constant 11 : index
    %c0_156 = arith.constant 0 : index
    %578 = vector.load %arg2[%c11, %c0_156] : memref<32x128xf32, #tpu.memory_space<vmem>>, vector<1x16xf32>
    %579 = vector.broadcast %578 : vector<1x16xf32> to vector<16x16xf32>
    %580 = arith.addf %577, %579 : vector<16x16xf32>
    %c352 = arith.constant 352 : index
    %c0_157 = arith.constant 0 : index
    %581 = vector.load %arg1[%c352, %c0_157] : memref<592x128xf32, #tpu.memory_space<vmem>>, vector<32x16xf32>
    %cst_158 = arith.constant dense<0.000000e+00> : vector<16x16xf32>
    %582 = tpu.matmul %555, %581, %cst_158 {dimension_numbers = #tpu.dot_dimension_numbers<[1], [0], [0], [1], [0, 0, 1, 1], [], []>} : vector<16x32xf32>, vector<32x16xf32>, vector<16x16xf32> -> vector<16x16xf32>
    %c14 = arith.constant 14 : index
    %c0_159 = arith.constant 0 : index
    %583 = vector.load %arg2[%c14, %c0_159] : memref<32x128xf32, #tpu.memory_space<vmem>>, vector<1x16xf32>
    %584 = vector.broadcast %583 : vector<1x16xf32> to vector<16x16xf32>
    %585 = arith.addf %582, %584 : vector<16x16xf32>
    %c272 = arith.constant 272 : index
    %c0_160 = arith.constant 0 : index
    %586 = vector.load %arg1[%c272, %c0_160] : memref<592x128xf32, #tpu.memory_space<vmem>>, vector<16x32xf32>
    %c384 = arith.constant 384 : index
    %c0_161 = arith.constant 0 : index
    %587 = vector.load %arg1[%c384, %c0_161] : memref<592x128xf32, #tpu.memory_space<vmem>>, vector<16x32xf32>
    %588 = vector.extract_strided_slice %560 {offsets = [0, 0], sizes = [8, 16], strides = [1, 1]} : vector<16x16xf32> to vector<8x16xf32>
    %589 = vector.extract_strided_slice %570 {offsets = [0, 0], sizes = [8, 16], strides = [1, 1]} : vector<16x16xf32> to vector<8x16xf32>
    %590 = vector.extract_strided_slice %580 {offsets = [0, 0], sizes = [8, 16], strides = [1, 1]} : vector<16x16xf32> to vector<8x16xf32>
    %cst_162 = arith.constant dense<0.000000e+00> : vector<8x8xf32>
    %591 = tpu.matmul %588, %589, %cst_162 {dimension_numbers = #tpu.dot_dimension_numbers<[1], [1], [0], [0], [0, 0, 1, 0], [], []>} : vector<8x16xf32>, vector<8x16xf32>, vector<8x8xf32> -> vector<8x8xf32>
    %cst_163 = arith.constant 2.500000e-01 : f32
    %592 = vector.broadcast %cst_163 : f32 to vector<8x8xf32>
    %593 = arith.mulf %591, %592 : vector<8x8xf32>
    %cst_164 = arith.constant dense<0xFF800000> : vector<8xf32>
    %594 = vector.multi_reduction <maximumf>, %593, %cst_164 [1] : vector<8x8xf32> to vector<8xf32>
    %595 = vector.shape_cast %594 : vector<8xf32> to vector<8x1xf32>
    %596 = vector.broadcast %595 : vector<8x1xf32> to vector<8x8xf32>
    %597 = arith.subf %593, %596 : vector<8x8xf32>
    %598 = math.exp %597 : vector<8x8xf32>
    %cst_165 = arith.constant dense<0.000000e+00> : vector<8xf32>
    %599 = vector.multi_reduction <add>, %598, %cst_165 [1] : vector<8x8xf32> to vector<8xf32>
    %600 = vector.shape_cast %599 : vector<8xf32> to vector<8x1xf32>
    %601 = tpu.reciprocal %600 {approx = true} : vector<8x1xf32> -> vector<8x1xf32>
    %602 = vector.broadcast %601 : vector<8x1xf32> to vector<8x8xf32>
    %603 = arith.mulf %598, %602 : vector<8x8xf32>
    %cst_166 = arith.constant dense<0.000000e+00> : vector<8x16xf32>
    %604 = tpu.matmul %603, %590, %cst_166 {dimension_numbers = #tpu.dot_dimension_numbers<[1], [0], [0], [1], [0, 0, 1, 1], [], []>} : vector<8x8xf32>, vector<8x16xf32>, vector<8x16xf32> -> vector<8x16xf32>
    %cst_167 = arith.constant dense<0.000000e+00> : vector<8x32xf32>
    %605 = tpu.matmul %604, %586, %cst_167 {dimension_numbers = #tpu.dot_dimension_numbers<[1], [0], [0], [1], [0, 0, 1, 1], [], []>} : vector<8x16xf32>, vector<16x32xf32>, vector<8x32xf32> -> vector<8x32xf32>
    %606 = vector.extract_strided_slice %565 {offsets = [0, 0], sizes = [8, 16], strides = [1, 1]} : vector<16x16xf32> to vector<8x16xf32>
    %607 = vector.extract_strided_slice %575 {offsets = [0, 0], sizes = [8, 16], strides = [1, 1]} : vector<16x16xf32> to vector<8x16xf32>
    %608 = vector.extract_strided_slice %585 {offsets = [0, 0], sizes = [8, 16], strides = [1, 1]} : vector<16x16xf32> to vector<8x16xf32>
    %cst_168 = arith.constant dense<0.000000e+00> : vector<8x8xf32>
    %609 = tpu.matmul %606, %607, %cst_168 {dimension_numbers = #tpu.dot_dimension_numbers<[1], [1], [0], [0], [0, 0, 1, 0], [], []>} : vector<8x16xf32>, vector<8x16xf32>, vector<8x8xf32> -> vector<8x8xf32>
    %cst_169 = arith.constant 2.500000e-01 : f32
    %610 = vector.broadcast %cst_169 : f32 to vector<8x8xf32>
    %611 = arith.mulf %609, %610 : vector<8x8xf32>
    %cst_170 = arith.constant dense<0xFF800000> : vector<8xf32>
    %612 = vector.multi_reduction <maximumf>, %611, %cst_170 [1] : vector<8x8xf32> to vector<8xf32>
    %613 = vector.shape_cast %612 : vector<8xf32> to vector<8x1xf32>
    %614 = vector.broadcast %613 : vector<8x1xf32> to vector<8x8xf32>
    %615 = arith.subf %611, %614 : vector<8x8xf32>
    %616 = math.exp %615 : vector<8x8xf32>
    %cst_171 = arith.constant dense<0.000000e+00> : vector<8xf32>
    %617 = vector.multi_reduction <add>, %616, %cst_171 [1] : vector<8x8xf32> to vector<8xf32>
    %618 = vector.shape_cast %617 : vector<8xf32> to vector<8x1xf32>
    %619 = tpu.reciprocal %618 {approx = true} : vector<8x1xf32> -> vector<8x1xf32>
    %620 = vector.broadcast %619 : vector<8x1xf32> to vector<8x8xf32>
    %621 = arith.mulf %616, %620 : vector<8x8xf32>
    %cst_172 = arith.constant dense<0.000000e+00> : vector<8x16xf32>
    %622 = tpu.matmul %621, %608, %cst_172 {dimension_numbers = #tpu.dot_dimension_numbers<[1], [0], [0], [1], [0, 0, 1, 1], [], []>} : vector<8x8xf32>, vector<8x16xf32>, vector<8x16xf32> -> vector<8x16xf32>
    %cst_173 = arith.constant dense<0.000000e+00> : vector<8x32xf32>
    %623 = tpu.matmul %622, %587, %cst_173 {dimension_numbers = #tpu.dot_dimension_numbers<[1], [0], [0], [1], [0, 0, 1, 1], [], []>} : vector<8x16xf32>, vector<16x32xf32>, vector<8x32xf32> -> vector<8x32xf32>
    %624 = arith.addf %605, %623 : vector<8x32xf32>
    %625 = vector.extract_strided_slice %560 {offsets = [8, 0], sizes = [8, 16], strides = [1, 1]} : vector<16x16xf32> to vector<8x16xf32>
    %626 = vector.extract_strided_slice %570 {offsets = [8, 0], sizes = [8, 16], strides = [1, 1]} : vector<16x16xf32> to vector<8x16xf32>
    %627 = vector.extract_strided_slice %580 {offsets = [8, 0], sizes = [8, 16], strides = [1, 1]} : vector<16x16xf32> to vector<8x16xf32>
    %cst_174 = arith.constant dense<0.000000e+00> : vector<8x8xf32>
    %628 = tpu.matmul %625, %626, %cst_174 {dimension_numbers = #tpu.dot_dimension_numbers<[1], [1], [0], [0], [0, 0, 1, 0], [], []>} : vector<8x16xf32>, vector<8x16xf32>, vector<8x8xf32> -> vector<8x8xf32>
    %cst_175 = arith.constant 2.500000e-01 : f32
    %629 = vector.broadcast %cst_175 : f32 to vector<8x8xf32>
    %630 = arith.mulf %628, %629 : vector<8x8xf32>
    %cst_176 = arith.constant dense<0xFF800000> : vector<8xf32>
    %631 = vector.multi_reduction <maximumf>, %630, %cst_176 [1] : vector<8x8xf32> to vector<8xf32>
    %632 = vector.shape_cast %631 : vector<8xf32> to vector<8x1xf32>
    %633 = vector.broadcast %632 : vector<8x1xf32> to vector<8x8xf32>
    %634 = arith.subf %630, %633 : vector<8x8xf32>
    %635 = math.exp %634 : vector<8x8xf32>
    %cst_177 = arith.constant dense<0.000000e+00> : vector<8xf32>
    %636 = vector.multi_reduction <add>, %635, %cst_177 [1] : vector<8x8xf32> to vector<8xf32>
    %637 = vector.shape_cast %636 : vector<8xf32> to vector<8x1xf32>
    %638 = tpu.reciprocal %637 {approx = true} : vector<8x1xf32> -> vector<8x1xf32>
    %639 = vector.broadcast %638 : vector<8x1xf32> to vector<8x8xf32>
    %640 = arith.mulf %635, %639 : vector<8x8xf32>
    %cst_178 = arith.constant dense<0.000000e+00> : vector<8x16xf32>
    %641 = tpu.matmul %640, %627, %cst_178 {dimension_numbers = #tpu.dot_dimension_numbers<[1], [0], [0], [1], [0, 0, 1, 1], [], []>} : vector<8x8xf32>, vector<8x16xf32>, vector<8x16xf32> -> vector<8x16xf32>
    %cst_179 = arith.constant dense<0.000000e+00> : vector<8x32xf32>
    %642 = tpu.matmul %641, %586, %cst_179 {dimension_numbers = #tpu.dot_dimension_numbers<[1], [0], [0], [1], [0, 0, 1, 1], [], []>} : vector<8x16xf32>, vector<16x32xf32>, vector<8x32xf32> -> vector<8x32xf32>
    %643 = vector.extract_strided_slice %565 {offsets = [8, 0], sizes = [8, 16], strides = [1, 1]} : vector<16x16xf32> to vector<8x16xf32>
    %644 = vector.extract_strided_slice %575 {offsets = [8, 0], sizes = [8, 16], strides = [1, 1]} : vector<16x16xf32> to vector<8x16xf32>
    %645 = vector.extract_strided_slice %585 {offsets = [8, 0], sizes = [8, 16], strides = [1, 1]} : vector<16x16xf32> to vector<8x16xf32>
    %cst_180 = arith.constant dense<0.000000e+00> : vector<8x8xf32>
    %646 = tpu.matmul %643, %644, %cst_180 {dimension_numbers = #tpu.dot_dimension_numbers<[1], [1], [0], [0], [0, 0, 1, 0], [], []>} : vector<8x16xf32>, vector<8x16xf32>, vector<8x8xf32> -> vector<8x8xf32>
    %cst_181 = arith.constant 2.500000e-01 : f32
    %647 = vector.broadcast %cst_181 : f32 to vector<8x8xf32>
    %648 = arith.mulf %646, %647 : vector<8x8xf32>
    %cst_182 = arith.constant dense<0xFF800000> : vector<8xf32>
    %649 = vector.multi_reduction <maximumf>, %648, %cst_182 [1] : vector<8x8xf32> to vector<8xf32>
    %650 = vector.shape_cast %649 : vector<8xf32> to vector<8x1xf32>
    %651 = vector.broadcast %650 : vector<8x1xf32> to vector<8x8xf32>
    %652 = arith.subf %648, %651 : vector<8x8xf32>
    %653 = math.exp %652 : vector<8x8xf32>
    %cst_183 = arith.constant dense<0.000000e+00> : vector<8xf32>
    %654 = vector.multi_reduction <add>, %653, %cst_183 [1] : vector<8x8xf32> to vector<8xf32>
    %655 = vector.shape_cast %654 : vector<8xf32> to vector<8x1xf32>
    %656 = tpu.reciprocal %655 {approx = true} : vector<8x1xf32> -> vector<8x1xf32>
    %657 = vector.broadcast %656 : vector<8x1xf32> to vector<8x8xf32>
    %658 = arith.mulf %653, %657 : vector<8x8xf32>
    %cst_184 = arith.constant dense<0.000000e+00> : vector<8x16xf32>
    %659 = tpu.matmul %658, %645, %cst_184 {dimension_numbers = #tpu.dot_dimension_numbers<[1], [0], [0], [1], [0, 0, 1, 1], [], []>} : vector<8x8xf32>, vector<8x16xf32>, vector<8x16xf32> -> vector<8x16xf32>
    %cst_185 = arith.constant dense<0.000000e+00> : vector<8x32xf32>
    %660 = tpu.matmul %659, %587, %cst_185 {dimension_numbers = #tpu.dot_dimension_numbers<[1], [0], [0], [1], [0, 0, 1, 1], [], []>} : vector<8x16xf32>, vector<16x32xf32>, vector<8x32xf32> -> vector<8x32xf32>
    %661 = arith.addf %642, %660 : vector<8x32xf32>
    %662 = tpu.concatenate %624, %661 in 0 : vector<8x32xf32>, vector<8x32xf32> -> vector<16x32xf32>
    %c15 = arith.constant 15 : index
    %c0_186 = arith.constant 0 : index
    %663 = vector.load %arg2[%c15, %c0_186] : memref<32x128xf32, #tpu.memory_space<vmem>>, vector<1x32xf32>
    %664 = vector.broadcast %663 : vector<1x32xf32> to vector<16x32xf32>
    %665 = arith.addf %662, %664 : vector<16x32xf32>
    %666 = arith.addf %555, %665 : vector<16x32xf32>
    %cst_187 = arith.constant dense<0.000000e+00> : vector<16xf32>
    %667 = vector.multi_reduction <add>, %666, %cst_187 [1] : vector<16x32xf32> to vector<16xf32>
    %668 = vector.shape_cast %667 : vector<16xf32> to vector<16x1xf32>
    %cst_188 = arith.constant 3.200000e+01 : f32
    %669 = vector.broadcast %cst_188 : f32 to vector<16x1xf32>
    %670 = arith.divf %668, %669 : vector<16x1xf32>
    %671 = arith.mulf %666, %666 : vector<16x32xf32>
    %cst_189 = arith.constant dense<0.000000e+00> : vector<16xf32>
    %672 = vector.multi_reduction <add>, %671, %cst_189 [1] : vector<16x32xf32> to vector<16xf32>
    %673 = vector.shape_cast %672 : vector<16xf32> to vector<16x1xf32>
    %cst_190 = arith.constant 3.200000e+01 : f32
    %674 = vector.broadcast %cst_190 : f32 to vector<16x1xf32>
    %675 = arith.divf %673, %674 : vector<16x1xf32>
    %676 = arith.mulf %670, %670 : vector<16x1xf32>
    %677 = arith.subf %675, %676 : vector<16x1xf32>
    %cst_191 = arith.constant 0.000000e+00 : f32
    %678 = vector.broadcast %cst_191 : f32 to vector<16x1xf32>
    %679 = arith.maximumf %677, %678 : vector<16x1xf32>
    %680 = vector.broadcast %670 : vector<16x1xf32> to vector<16x32xf32>
    %681 = arith.subf %666, %680 : vector<16x32xf32>
    %cst_192 = arith.constant 9.99999974E-6 : f32
    %682 = vector.broadcast %cst_192 : f32 to vector<16x1xf32>
    %683 = arith.addf %679, %682 : vector<16x1xf32>
    %684 = math.rsqrt %683 : vector<16x1xf32>
    %685 = vector.broadcast %684 : vector<16x1xf32> to vector<16x32xf32>
    %686 = arith.mulf %681, %685 : vector<16x32xf32>
    %c16_193 = arith.constant 16 : index
    %c0_194 = arith.constant 0 : index
    %687 = vector.load %arg2[%c16_193, %c0_194] : memref<32x128xf32, #tpu.memory_space<vmem>>, vector<1x32xf32>
    %688 = vector.broadcast %687 : vector<1x32xf32> to vector<16x32xf32>
    %689 = arith.mulf %686, %688 : vector<16x32xf32>
    %c17 = arith.constant 17 : index
    %c0_195 = arith.constant 0 : index
    %690 = vector.load %arg2[%c17, %c0_195] : memref<32x128xf32, #tpu.memory_space<vmem>>, vector<1x32xf32>
    %691 = vector.broadcast %690 : vector<1x32xf32> to vector<16x32xf32>
    %692 = arith.addf %689, %691 : vector<16x32xf32>
    %c400 = arith.constant 400 : index
    %c0_196 = arith.constant 0 : index
    %693 = vector.load %arg1[%c400, %c0_196] : memref<592x128xf32, #tpu.memory_space<vmem>>, vector<32x64xf32>
    %cst_197 = arith.constant dense<0.000000e+00> : vector<16x64xf32>
    %694 = tpu.matmul %692, %693, %cst_197 {dimension_numbers = #tpu.dot_dimension_numbers<[1], [0], [0], [1], [0, 0, 1, 1], [], []>} : vector<16x32xf32>, vector<32x64xf32>, vector<16x64xf32> -> vector<16x64xf32>
    %c18 = arith.constant 18 : index
    %c0_198 = arith.constant 0 : index
    %695 = vector.load %arg2[%c18, %c0_198] : memref<32x128xf32, #tpu.memory_space<vmem>>, vector<1x64xf32>
    %696 = vector.broadcast %695 : vector<1x64xf32> to vector<16x64xf32>
    %697 = arith.addf %694, %696 : vector<16x64xf32>
    %cst_199 = arith.constant 0.000000e+00 : f32
    %698 = vector.broadcast %cst_199 : f32 to vector<16x64xf32>
    %699 = arith.maximumf %697, %698 : vector<16x64xf32>
    %c432 = arith.constant 432 : index
    %c0_200 = arith.constant 0 : index
    %700 = vector.load %arg1[%c432, %c0_200] : memref<592x128xf32, #tpu.memory_space<vmem>>, vector<64x32xf32>
    %cst_201 = arith.constant dense<0.000000e+00> : vector<16x32xf32>
    %701 = tpu.matmul %699, %700, %cst_201 {dimension_numbers = #tpu.dot_dimension_numbers<[1], [0], [0], [1], [0, 0, 1, 1], [], []>} : vector<16x64xf32>, vector<64x32xf32>, vector<16x32xf32> -> vector<16x32xf32>
    %c19 = arith.constant 19 : index
    %c0_202 = arith.constant 0 : index
    %702 = vector.load %arg2[%c19, %c0_202] : memref<32x128xf32, #tpu.memory_space<vmem>>, vector<1x32xf32>
    %703 = vector.broadcast %702 : vector<1x32xf32> to vector<16x32xf32>
    %704 = arith.addf %701, %703 : vector<16x32xf32>
    %705 = arith.addf %692, %704 : vector<16x32xf32>
    %cst_203 = arith.constant dense<0.000000e+00> : vector<16xf32>
    %706 = vector.multi_reduction <add>, %705, %cst_203 [1] : vector<16x32xf32> to vector<16xf32>
    %707 = vector.shape_cast %706 : vector<16xf32> to vector<16x1xf32>
    %cst_204 = arith.constant 3.200000e+01 : f32
    %708 = vector.broadcast %cst_204 : f32 to vector<16x1xf32>
    %709 = arith.divf %707, %708 : vector<16x1xf32>
    %710 = arith.mulf %705, %705 : vector<16x32xf32>
    %cst_205 = arith.constant dense<0.000000e+00> : vector<16xf32>
    %711 = vector.multi_reduction <add>, %710, %cst_205 [1] : vector<16x32xf32> to vector<16xf32>
    %712 = vector.shape_cast %711 : vector<16xf32> to vector<16x1xf32>
    %cst_206 = arith.constant 3.200000e+01 : f32
    %713 = vector.broadcast %cst_206 : f32 to vector<16x1xf32>
    %714 = arith.divf %712, %713 : vector<16x1xf32>
    %715 = arith.mulf %709, %709 : vector<16x1xf32>
    %716 = arith.subf %714, %715 : vector<16x1xf32>
    %cst_207 = arith.constant 0.000000e+00 : f32
    %717 = vector.broadcast %cst_207 : f32 to vector<16x1xf32>
    %718 = arith.maximumf %716, %717 : vector<16x1xf32>
    %719 = vector.broadcast %709 : vector<16x1xf32> to vector<16x32xf32>
    %720 = arith.subf %705, %719 : vector<16x32xf32>
    %cst_208 = arith.constant 9.99999974E-6 : f32
    %721 = vector.broadcast %cst_208 : f32 to vector<16x1xf32>
    %722 = arith.addf %718, %721 : vector<16x1xf32>
    %723 = math.rsqrt %722 : vector<16x1xf32>
    %724 = vector.broadcast %723 : vector<16x1xf32> to vector<16x32xf32>
    %725 = arith.mulf %720, %724 : vector<16x32xf32>
    %c20 = arith.constant 20 : index
    %c0_209 = arith.constant 0 : index
    %726 = vector.load %arg2[%c20, %c0_209] : memref<32x128xf32, #tpu.memory_space<vmem>>, vector<1x32xf32>
    %727 = vector.broadcast %726 : vector<1x32xf32> to vector<16x32xf32>
    %728 = arith.mulf %725, %727 : vector<16x32xf32>
    %c21 = arith.constant 21 : index
    %c0_210 = arith.constant 0 : index
    %729 = vector.load %arg2[%c21, %c0_210] : memref<32x128xf32, #tpu.memory_space<vmem>>, vector<1x32xf32>
    %730 = vector.broadcast %729 : vector<1x32xf32> to vector<16x32xf32>
    %731 = arith.addf %728, %730 : vector<16x32xf32>
    %c496 = arith.constant 496 : index
    %c0_211 = arith.constant 0 : index
    %732 = vector.load %arg1[%c496, %c0_211] : memref<592x128xf32, #tpu.memory_space<vmem>>, vector<32x32xf32>
    %cst_212 = arith.constant dense<0.000000e+00> : vector<16x32xf32>
    %733 = tpu.matmul %731, %732, %cst_212 {dimension_numbers = #tpu.dot_dimension_numbers<[1], [0], [0], [1], [0, 0, 1, 1], [], []>} : vector<16x32xf32>, vector<32x32xf32>, vector<16x32xf32> -> vector<16x32xf32>
    %c22 = arith.constant 22 : index
    %c0_213 = arith.constant 0 : index
    %734 = vector.load %arg2[%c22, %c0_213] : memref<32x128xf32, #tpu.memory_space<vmem>>, vector<1x32xf32>
    %735 = vector.broadcast %734 : vector<1x32xf32> to vector<16x32xf32>
    %736 = arith.addf %733, %735 : vector<16x32xf32>
    %737 = arith.addf %736, %731 : vector<16x32xf32>
    %cst_214 = arith.constant dense<0.000000e+00> : vector<16xf32>
    %738 = vector.multi_reduction <add>, %737, %cst_214 [1] : vector<16x32xf32> to vector<16xf32>
    %739 = vector.shape_cast %738 : vector<16xf32> to vector<16x1xf32>
    %cst_215 = arith.constant 3.200000e+01 : f32
    %740 = vector.broadcast %cst_215 : f32 to vector<16x1xf32>
    %741 = arith.divf %739, %740 : vector<16x1xf32>
    %742 = arith.mulf %737, %737 : vector<16x32xf32>
    %cst_216 = arith.constant dense<0.000000e+00> : vector<16xf32>
    %743 = vector.multi_reduction <add>, %742, %cst_216 [1] : vector<16x32xf32> to vector<16xf32>
    %744 = vector.shape_cast %743 : vector<16xf32> to vector<16x1xf32>
    %cst_217 = arith.constant 3.200000e+01 : f32
    %745 = vector.broadcast %cst_217 : f32 to vector<16x1xf32>
    %746 = arith.divf %744, %745 : vector<16x1xf32>
    %747 = arith.mulf %741, %741 : vector<16x1xf32>
    %748 = arith.subf %746, %747 : vector<16x1xf32>
    %cst_218 = arith.constant 0.000000e+00 : f32
    %749 = vector.broadcast %cst_218 : f32 to vector<16x1xf32>
    %750 = arith.maximumf %748, %749 : vector<16x1xf32>
    %751 = vector.broadcast %741 : vector<16x1xf32> to vector<16x32xf32>
    %752 = arith.subf %737, %751 : vector<16x32xf32>
    %cst_219 = arith.constant 9.99999974E-6 : f32
    %753 = vector.broadcast %cst_219 : f32 to vector<16x1xf32>
    %754 = arith.addf %750, %753 : vector<16x1xf32>
    %755 = math.rsqrt %754 : vector<16x1xf32>
    %756 = vector.broadcast %755 : vector<16x1xf32> to vector<16x32xf32>
    %757 = arith.mulf %752, %756 : vector<16x32xf32>
    %c23 = arith.constant 23 : index
    %c0_220 = arith.constant 0 : index
    %758 = vector.load %arg2[%c23, %c0_220] : memref<32x128xf32, #tpu.memory_space<vmem>>, vector<1x32xf32>
    %759 = vector.broadcast %758 : vector<1x32xf32> to vector<16x32xf32>
    %760 = arith.mulf %757, %759 : vector<16x32xf32>
    %c24_221 = arith.constant 24 : index
    %c0_222 = arith.constant 0 : index
    %761 = vector.load %arg2[%c24_221, %c0_222] : memref<32x128xf32, #tpu.memory_space<vmem>>, vector<1x32xf32>
    %762 = vector.broadcast %761 : vector<1x32xf32> to vector<16x32xf32>
    %763 = arith.addf %760, %762 : vector<16x32xf32>
    %cst_223 = arith.constant 0.000000e+00 : f32
    %764 = vector.broadcast %cst_223 : f32 to vector<16x32xf32>
    %765 = arith.maximumf %763, %764 : vector<16x32xf32>
    %c528 = arith.constant 528 : index
    %c0_224 = arith.constant 0 : index
    %766 = vector.load %arg1[%c528, %c0_224] : memref<592x128xf32, #tpu.memory_space<vmem>>, vector<32x32xf32>
    %cst_225 = arith.constant dense<0.000000e+00> : vector<16x32xf32>
    %767 = tpu.matmul %765, %766, %cst_225 {dimension_numbers = #tpu.dot_dimension_numbers<[1], [0], [0], [1], [0, 0, 1, 1], [], []>} : vector<16x32xf32>, vector<32x32xf32>, vector<16x32xf32> -> vector<16x32xf32>
    %c25 = arith.constant 25 : index
    %c0_226 = arith.constant 0 : index
    %768 = vector.load %arg2[%c25, %c0_226] : memref<32x128xf32, #tpu.memory_space<vmem>>, vector<1x32xf32>
    %769 = vector.broadcast %768 : vector<1x32xf32> to vector<16x32xf32>
    %770 = arith.addf %767, %769 : vector<16x32xf32>
    %771 = arith.addf %770, %765 : vector<16x32xf32>
    %cst_227 = arith.constant dense<0.000000e+00> : vector<16xf32>
    %772 = vector.multi_reduction <add>, %771, %cst_227 [1] : vector<16x32xf32> to vector<16xf32>
    %773 = vector.shape_cast %772 : vector<16xf32> to vector<16x1xf32>
    %cst_228 = arith.constant 3.200000e+01 : f32
    %774 = vector.broadcast %cst_228 : f32 to vector<16x1xf32>
    %775 = arith.divf %773, %774 : vector<16x1xf32>
    %776 = arith.mulf %771, %771 : vector<16x32xf32>
    %cst_229 = arith.constant dense<0.000000e+00> : vector<16xf32>
    %777 = vector.multi_reduction <add>, %776, %cst_229 [1] : vector<16x32xf32> to vector<16xf32>
    %778 = vector.shape_cast %777 : vector<16xf32> to vector<16x1xf32>
    %cst_230 = arith.constant 3.200000e+01 : f32
    %779 = vector.broadcast %cst_230 : f32 to vector<16x1xf32>
    %780 = arith.divf %778, %779 : vector<16x1xf32>
    %781 = arith.mulf %775, %775 : vector<16x1xf32>
    %782 = arith.subf %780, %781 : vector<16x1xf32>
    %cst_231 = arith.constant 0.000000e+00 : f32
    %783 = vector.broadcast %cst_231 : f32 to vector<16x1xf32>
    %784 = arith.maximumf %782, %783 : vector<16x1xf32>
    %785 = vector.broadcast %775 : vector<16x1xf32> to vector<16x32xf32>
    %786 = arith.subf %771, %785 : vector<16x32xf32>
    %cst_232 = arith.constant 9.99999974E-6 : f32
    %787 = vector.broadcast %cst_232 : f32 to vector<16x1xf32>
    %788 = arith.addf %784, %787 : vector<16x1xf32>
    %789 = math.rsqrt %788 : vector<16x1xf32>
    %790 = vector.broadcast %789 : vector<16x1xf32> to vector<16x32xf32>
    %791 = arith.mulf %786, %790 : vector<16x32xf32>
    %c26 = arith.constant 26 : index
    %c0_233 = arith.constant 0 : index
    %792 = vector.load %arg2[%c26, %c0_233] : memref<32x128xf32, #tpu.memory_space<vmem>>, vector<1x32xf32>
    %793 = vector.broadcast %792 : vector<1x32xf32> to vector<16x32xf32>
    %794 = arith.mulf %791, %793 : vector<16x32xf32>
    %c27 = arith.constant 27 : index
    %c0_234 = arith.constant 0 : index
    %795 = vector.load %arg2[%c27, %c0_234] : memref<32x128xf32, #tpu.memory_space<vmem>>, vector<1x32xf32>
    %796 = vector.broadcast %795 : vector<1x32xf32> to vector<16x32xf32>
    %797 = arith.addf %794, %796 : vector<16x32xf32>
    %cst_235 = arith.constant 0.000000e+00 : f32
    %798 = vector.broadcast %cst_235 : f32 to vector<16x32xf32>
    %799 = arith.maximumf %797, %798 : vector<16x32xf32>
    %c560 = arith.constant 560 : index
    %c0_236 = arith.constant 0 : index
    %800 = vector.load %arg1[%c560, %c0_236] : memref<592x128xf32, #tpu.memory_space<vmem>>, vector<32x128xf32>
    %cst_237 = arith.constant dense<0.000000e+00> : vector<16x128xf32>
    %801 = tpu.matmul %799, %800, %cst_237 {dimension_numbers = #tpu.dot_dimension_numbers<[1], [0], [0], [1], [0, 0, 1, 1], [], []>} : vector<16x32xf32>, vector<32x128xf32>, vector<16x128xf32> -> vector<16x128xf32>
    %c28 = arith.constant 28 : index
    %c0_238 = arith.constant 0 : index
    %802 = vector.load %arg2[%c28, %c0_238] : memref<32x128xf32, #tpu.memory_space<vmem>>, vector<1x128xf32>
    %803 = vector.broadcast %802 : vector<1x128xf32> to vector<16x128xf32>
    %804 = arith.addf %801, %803 : vector<16x128xf32>
    %c0_239 = arith.constant 0 : index
    %c0_240 = arith.constant 0 : index
    %805 = vector.load %arg3[%c0_239, %c0_240] : memref<16x128xf32, #tpu.memory_space<vmem>>, vector<16x128xf32>
    tpu.vector_store %arg3[%c0_239, %c0_240], %804 {strides = array<i32>} : memref<16x128xf32, #tpu.memory_space<vmem>>, vector<16x128xf32>,
    return
  }
}

</mosaic_0001>

<bundles_post_ra>
// kernel: tpu_custom_call.1
= control target key start
LH: loop header
LB: loop body
LE: loop exit
PB: predicated region body
PF: predicated region fallthrough
CT: control target
= control target key end

     0   :  { %8 = vsyncpa [#allocation4], 0  ;;  %s6768_s0 = inlined_call_operand.vmem [shape: f32[64,8], index: 0, kind: input, shape index: {}]   ;;  %s6769_s1 = inlined_call_operand.hbm [shape: f32[592,128], index: 1, kind: input, shape index: {}]   ;;  %s6770_s2 = inlined_call_operand.vmem [shape: f32[32,128], index: 2, kind: input, shape index: {}]   ;;  %s6771_s3 = inlined_call_operand.hbm [shape: f32[16,128], index: 3, kind: output, shape index: {}]  }
   0x1   :  { %9 = vsyncpa [#allocation5], 0  ;;  %s5805_s12 = smov [#allocation3]  }
   0x2   :  { %s17_s13 = sshll.u32 %s5805_s12, 4  ;;  %s18_s13 = int_to_ptr.vmem [resolvable:$true] %s17_s13 }
   0x3   :  { %s5769_s14 = scalar_lea.vmem %s18_s13, 9472  ;;  %p5774_p1 = scmp.lt.s32.totalorder %s18_s13, %s18_s13 }
   0x4   :  { %p5770_p0 = scmp.ne.s32.totalorder %s18_s13, %s5769_s14  ;;  %p5775_p2 = scmp.lt.s32.totalorder %s5769_s14, %s5769_s14 }
   0x6   :  { %p5776_p3 = por %p5775_p2, %p5774_p1 }
   0x8   :  { %p5777_p4 = pnand %p5776_p3, %p5770_p0 }
   0xa   :  { %5780 = shalt.err (!%p5777_p4)
}
   0xb   :  { %s5806_s15 = smov 128   ;;  %s5807_s16 = smov 8  }
   0xc   :  { %23 = dma.hbm_to_vmem [thread:$0]  %s6769_s1, 9472, %s18_s13, [#allocation4], %s5806_s15, %s5806_s15, %s5807_s16  }
   0xd   :  { %5801 = dma.done.wait [#allocation4], 9472  }
   0xe   :  { %5802 = vsyncadd [#allocation4], 4294957824  ;;  %v5808_v0 = vmov 0.0   ;;  %vm5809_vm0 = vmmov 0   ;;  %vm43_vm1 = vcmask 64512   ;;  %v37_v1 = vld [vmem:[#allocation3] sm:$0xff] }
   0xf   :  { %5123 = vmatprep.subr.mxu1 %v5808_v0  ;;  %5131 = vmatprep.mubr.msk.f32.mxu1 %vm5809_vm0, %v5808_v0  ;;  %v5842_v2 = vld [vmem:[#allocation3 + $0x20] sm:$0xff]  ;;  %v5853_v4 = vld [vmem:[%s6768_s0 + $0x8] sm:$0xff]  ;;  %v5855_v5 = vld [vmem:[#allocation3 + $0x18] sm:$0xff]  ;;  %s5810_s24 = smov 64   ;;  %s5811_s25 = smov 32   ;;  %vm177_vm2 = vcmask 261120  }
  0x10   :  { %v5847_v3 = vld [vmem:[%s6768_s0] sm:$0xff]  ;;  %5109 = vmatprep.subr.mxu0 %v37_v1  ;;  %5124 = vmatpush3.msra.mxu1 %v5842_v2  ;;  %v5862_v6 = vld [vmem:[#allocation3 + $0x10] sm:$0xff]  ;;  %v5867_v7 = vld [vmem:[#allocation3 + $0x8] sm:$0xff]  ;;  %vm3136_vm3 = vcmask 130048   ;;  %vm4233_vm4 = vcmask 523264   ;;  %s5812_s12 = smov [#allocation6]  }
  0x11   :  { %5110 = vmatpush3.msra.mxu0 %v37_v1  ;;  %5111 = vmatprep.mubr.msk.f32.mxu0 %vm43_vm1, %v5847_v3  ;;  %v5895_v9 = vld [vmem:[%s6770_s2] ss:$0 sm:$0xff]  ;;  %v5920_v43 = vld [vmem:[%s6768_s0 + $0x10] sm:$0xff]  ;;  %v5925_v44 = vld [vmem:[%s6768_s0 + $0x18] sm:$0xff]  ;;  %s4740_s13 = sshll.u32 %s5812_s12, 4  ;;  %s4741_s13 = int_to_ptr.vmem [resolvable:$true] %s4740_s13 }
  0x12   :  { %5125 = vmatprep.subr.mxu1 %v5808_v0  ;;  %5112 = vmatmul.mubr.msk.f32.vlgmr.msra.gmra.mxu0 %vm43_vm1, %v5853_v4  ;;  %v5930_v45 = vld [vmem:[%s6768_s0 + $0x20] sm:$0xff]  ;;  %v5941_v46 = vld [vmem:[%s6768_s0 + $0x28] sm:$0xff]  ;;  %v5946_v47 = vld [vmem:[%s6768_s0 + $0x30] sm:$0xff]  ;;  %s5781_s14 = scalar_lea.vmem %s4741_s13, 256  ;;  %p5786_p6 = scmp.lt.s32.totalorder %s4741_s13, %s4741_s13 }
  0x13   :  { %5126 = vmatpush3.msra.mxu1 %v5855_v5  ;;  %5145 = vmatprep.subr.mxu0 %v5808_v0  ;;  %v5955_v48 = vld [vmem:[%s6768_s0 + $0x38] sm:$0xff]  ;;  %p5782_p5 = scmp.ne.s32.totalorder %s4741_s13, %s5781_s14  ;;  %p5787_p7 = scmp.lt.s32.totalorder %s5781_s14, %s5781_s14 }
  0x14   :  { %5127 = vmatprep.subr.mxu1 %v5808_v0  ;;  %5146 = vmatpush3.msra.mxu0 %v5842_v2 }
  0x15   :  { %5128 = vmatpush3.msra.mxu1 %v5862_v6  ;;  %5147 = vmatprep.subr.mxu0 %v5808_v0  ;;  %p5788_p8 = por %p5787_p7, %p5786_p6 }
  0x16   :  { %5129 = vmatprep.subr.mxu1 %v5808_v0  ;;  %5148 = vmatpush3.msra.mxu0 %v5855_v5 }
  0x17   :  { %5130 = vmatpush3.msra.mxu1 %v5867_v7  ;;  %5149 = vmatprep.subr.mxu0 %v5808_v0  ;;  %p5789_p9 = pnand %p5788_p8, %p5782_p5 }
  0x18   :  { %5132 = vmatmul.mubr.f32.vlgmr.msra.gmra.mxu1 %v5808_v0  ;;  %5134 = vmatprep.subr.mxu1 %v5808_v0 }
  0x19   :  { %5135 = vmatpush3.msra.mxu1 %v5842_v2  ;;  %5142 = vmatprep.mubr.msk.f32.mxu1 %vm5809_vm0, %v5808_v0 }
  0x1a   :  { %5136 = vmatprep.subr.mxu1 %v5808_v0  ;;  %5150 = vmatpush3.msra.mxu0 %v5862_v6 }
  0x1b   :  { %5137 = vmatpush3.msra.mxu1 %v5855_v5  ;;  %5151 = vmatprep.subr.mxu0 %v5808_v0 }
  0x1c   :  { %5138 = vmatprep.subr.mxu1 %v5808_v0  ;;  %5152 = vmatpush3.msra.mxu0 %v5867_v7 }
  0x1d   :  { %5139 = vmatpush3.msra.mxu1 %v5862_v6  ;;  %5167 = vmatprep.subr.mxu0 %v5808_v0 }
  0x1e   :  { %5140 = vmatprep.subr.mxu1 %v5808_v0  ;;  %5114 = vmatprep.mubr.msk.f32.mxu0 %vm43_vm1, %v5920_v43 }
  0x1f   :  { %5141 = vmatpush3.msra.mxu1 %v5867_v7  ;;  %5115 = vmatmul.mubr.msk.f32.gmra.mxu0 %vm43_vm1, %v5925_v44 }
  0x20   :  { %5156 = vmatprep.subr.mxu1 %v5808_v0  ;;  %5117 = vmatprep.mubr.msk.f32.mxu0 %vm43_vm1, %v5930_v45 }
  0x23   :  { %5118 = vmatmul.mubr.msk.f32.gmra.mxu0 %vm43_vm1, %v5941_v46 }
  0x24   :  { %5120 = vmatprep.mubr.msk.f32.mxu0 %vm43_vm1, %v5946_v47 }
  0x27   :  { %5121 = vmatmul.mubr.msk.f32.gmra.mxu0 %vm43_vm1, %v5955_v48 }
  0x28   :  { %5153 = vmatprep.mubr.msk.f32.mxu0 %vm5809_vm0, %v5808_v0 }
  0xd2   :  { %v5113_v8 = vpop.f32.mrf.mxu0 }
  0xd3   :  { %v140_v29 = vadd.f32 %v5113_v8, %v5895_v9 }
  0xd4   :  { %v134_v10 = vpop.f32.mrf.mxu0 }
  0xd5   :  { %v135_v11 = vadd.f32 %v5895_v9, %v134_v10 }
  0xd8   :  { %v247_v12 = vpop.f32.mrf.mxu1 }
  0xd9   :  { %v251_v13 = vadd.f32 %v247_v12, %v135_v11 }
  0xda   :  { %v5133_v14 = vpop.f32.mrf.mxu1 }
  0xdb   :  { %5569 = vtanh.f32 %v251_v13  ;;  %v4761_v16 = vmul.f32 -1.442695, %v251_v13 }
  0xdd   :  { %5571 = vpow2.f32 %v4761_v16 }
  0xdf   :  { %v5116_v53 = vpop.f32.mrf.mxu0 }
  0xe1   :  { %v144_v54 = vpop.f32.mrf.mxu0 }
  0xe2   :  { %v145_v59 = vadd.f32 %v5895_v9, %v144_v54 }
  0xe3   :  { %v5975_v55 = vpop.f32.mrf.mxu0 }
  0xe5   :  { %v5977_v56 = vpop.f32.mrf.mxu0 }
  0xe7   :  { %v5979_v57 = vpop.f32.mrf.mxu0 }
  0xe8   :  { %v5570_v15 = vpop.eup %5569 }
  0xe9   :  { %261 = vrot.lane.b32.xlu0 %v5570_v15, %s5810_s24  ;;  %v5981_v58 = vpop.f32.mrf.mxu0 }
  0xea   :  { %v5572_v17 = vpop.eup %5571 }
  0xeb   :  { %v255_v18 = vadd.f32 1.0, %v5572_v17 }
  0xed   :  { %5573 = vrcp.f32 %v255_v18 }
  0xfa   :  { %v5574_v19 = vpop.eup %5573 }
  0xfb   :  { %v259_v22 = vmul.f32 0.0, %v5574_v19 }
 0x15b   :  { %v262_v20 = vpop.permute.xlu0 %261 }
 0x15c   :  { %v264_v21 = vmul.f32 %v5574_v19, %v262_v20 }
 0x15e   :  { %266 = vrot.lane.b32.xlu0 %v264_v21, %s5811_s25  ;;  %v150_v21 = vadd.f32 %v5116_v53, %v5895_v9 }
 0x1d0   :  { %v267_v23 = vpop.permute.xlu0 %266 }
 0x1d1   :  { %v269_v24 = vadd.f32 %v267_v23, %v259_v22 }
 0x1d3   :  { %5575 = vtanh.f32 %v269_v24 }
 0x1e0   :  { %v5576_v25 = vpop.eup %5575 }
 0x1e1   :  { %272 = vrot.lane.b32.xlu1 %v5576_v25, %s5810_s24 }
 0x253   :  { %v273_v26 = vpop.permute.xlu1 %272 }
 0x254   :  { %v275_v27 = vmul.f32 %v5574_v19, %v273_v26 }
 0x256   :  { %277 = vrot.lane.b32.xlu1 %v275_v27, %s5811_s25 }
 0x2c8   :  { %v278_v28 = vpop.permute.xlu1 %277 }
 0x2c9   :  { %280 = vst.msk [vmem:[#allocation2] sm:$0xff] %vm177_vm2, %v278_v28  ;;  %5143 = vmatmul.mubr.msk.f32.vlgmr.msra.gmra.mxu1 %vm177_vm2, %v278_v28 }
 0x2ca   :  { %5157 = vmatpush3.msra.mxu1 %v5842_v2  ;;  %5164 = vmatprep.mubr.msk.f32.mxu1 %vm5809_vm0, %v5808_v0 }
 0x2cb   :  { %5158 = vmatprep.subr.mxu1 %v5808_v0 }
 0x2cc   :  { %5159 = vmatpush3.msra.mxu1 %v5855_v5 }
 0x2cd   :  { %5160 = vmatprep.subr.mxu1 %v5808_v0 }
 0x2ce   :  { %5161 = vmatpush3.msra.mxu1 %v5862_v6 }
 0x2cf   :  { %5162 = vmatprep.subr.mxu1 %v5808_v0 }
 0x2d0   :  { %5163 = vmatpush3.msra.mxu1 %v5867_v7 }
 0x2d1   :  { %5178 = vmatprep.subr.mxu1 %v5808_v0 }
 0x389   :  { %v349_v30 = vpop.f32.mrf.mxu1 }
 0x38a   :  { %v353_v31 = vadd.f32 %v349_v30, %v140_v29 }
 0x38b   :  { %v5144_v32 = vpop.f32.mrf.mxu1 }
 0x38c   :  { %5577 = vtanh.f32 %v353_v31  ;;  %v4763_v34 = vmul.f32 -1.442695, %v353_v31 }
 0x38e   :  { %5579 = vpow2.f32 %v4763_v34 }
 0x399   :  { %v5578_v33 = vpop.eup %5577 }
 0x39a   :  { %363 = vrot.lane.b32.xlu0 %v5578_v33, %s5810_s24 }
 0x39b   :  { %v5580_v35 = vpop.eup %5579 }
 0x39c   :  { %v357_v36 = vadd.f32 1.0, %v5580_v35 }
 0x39e   :  { %5581 = vrcp.f32 %v357_v36 }
 0x3ab   :  { %v5582_v37 = vpop.eup %5581 }
 0x3ac   :  { %v361_v40 = vmul.f32 %v5582_v37, %v269_v24 }
 0x40c   :  { %v364_v38 = vpop.permute.xlu0 %363 }
 0x40d   :  { %v366_v39 = vmul.f32 %v5582_v37, %v364_v38 }
 0x40f   :  { %368 = vrot.lane.b32.xlu1 %v366_v39, %s5811_s25  ;;  %v155_v39 = vadd.f32 %v5895_v9, %v5977_v56 }
 0x481   :  { %v369_v41 = vpop.permute.xlu1 %368 }
 0x482   :  { %v371_v42 = vadd.f32 %v369_v41, %v361_v40 }
 0x484   :  { %5583 = vtanh.f32 %v371_v42 }
 0x491   :  { %v5584_v49 = vpop.eup %5583 }
 0x492   :  { %374 = vrot.lane.b32.xlu0 %v5584_v49, %s5810_s24 }
 0x504   :  { %v375_v50 = vpop.permute.xlu0 %374 }
 0x505   :  { %v377_v51 = vmul.f32 %v5582_v37, %v375_v50 }
 0x507   :  { %379 = vrot.lane.b32.xlu1 %v377_v51, %s5811_s25 }
 0x579   :  { %v380_v52 = vpop.permute.xlu1 %379 }
 0x57a   :  { %382 = vst.msk [vmem:[#allocation2 + $0x8] sm:$0xff] %vm177_vm2, %v380_v52  ;;  %5154 = vmatmul.mubr.msk.f32.vlgmr.msra.gmra.mxu0 %vm177_vm2, %v380_v52 }
 0x57b   :  { %5168 = vmatpush3.msra.mxu0 %v5842_v2  ;;  %5175 = vmatprep.mubr.msk.f32.mxu0 %vm5809_vm0, %v5808_v0 }
 0x57c   :  { %5169 = vmatprep.subr.mxu0 %v5808_v0 }
 0x57d   :  { %5170 = vmatpush3.msra.mxu0 %v5855_v5 }
 0x57e   :  { %5171 = vmatprep.subr.mxu0 %v5808_v0 }
 0x57f   :  { %5172 = vmatpush3.msra.mxu0 %v5862_v6 }
 0x580   :  { %5173 = vmatprep.subr.mxu0 %v5808_v0 }
 0x581   :  { %5174 = vmatpush3.msra.mxu0 %v5867_v7 }
 0x582   :  { %5189 = vmatprep.subr.mxu0 %v5808_v0 }
 0x63a   :  { %v451_v60 = vpop.f32.mrf.mxu0 }
 0x63b   :  { %v455_v61 = vadd.f32 %v451_v60, %v145_v59 }
 0x63c   :  { %v5155_v62 = vpop.f32.mrf.mxu0 }
 0x63d   :  { %5585 = vtanh.f32 %v455_v61  ;;  %v4765_v1 = vmul.f32 -1.442695, %v455_v61 }
 0x63f   :  { %5587 = vpow2.f32 %v4765_v1 }
 0x64a   :  { %v5586_v63 = vpop.eup %5585 }
 0x64b   :  { %465 = vrot.lane.b32.xlu0 %v5586_v63, %s5810_s24 }
 0x64c   :  { %v5588_v8 = vpop.eup %5587 }
 0x64d   :  { %v459_v10 = vadd.f32 1.0, %v5588_v8 }
 0x64f   :  { %5589 = vrcp.f32 %v459_v10  ;;  %v160_v10 = vadd.f32 %v5975_v55, %v5895_v9 }
 0x65c   :  { %v5590_v11 = vpop.eup %5589 }
 0x65d   :  { %v463_v14 = vmul.f32 %v5590_v11, %v371_v42 }
 0x6bd   :  { %v466_v12 = vpop.permute.xlu0 %465 }
 0x6be   :  { %v468_v13 = vmul.f32 %v5590_v11, %v466_v12 }
 0x6c0   :  { %470 = vrot.lane.b32.xlu1 %v468_v13, %s5811_s25 }
 0x732   :  { %v471_v15 = vpop.permute.xlu1 %470 }
 0x733   :  { %v473_v16 = vadd.f32 %v471_v15, %v463_v14 }
 0x735   :  { %5591 = vtanh.f32 %v473_v16 }
 0x742   :  { %v5592_v17 = vpop.eup %5591 }
 0x743   :  { %476 = vrot.lane.b32.xlu0 %v5592_v17, %s5810_s24 }
 0x7b5   :  { %v477_v18 = vpop.permute.xlu0 %476 }
 0x7b6   :  { %v479_v19 = vmul.f32 %v5590_v11, %v477_v18 }
 0x7b8   :  { %481 = vrot.lane.b32.xlu1 %v479_v19, %s5811_s25 }
 0x82a   :  { %v482_v20 = vpop.permute.xlu1 %481 }
 0x82b   :  { %484 = vst.msk [vmem:[#allocation2 + $0x10] sm:$0xff] %vm177_vm2, %v482_v20  ;;  %5165 = vmatmul.mubr.msk.f32.vlgmr.msra.gmra.mxu1 %vm177_vm2, %v482_v20  ;;  %v1003_v20 = vld [vmem:[#allocation3 + $0x28] sm:$0xff] }
 0x82c   :  { %5179 = vmatpush3.msra.mxu1 %v5842_v2  ;;  %5186 = vmatprep.mubr.msk.f32.mxu1 %vm5809_vm0, %v5808_v0 }
 0x82d   :  { %5180 = vmatprep.subr.mxu1 %v5808_v0 }
 0x82e   :  { %5181 = vmatpush3.msra.mxu1 %v5855_v5 }
 0x82f   :  { %5182 = vmatprep.subr.mxu1 %v5808_v0 }
 0x830   :  { %5183 = vmatpush3.msra.mxu1 %v5862_v6 }
 0x831   :  { %5184 = vmatprep.subr.mxu1 %v5808_v0 }
 0x832   :  { %5185 = vmatpush3.msra.mxu1 %v5867_v7 }
 0x833   :  { %5200 = vmatprep.subr.mxu1 %v5808_v0 }
 0x8eb   :  { %v553_v22 = vpop.f32.mrf.mxu1 }
 0x8ec   :  { %v557_v23 = vadd.f32 %v553_v22, %v150_v21 }
 0x8ed   :  { %v5166_v24 = vpop.f32.mrf.mxu1 }
 0x8ee   :  { %5593 = vtanh.f32 %v557_v23  ;;  %v4767_v26 = vmul.f32 -1.442695, %v557_v23 }
 0x8f0   :  { %5595 = vpow2.f32 %v4767_v26 }
 0x8fb   :  { %v5594_v25 = vpop.eup %5593 }
 0x8fc   :  { %567 = vrot.lane.b32.xlu0 %v5594_v25, %s5810_s24 }
 0x8fd   :  { %v5596_v27 = vpop.eup %5595 }
 0x8fe   :  { %v561_v28 = vadd.f32 1.0, %v5596_v27 }
 0x900   :  { %5597 = vrcp.f32 %v561_v28 }
 0x90d   :  { %v5598_v29 = vpop.eup %5597 }
 0x90e   :  { %v565_v32 = vmul.f32 %v5598_v29, %v473_v16 }
 0x96e   :  { %v568_v30 = vpop.permute.xlu0 %567 }
 0x96f   :  { %v570_v31 = vmul.f32 %v5598_v29, %v568_v30 }
 0x971   :  { %572 = vrot.lane.b32.xlu1 %v570_v31, %s5811_s25  ;;  %v996_v31 = vld [vmem:[#allocation2 + $0x8] sm:$0xff] }
 0x9e3   :  { %v573_v33 = vpop.permute.xlu1 %572 }
 0x9e4   :  { %v575_v34 = vadd.f32 %v573_v33, %v565_v32  ;;  %v995_v32 = vld [vmem:[#allocation2] sm:$0xff] }
 0x9e6   :  { %5599 = vtanh.f32 %v575_v34 }
 0x9f3   :  { %v5600_v35 = vpop.eup %5599 }
 0x9f4   :  { %578 = vrot.lane.b32.xlu0 %v5600_v35, %s5810_s24 }
 0xa66   :  { %v579_v36 = vpop.permute.xlu0 %578 }
 0xa67   :  { %v581_v37 = vmul.f32 %v5598_v29, %v579_v36 }
 0xa69   :  { %583 = vrot.lane.b32.xlu1 %v581_v37, %s5811_s25 }
 0xadb   :  { %v584_v38 = vpop.permute.xlu1 %583 }
 0xadc   :  { %586 = vst.msk [vmem:[#allocation2 + $0x18] sm:$0xff] %vm177_vm2, %v584_v38  ;;  %5176 = vmatmul.mubr.msk.f32.vlgmr.msra.gmra.mxu0 %vm177_vm2, %v584_v38 }
 0xadd   :  { %5190 = vmatpush3.msra.mxu0 %v5842_v2  ;;  %5197 = vmatprep.mubr.msk.f32.mxu0 %vm5809_vm0, %v5808_v0 }
 0xade   :  { %5191 = vmatprep.subr.mxu0 %v5808_v0 }
 0xadf   :  { %5192 = vmatpush3.msra.mxu0 %v5855_v5 }
 0xae0   :  { %5193 = vmatprep.subr.mxu0 %v5808_v0 }
 0xae1   :  { %5194 = vmatpush3.msra.mxu0 %v5862_v6 }
 0xae2   :  { %5195 = vmatprep.subr.mxu0 %v5808_v0 }
 0xae3   :  { %5196 = vmatpush3.msra.mxu0 %v5867_v7 }
 0xae4   :  { %5211 = vmatprep.subr.mxu0 %v1003_v20 }
 0xb9c   :  { %v655_v40 = vpop.f32.mrf.mxu0 }
 0xb9d   :  { %v659_v41 = vadd.f32 %v655_v40, %v155_v39 }
 0xb9e   :  { %v5177_v42 = vpop.f32.mrf.mxu0 }
 0xb9f   :  { %5601 = vtanh.f32 %v659_v41  ;;  %v4769_v50 = vmul.f32 -1.442695, %v659_v41 }
 0xba1   :  { %5603 = vpow2.f32 %v4769_v50 }
 0xbac   :  { %v5602_v49 = vpop.eup %5601 }
 0xbad   :  { %669 = vrot.lane.b32.xlu0 %v5602_v49, %s5810_s24 }
 0xbae   :  { %v5604_v51 = vpop.eup %5603 }
 0xbaf   :  { %v663_v52 = vadd.f32 1.0, %v5604_v51  ;;  %v6089_v51 = vld [vmem:[#allocation3 + $0x68] sm:$0xff] }
 0xbb1   :  { %5605 = vrcp.f32 %v663_v52  ;;  %v1280_v52 = vld [vmem:[#allocation3 + $0x48] sm:$0xff] }
 0xbbe   :  { %v5606_v53 = vpop.eup %5605 }
 0xbbf   :  { %v667_v60 = vmul.f32 %v5606_v53, %v575_v34 }
 0xc1f   :  { %v670_v54 = vpop.permute.xlu0 %669 }
 0xc20   :  { %v672_v59 = vmul.f32 %v5606_v53, %v670_v54  ;;  %v6097_v54 = vld [vmem:[#allocation3 + $0x58] sm:$0xff] }
 0xc22   :  { %674 = vrot.lane.b32.xlu1 %v672_v59, %s5811_s25  ;;  %v6101_v59 = vld [vmem:[#allocation3 + $0x50] sm:$0xff] }
 0xc94   :  { %v675_v61 = vpop.permute.xlu1 %674 }
 0xc95   :  { %v677_v56 = vadd.f32 %v675_v61, %v667_v60 }
 0xc97   :  { %5607 = vtanh.f32 %v677_v56 }
 0xca4   :  { %v5608_v62 = vpop.eup %5607 }
 0xca5   :  { %680 = vrot.lane.b32.xlu0 %v5608_v62, %s5810_s24 }
 0xd17   :  { %v681_v63 = vpop.permute.xlu0 %680 }
 0xd18   :  { %v683_v1 = vmul.f32 %v5606_v53, %v681_v63  ;;  %v6093_v53 = vld [vmem:[#allocation3 + $0x60] sm:$0xff] }
 0xd1a   :  { %685 = vrot.lane.b32.xlu1 %v683_v1, %s5811_s25 }
 0xd8c   :  { %v686_v8 = vpop.permute.xlu1 %685 }
 0xd8d   :  { %688 = vst.msk [vmem:[#allocation2 + $0x20] sm:$0xff] %vm177_vm2, %v686_v8  ;;  %5187 = vmatmul.mubr.msk.f32.vlgmr.msra.gmra.mxu1 %vm177_vm2, %v686_v8 }
 0xd8e   :  { %5201 = vmatpush3.msra.mxu1 %v5842_v2  ;;  %5208 = vmatprep.mubr.msk.f32.mxu1 %vm5809_vm0, %v5808_v0 }
 0xd8f   :  { %5202 = vmatprep.subr.mxu1 %v5808_v0 }
 0xd90   :  { %5203 = vmatpush3.msra.mxu1 %v5855_v5 }
 0xd91   :  { %5204 = vmatprep.subr.mxu1 %v5808_v0 }
 0xd92   :  { %5205 = vmatpush3.msra.mxu1 %v5862_v6 }
 0xd93   :  { %5206 = vmatprep.subr.mxu1 %v5808_v0 }
 0xd94   :  { %5207 = vmatpush3.msra.mxu1 %v5867_v7 }
 0xd95   :  { %5225 = vmatprep.subr.mxu1 %v1280_v52 }
 0xe4d   :  { %v757_v11 = vpop.f32.mrf.mxu1 }
 0xe4e   :  { %v761_v2 = vadd.f32 %v757_v11, %v160_v10 }
 0xe4f   :  { %v5188_v12 = vpop.f32.mrf.mxu1 }
 0xe50   :  { %5609 = vtanh.f32 %v761_v2  ;;  %v4771_v14 = vmul.f32 -1.442695, %v761_v2 }
 0xe52   :  { %5611 = vpow2.f32 %v4771_v14 }
 0xe5d   :  { %v5610_v13 = vpop.eup %5609 }
 0xe5e   :  { %771 = vrot.lane.b32.xlu0 %v5610_v13, %s5810_s24 }
 0xe5f   :  { %v5612_v5 = vpop.eup %5611 }
 0xe60   :  { %v765_v15 = vadd.f32 1.0, %v5612_v5 }
 0xe62   :  { %5613 = vrcp.f32 %v765_v15 }
 0xe6f   :  { %v5614_v6 = vpop.eup %5613 }
 0xe70   :  { %v769_v7 = vmul.f32 %v5614_v6, %v677_v56 }
 0xed0   :  { %v772_v16 = vpop.permute.xlu0 %771 }
 0xed1   :  { %v774_v17 = vmul.f32 %v5614_v6, %v772_v16 }
 0xed3   :  { %776 = vrot.lane.b32.xlu1 %v774_v17, %s5811_s25 }
 0xf45   :  { %v777_v18 = vpop.permute.xlu1 %776 }
 0xf46   :  { %v779_v55 = vadd.f32 %v777_v18, %v769_v7 }
 0xf48   :  { %5615 = vtanh.f32 %v779_v55 }
 0xf55   :  { %v5616_v19 = vpop.eup %5615 }
 0xf56   :  { %782 = vrot.lane.b32.xlu0 %v5616_v19, %s5810_s24  ;;  %v6121_v19 = vld [vmem:[%s6770_s2 + $0x2] ss:$0 sm:$0xff] }
 0xfc8   :  { %v783_v21 = vpop.permute.xlu0 %782 }
 0xfc9   :  { %v785_v22 = vmul.f32 %v5614_v6, %v783_v21 }
 0xfcb   :  { %787 = vrot.lane.b32.xlu1 %v785_v22, %s5811_s25 }
0x103d   :  { %v788_v23 = vpop.permute.xlu1 %787 }
0x103e   :  { %790 = vst.msk [vmem:[#allocation2 + $0x28] sm:$0xff] %vm177_vm2, %v788_v23  ;;  %5198 = vmatmul.mubr.msk.f32.vlgmr.msra.gmra.mxu0 %vm177_vm2, %v788_v23  ;;  %v6128_v23 = vld [vmem:[%s6770_s2 + $0x3] ss:$0 sm:$0xff] }
0x103f   :  { %5212 = vmatpush3.msra.mxu0 %v1003_v20  ;;  %5213 = vmatprep.mubr.msk.f32.mxu0 %vm43_vm1, %v5847_v3  ;;  %v165_v3 = vadd.f32 %v5895_v9, %v5981_v58  ;;  %v6067_v58 = vld [vmem:[%s6770_s2 + $0x1] ss:$0 sm:$0xff] }
0x1040   :  { %5245 = vmatprep.subr.mxu0 %v5808_v0 }
0x1042   :  { %5214 = vmatmul.mubr.msk.f32.vlgmr.msra.gmra.mxu0 %vm43_vm1, %v5853_v4 }
0x1043   :  { %5216 = vmatprep.mubr.msk.f32.mxu0 %vm43_vm1, %v5920_v43  ;;  %5246 = vmatpush3.msra.mxu0 %v6089_v51 }
0x1044   :  { %5247 = vmatprep.subr.mxu0 %v5808_v0 }
0x1045   :  { %5248 = vmatpush3.msra.mxu0 %v6093_v53 }
0x1046   :  { %5217 = vmatmul.mubr.msk.f32.gmra.mxu0 %vm43_vm1, %v5925_v44  ;;  %5249 = vmatprep.subr.mxu0 %v5808_v0 }
0x1047   :  { %5219 = vmatprep.mubr.msk.f32.mxu0 %vm43_vm1, %v5930_v45  ;;  %5250 = vmatpush3.msra.mxu0 %v6097_v54 }
0x1048   :  { %5251 = vmatprep.subr.mxu0 %v5808_v0 }
0x1049   :  { %5252 = vmatpush3.msra.mxu0 %v6101_v59 }
0x104a   :  { %5220 = vmatmul.mubr.msk.f32.gmra.mxu0 %vm43_vm1, %v5941_v46  ;;  %5256 = vmatprep.subr.mxu0 %v5808_v0 }
0x104b   :  { %5222 = vmatprep.mubr.msk.f32.mxu0 %vm43_vm1, %v5946_v47 }
0x104e   :  { %5223 = vmatmul.mubr.msk.f32.gmra.mxu0 %vm43_vm1, %v5955_v48 }
0x104f   :  { %5253 = vmatprep.mubr.msk.f32.mxu0 %vm5809_vm0, %v5808_v0 }
0x1052   :  { %5254 = vmatmul.mubr.f32.vlgmr.msra.gmra.mxu0 %v5808_v0 }
0x1053   :  { %5257 = vmatpush3.msra.mxu0 %v6089_v51  ;;  %5264 = vmatprep.mubr.msk.f32.mxu0 %vm5809_vm0, %v5808_v0 }
0x1054   :  { %5258 = vmatprep.subr.mxu0 %v5808_v0 }
0x1055   :  { %5259 = vmatpush3.msra.mxu0 %v6093_v53 }
0x1056   :  { %5260 = vmatprep.subr.mxu0 %v5808_v0 }
0x1057   :  { %5261 = vmatpush3.msra.mxu0 %v6097_v54 }
0x1058   :  { %5262 = vmatprep.subr.mxu0 %v5808_v0 }
0x1059   :  { %5263 = vmatpush3.msra.mxu0 %v6101_v59 }
0x105a   :  { %5278 = vmatprep.subr.mxu0 %v5808_v0 }
0x10fe   :  { %v859_v4 = vpop.f32.mrf.mxu0 }
0x10ff   :  { %v863_v43 = vadd.f32 %v859_v4, %v165_v3 }
0x1100   :  { %v5199_v44 = vpop.f32.mrf.mxu0 }
0x1101   :  { %5617 = vtanh.f32 %v863_v43  ;;  %v4773_v46 = vmul.f32 -1.442695, %v863_v43  ;;  %v1279_v43 = vld [vmem:[#allocation3 + $0x40] sm:$0xff] }
0x1102   :  { %v5215_v27 = vpop.f32.mrf.mxu0 }
0x1103   :  { %5619 = vpow2.f32 %v4773_v46  ;;  %v1081_v29 = vadd.f32 %v5215_v27, %v6067_v58 }
0x1104   :  { %v1075_v28 = vpop.f32.mrf.mxu0 }
0x1105   :  { %v1076_v30 = vadd.f32 %v6067_v58, %v1075_v28  ;;  %v6071_v33 = vadd.f32 %v1081_v29, %v996_v31 }
0x1107   :  { %v6073_v34 = vadd.f32 %v1076_v30, %v995_v32  ;;  %v1156_v36 = vmul.f32 %v6071_v33, %v6071_v33  ;;  %v1125_v42 = vsel %vm177_vm2, %v6071_v33, 0.0  ;;  %v170_v32 = vadd.f32 %v5979_v57, %v5895_v9 }
0x1109   :  { %v1122_v35 = vsel %vm177_vm2, %v6073_v34, 0.0  ;;  %v1166_v37 = vsel %vm177_vm2, %v1156_v36, 0.0  ;;  %v1155_v49 = vmul.f32 %v6073_v34, %v6073_v34 }
0x110b   :  { %v1163_v50 = vsel %vm177_vm2, %v1155_v49, 0.0 }
0x110e   :  { %v5618_v45 = vpop.eup %5617 }
0x110f   :  { %873 = vrot.lane.b32.xlu0 %v5618_v45, %s5810_s24  ;;  %v1278_v45 = vld [vmem:[#allocation3 + $0x38] sm:$0xff] }
0x1110   :  { %v5620_v24 = vpop.eup %5619 }
0x1111   :  { %v867_v47 = vadd.f32 1.0, %v5620_v24  ;;  %v1277_v24 = vld [vmem:[#allocation3 + $0x30] sm:$0xff] }
0x1113   :  { %5621 = vrcp.f32 %v867_v47 }
0x1120   :  { %v5622_v25 = vpop.eup %5621 }
0x1121   :  { %v871_v38 = vmul.f32 %v5622_v25, %v779_v55 }
0x1181   :  { %v874_v48 = vpop.permute.xlu0 %873 }
0x1182   :  { %v876_v26 = vmul.f32 %v5622_v25, %v874_v48 }
0x1184   :  { %878 = vrot.lane.b32.xlu1 %v876_v26, %s5811_s25 }
0x11a8   :  { %1123 = vadd.xlane.f32.xlu1 %v1122_v35 }
0x11ac   :  { %1167 = vadd.xlane.f32.xlu1 %v1166_v37  ;;  %v6171_v37 = vld [vmem:[%s6770_s2 + $0x4] ss:$0 sm:$0xff] }
0x11f6   :  { %v879_v39 = vpop.permute.xlu1 %878 }
0x11f7   :  { %v6080_v40 = vadd.f32 %v879_v39, %v871_v38 }
0x11f9   :  { %5623 = vtanh.f32 %v6080_v40 }
0x1206   :  { %v5624_v41 = vpop.eup %5623 }
0x1207   :  { %884 = vrot.lane.b32.xlu0 %v5624_v41, %s5810_s24 }
0x1226   :  { %1126 = vadd.xlane.f32.xlu0 %v1125_v42 }
0x122a   :  { %1164 = vadd.xlane.f32.xlu0 %v1163_v50 }
0x1231   :  { %v1124_v62 = vpop.xlane.xlu1 %1123 }
0x1232   :  { %v1147_v1 = vmul.f32 0.03125, %v1124_v62 }
0x1234   :  { %v1195_v10 = vmul.f32 %v1147_v1, %v1147_v1  ;;  %v1219_v18 = vsub.f32 %v6073_v34, %v1147_v1 }
0x1235   :  { %v1168_v12 = vpop.xlane.xlu1 %1167 }
0x1236   :  { %v1188_v5 = vmul.f32 0.03125, %v1168_v12 }
0x1279   :  { %v885_v60 = vpop.permute.xlu0 %884 }
0x127a   :  { %v887_v61 = vmul.f32 %v5622_v25, %v885_v60  ;;  %v6152_v25 = vpop.f32.mrf.mxu0 }
0x127c   :  { %889 = vrot.lane.b32.xlu0 %v887_v61, %s5811_s25  ;;  %v6154_v48 = vpop.f32.mrf.mxu0 }
0x127e   :  { %v6156_v26 = vpop.f32.mrf.mxu0 }
0x1280   :  { %v6158_v27 = vpop.f32.mrf.mxu0 }
0x1282   :  { %v6160_v28 = vpop.f32.mrf.mxu0 }
0x1284   :  { %v6162_v29 = vpop.f32.mrf.mxu0 }
0x1286   :  { %v1485_v30 = vpop.f32.mrf.mxu0 }
0x1288   :  { %v5255_v31 = vpop.f32.mrf.mxu0 }
0x12af   :  { %v1127_v56 = vpop.xlane.xlu0 %1126 }
0x12b0   :  { %v1148_v11 = vmul.f32 0.03125, %v1127_v56 }
0x12b2   :  { %v1196_v13 = vmul.f32 %v1148_v11, %v1148_v11  ;;  %v1220_v22 = vsub.f32 %v6071_v33, %v1148_v11 }
0x12b3   :  { %v1165_v63 = vpop.xlane.xlu0 %1164 }
0x12b4   :  { %v1187_v8 = vmul.f32 0.03125, %v1165_v63  ;;  %v1204_v15 = vsub.f32 %v1188_v5, %v1196_v13 }
0x12b6   :  { %v1203_v2 = vsub.f32 %v1187_v8, %v1195_v10  ;;  %v1212_v16 = vmax.f32 %v1204_v15, 0.0 }
0x12b8   :  { %v1211_v14 = vmax.f32 %v1203_v2, 0.0  ;;  %v1228_v17 = vadd.f32 1e-05, %v1212_v16 }
0x12ba   :  { %v1227_v6 = vadd.f32 1e-05, %v1211_v14 }
0x12bc   :  { %5625 = vrsqrt.f32 %v1227_v6 }
0x12bd   :  { %5627 = vrsqrt.f32 %v1228_v17 }
0x12c9   :  { %v5626_v7 = vpop.eup %5625 }
0x12ca   :  { %v1243_v55 = vmul.f32 %v5626_v7, %v1219_v18  ;;  %v5628_v20 = vpop.eup %5627 }
0x12cb   :  { %v1244_v3 = vmul.f32 %v5628_v20, %v1220_v22  ;;  %v1086_v20 = vadd.f32 %v6067_v58, %v6154_v48  ;;  %v997_v22 = vld [vmem:[#allocation2 + $0x10] sm:$0xff] }
0x12cc   :  { %v1256_v21 = vmul.f32 %v6121_v19, %v1243_v55  ;;  %v1091_v55 = vadd.f32 %v6152_v25, %v6067_v58 }
0x12cd   :  { %v1257_v46 = vmul.f32 %v6121_v19, %v1244_v3 }
0x12ce   :  { %v6131_v44 = vadd.f32 %v6128_v23, %v1256_v21  ;;  %v998_v21 = vld [vmem:[#allocation2 + $0x18] sm:$0xff] }
0x12cf   :  { %v6139_v47 = vadd.f32 %v6128_v23, %v1257_v46  ;;  %v6202_v3 = vadd.f32 %v1091_v55, %v998_v21 }
0x12d1   :  { %v1158_v46 = vmul.f32 %v6202_v3, %v6202_v3 }
0x12d3   :  { %v1172_v48 = vsel %vm177_vm2, %v1158_v46, 0.0 }
0x12ee   :  { %v890_v4 = vpop.permute.xlu0 %889 }
0x12ef   :  { %892 = vst.msk [vmem:[#allocation2 + $0x30] sm:$0xff] %vm177_vm2, %v890_v4  ;;  %5209 = vmatmul.mubr.msk.f32.vlgmr.msra.gmra.mxu1 %vm177_vm2, %v890_v4  ;;  %v6204_v4 = vadd.f32 %v1086_v20, %v997_v22 }
0x12f0   :  { %5226 = vmatpush3.msra.mxu1 %v1280_v52  ;;  %5233 = vmatprep.mubr.msk.f32.mxu1 %vm177_vm2, %v6131_v44 }
0x12f1   :  { %5227 = vmatprep.subr.mxu1 %v1279_v43 }
0x12f2   :  { %5228 = vmatpush3.msra.mxu1 %v1279_v43  ;;  %v1101_v43 = vadd.f32 %v6156_v26, %v6067_v58 }
0x12f3   :  { %5229 = vmatprep.subr.mxu1 %v1278_v45 }
0x12f4   :  { %5230 = vmatpush3.msra.mxu1 %v1278_v45  ;;  %v1128_v45 = vsel %vm177_vm2, %v6204_v4, 0.0 }
0x12f5   :  { %5231 = vmatprep.subr.mxu1 %v1277_v24 }
0x12f6   :  { %5232 = vmatpush3.msra.mxu1 %v1277_v24  ;;  %v1000_v24 = vld [vmem:[#allocation2 + $0x28] sm:$0xff] }
0x12f7   :  { %5234 = vmatmul.mubr.msk.f32.vlgmr.msra.gmra.mxu1 %vm177_vm2, %v6139_v47  ;;  %5267 = vmatprep.subr.mxu1 %v5808_v0  ;;  %v6212_v25 = vadd.f32 %v1101_v43, %v1000_v24 }
0x12f8   :  { %5268 = vmatpush3.msra.mxu1 %v6089_v51 }
0x12f9   :  { %5269 = vmatprep.subr.mxu1 %v5808_v0  ;;  %v1160_v31 = vmul.f32 %v6212_v25, %v6212_v25 }
0x12fa   :  { %5270 = vmatpush3.msra.mxu1 %v6093_v53 }
0x12fb   :  { %5271 = vmatprep.subr.mxu1 %v5808_v0  ;;  %v1178_v26 = vsel %vm177_vm2, %v1160_v31, 0.0 }
0x12fc   :  { %5272 = vmatpush3.msra.mxu1 %v6097_v54 }
0x12fd   :  { %5273 = vmatprep.subr.mxu1 %v5808_v0 }
0x12fe   :  { %5274 = vmatpush3.msra.mxu1 %v6101_v59 }
0x12ff   :  { %5289 = vmatprep.subr.mxu1 %v5808_v0 }
0x13af   :  { %v961_v33 = vpop.f32.mrf.mxu1 }
0x13b0   :  { %v965_v34 = vadd.f32 %v961_v33, %v170_v32 }
0x13b1   :  { %v5210_v35 = vpop.f32.mrf.mxu1 }
0x13b2   :  { %v4775_v8 = vmul.f32 -1.442695, %v965_v34 }
0x13b7   :  { %v6166_v36 = vpop.f32.mrf.mxu1 }
0x13b8   :  { %v1382_v32 = vadd.f32 %v6166_v36, %v6171_v37 }
0x13b9   :  { %v1376_v38 = vpop.f32.mrf.mxu1 }
0x13ba   :  { %v1377_v39 = vadd.f32 %v6171_v37, %v1376_v38 }
0x13bc   :  { %v1489_v41 = vadd.f32 %v1485_v30, %v1377_v39  ;;  %v1137_v30 = vsel %vm177_vm2, %v6212_v25, 0.0 }
0x13be   :  { %5629 = vtanh.f32 %v1489_v41  ;;  %v4796_v49 = vmul.f32 -1.442695, %v1489_v41  ;;  %v1111_v41 = vadd.f32 %v6160_v28, %v6067_v58 }
0x13c0   :  { %5631 = vpow2.f32 %v4796_v49 }
0x13cb   :  { %v5630_v42 = vpop.eup %5629 }
0x13cc   :  { %1499 = vrot.lane.b32.xlu1 %v5630_v42, %s5810_s24 }
0x13cd   :  { %v5632_v9 = vpop.eup %5631 }
0x13ce   :  { %v1493_v57 = vadd.f32 1.0, %v5632_v9 }
0x13d0   :  { %5633 = vrcp.f32 %v1493_v57 }
0x13dd   :  { %v5634_v50 = vpop.eup %5633 }
0x13de   :  { %v1497_v61 = vmul.f32 0.0, %v5634_v50 }
0x143e   :  { %v1500_v52 = vpop.permute.xlu1 %1499 }
0x143f   :  { %v1502_v60 = vmul.f32 %v5634_v50, %v1500_v52 }
0x1441   :  { %1504 = vrot.lane.b32.xlu1 %v1502_v60, %s5811_s25 }
0x14b3   :  { %v1505_v56 = vpop.permute.xlu1 %1504 }
0x14b4   :  { %v6176_v62 = vadd.f32 %v1505_v56, %v1497_v61 }
0x14b6   :  { %5635 = vtanh.f32 %v6176_v62 }
0x14b7   :  { %5637 = vtanh.f32 %v965_v34 }
0x14b8   :  { %5639 = vpow2.f32 %v4775_v8  ;;  %v1157_v8 = vmul.f32 %v6204_v4, %v6204_v4 }
0x14c3   :  { %v5636_v63 = vpop.eup %5635 }
0x14c4   :  { %1510 = vrot.lane.b32.xlu0 %v5636_v63, %s5810_s24  ;;  %v5638_v1 = vpop.eup %5637  ;;  %v1096_v63 = vadd.f32 %v6067_v58, %v6158_v27 }
0x14c5   :  { %v5640_v10 = vpop.eup %5639 }
0x14c6   :  { %v969_v11 = vadd.f32 1.0, %v5640_v10  ;;  %v999_v10 = vld [vmem:[#allocation2 + $0x20] sm:$0xff] }
0x14c8   :  { %975 = vrot.lane.b32.xlu0 %v5638_v1, %s5810_s24  ;;  %5641 = vrcp.f32 %v969_v11  ;;  %v1131_v1 = vsel %vm177_vm2, %v6202_v3, 0.0  ;;  %v6243_v11 = vadd.f32 %v1096_v63, %v999_v10 }
0x14ca   :  { %v1159_v27 = vmul.f32 %v6243_v11, %v6243_v11 }
0x14d5   :  { %v5642_v13 = vpop.eup %5641 }
0x14d6   :  { %v973_v6 = vmul.f32 %v5642_v13, %v6080_v40 }
0x1536   :  { %v1511_v2 = vpop.permute.xlu0 %1510 }
0x1537   :  { %v1513_v12 = vmul.f32 %v5634_v50, %v1511_v2  ;;  %v1169_v2 = vsel %vm177_vm2, %v1157_v8, 0.0 }
0x1539   :  { %1515 = vrot.lane.b32.xlu1 %v1513_v12, %s5811_s25  ;;  %v1106_v12 = vadd.f32 %v6067_v58, %v6162_v29 }
0x153a   :  { %v976_v14 = vpop.permute.xlu0 %975 }
0x153b   :  { %v978_v5 = vmul.f32 %v5642_v13, %v976_v14  ;;  %v1001_v14 = vld [vmem:[#allocation2 + $0x30] sm:$0xff] }
0x153d   :  { %980 = vrot.lane.b32.xlu1 %v978_v5, %s5811_s25  ;;  %v6252_v5 = vadd.f32 %v1106_v12, %v1001_v14 }
0x15ab   :  { %v1516_v15 = vpop.permute.xlu1 %1515 }
0x15ac   :  { %1518 = vst.msk [vmem:[#allocation2] sm:$0xff] %vm177_vm2, %v1516_v15  ;;  %5265 = vmatmul.mubr.msk.f32.vlgmr.msra.gmra.mxu0 %vm177_vm2, %v1516_v15  ;;  %v1175_v15 = vsel %vm177_vm2, %v1159_v27, 0.0 }
0x15ad   :  { %5279 = vmatpush3.msra.mxu0 %v6089_v51  ;;  %5286 = vmatprep.mubr.msk.f32.mxu0 %vm5809_vm0, %v5808_v0 }
0x15ae   :  { %5280 = vmatprep.subr.mxu0 %v5808_v0 }
0x15af   :  { %v981_v16 = vpop.permute.xlu1 %980  ;;  %5281 = vmatpush3.msra.mxu0 %v6093_v53 }
0x15b0   :  { %v983_v17 = vadd.f32 %v981_v16, %v973_v6  ;;  %5282 = vmatprep.subr.mxu0 %v5808_v0  ;;  %v1140_v6 = vsel %vm177_vm2, %v6252_v5, 0.0 }
0x15b1   :  { %5283 = vmatpush3.msra.mxu0 %v6097_v54 }
0x15b2   :  { %5643 = vtanh.f32 %v983_v17  ;;  %5284 = vmatprep.subr.mxu0 %v5808_v0 }
0x15b3   :  { %5285 = vmatpush3.msra.mxu0 %v6101_v59 }
0x15b4   :  { %5300 = vmatprep.subr.mxu0 %v5808_v0 }
0x15bf   :  { %v5644_v7 = vpop.eup %5643 }
0x15c0   :  { %986 = vrot.lane.b32.xlu1 %v5644_v7, %s5810_s24 }
0x1632   :  { %v987_v40 = vpop.permute.xlu1 %986 }
0x1633   :  { %v989_v18 = vmul.f32 %v5642_v13, %v987_v40  ;;  %v1134_v13 = vsel %vm177_vm2, %v6243_v11, 0.0 }
0x1635   :  { %991 = vrot.lane.b32.xlu1 %v989_v18, %s5811_s25  ;;  %v1161_v18 = vmul.f32 %v6252_v5, %v6252_v5 }
0x1637   :  { %v1181_v20 = vsel %vm177_vm2, %v1161_v18, 0.0 }
0x1659   :  { %1129 = vadd.xlane.f32.xlu1 %v1128_v45 }
0x165d   :  { %1173 = vadd.xlane.f32.xlu1 %v1172_v48 }
0x1661   :  { %1138 = vadd.xlane.f32.xlu1 %v1137_v30 }
0x1665   :  { %1179 = vadd.xlane.f32.xlu1 %v1178_v26 }
0x166c   :  { %v1587_v33 = vpop.f32.mrf.mxu0 }
0x166d   :  { %v1591_v34 = vadd.f32 %v1587_v33, %v1382_v32 }
0x166e   :  { %v5266_v35 = vpop.f32.mrf.mxu0 }
0x166f   :  { %5645 = vtanh.f32 %v1591_v34  ;;  %v4798_v50 = vmul.f32 -1.442695, %v1591_v34 }
0x1671   :  { %5647 = vpow2.f32 %v4798_v50 }
0x167c   :  { %v5646_v38 = vpop.eup %5645 }
0x167d   :  { %1601 = vrot.lane.b32.xlu0 %v5646_v38, %s5810_s24 }
0x167e   :  { %v5648_v52 = vpop.eup %5647 }
0x167f   :  { %v1595_v60 = vadd.f32 1.0, %v5648_v52 }
0x1681   :  { %5649 = vrcp.f32 %v1595_v60 }
0x168e   :  { %v6233_v61 = vpop.eup %5649 }
0x168f   :  { %v1599_v58 = vmul.f32 %v6233_v61, %v6176_v62 }
0x16a7   :  { %v992_v39 = vpop.permute.xlu1 %991 }
0x16a8   :  { %994 = vst.msk [vmem:[#allocation2 + $0x38] sm:$0xff] %vm177_vm2, %v992_v39 }
0x16af   :  { %v1002_v42 = vld [vmem:[#allocation2 + $0x38] sm:$0xff] }
0x16b0   :  { %v6226_v49 = vadd.f32 %v1111_v41, %v1002_v42 }
0x16b2   :  { %v1143_v9 = vsel %vm177_vm2, %v6226_v49, 0.0  ;;  %v1162_v36 = vmul.f32 %v6226_v49, %v6226_v49 }
0x16b3   :  { %1144 = vadd.xlane.f32.xlu1 %v1143_v9 }
0x16b4   :  { %v1184_v57 = vsel %vm177_vm2, %v1162_v36, 0.0 }
0x16b7   :  { %1185 = vadd.xlane.f32.xlu1 %v1184_v57 }
0x16e2   :  { %v1130_v7 = vpop.xlane.xlu1 %1129 }
0x16e3   :  { %v1149_v45 = vmul.f32 0.03125, %v1130_v7 }
0x16e5   :  { %v1197_v32 = vmul.f32 %v1149_v45, %v1149_v45 }
0x16e6   :  { %v1174_v40 = vpop.xlane.xlu1 %1173 }
0x16e7   :  { %v1190_v48 = vmul.f32 0.03125, %v1174_v40 }
0x16ea   :  { %v1139_v55 = vpop.xlane.xlu1 %1138 }
0x16eb   :  { %v1152_v22 = vmul.f32 0.03125, %v1139_v55 }
0x16ed   :  { %v1200_v24 = vmul.f32 %v1152_v22, %v1152_v22 }
0x16ee   :  { %v1180_v21 = vpop.xlane.xlu1 %1179 }
0x16ef   :  { %v1602_v28 = vpop.permute.xlu0 %1601  ;;  %v1192_v62 = vmul.f32 0.03125, %v1180_v21 }
0x16f0   :  { %v1604_v56 = vmul.f32 %v6233_v61, %v1602_v28 }
0x16f1   :  { %v1208_v31 = vsub.f32 %v1192_v62, %v1200_v24 }
0x16f2   :  { %1606 = vrot.lane.b32.xlu0 %v1604_v56, %s5811_s25 }
0x16f3   :  { %v1216_v39 = vmax.f32 %v1208_v31, 0.0 }
0x16f5   :  { %v1232_v50 = vadd.f32 1e-05, %v1216_v39 }
0x1711   :  { %1132 = vadd.xlane.f32.xlu0 %v1131_v1 }
0x1715   :  { %1170 = vadd.xlane.f32.xlu0 %v1169_v2  ;;  %v1221_v2 = vsub.f32 %v6204_v4, %v1149_v45 }
0x1719   :  { %1135 = vadd.xlane.f32.xlu0 %v1134_v13 }
0x171d   :  { %1176 = vadd.xlane.f32.xlu0 %v1175_v15 }
0x1721   :  { %1141 = vadd.xlane.f32.xlu0 %v1140_v6 }
0x173c   :  { %v1145_v62 = vpop.xlane.xlu1 %1144 }
0x173d   :  { %v1154_v45 = vmul.f32 0.03125, %v1145_v62 }
0x173f   :  { %v1202_v24 = vmul.f32 %v1154_v45, %v1154_v45 }
0x1764   :  { %v1607_v29 = vpop.permute.xlu0 %1606 }
0x1765   :  { %v6259_v16 = vadd.f32 %v1607_v29, %v1599_v58  ;;  %v1224_v58 = vsub.f32 %v6212_v25, %v1152_v22 }
0x1767   :  { %5651 = vtanh.f32 %v6259_v16 }
0x1774   :  { %v5652_v17 = vpop.eup %5651 }
0x1775   :  { %1612 = vrot.lane.b32.xlu0 %v5652_v17, %s5810_s24 }
0x1794   :  { %1182 = vadd.xlane.f32.xlu0 %v1181_v20 }
0x179a   :  { %v1133_v43 = vpop.xlane.xlu0 %1132 }
0x179b   :  { %v1150_v46 = vmul.f32 0.03125, %v1133_v43  ;;  %v1186_v43 = vpop.xlane.xlu1 %1185 }
0x179d   :  { %v1198_v30 = vmul.f32 %v1150_v46, %v1150_v46  ;;  %v1222_v8 = vsub.f32 %v6202_v3, %v1150_v46  ;;  %v1194_v46 = vmul.f32 0.03125, %v1186_v43 }
0x179e   :  { %v1171_v26 = vpop.xlane.xlu0 %1170 }
0x179f   :  { %v1206_v33 = vsub.f32 %v1190_v48, %v1198_v30  ;;  %v1189_v34 = vmul.f32 0.03125, %v1171_v26  ;;  %v1210_v48 = vsub.f32 %v1194_v46, %v1202_v24 }
0x17a1   :  { %v1214_v35 = vmax.f32 %v1206_v33, 0.0  ;;  %v1205_v38 = vsub.f32 %v1189_v34, %v1197_v32  ;;  %v1218_v30 = vmax.f32 %v1210_v48, 0.0 }
0x17a2   :  { %v1136_v41 = vpop.xlane.xlu0 %1135 }
0x17a3   :  { %v1230_v42 = vadd.f32 1e-05, %v1214_v35  ;;  %v1213_v9 = vmax.f32 %v1205_v38, 0.0  ;;  %v1151_v36 = vmul.f32 0.03125, %v1136_v41  ;;  %v1234_v26 = vadd.f32 1e-05, %v1218_v30 }
0x17a4   :  { %v1226_v41 = vsub.f32 %v6226_v49, %v1154_v45 }
0x17a5   :  { %5653 = vrsqrt.f32 %v1230_v42  ;;  %v1229_v57 = vadd.f32 1e-05, %v1213_v9  ;;  %v1199_v60 = vmul.f32 %v1151_v36, %v1151_v36  ;;  %v1223_v7 = vsub.f32 %v6243_v11, %v1151_v36 }
0x17a6   :  { %v1177_v52 = vpop.xlane.xlu0 %1176 }
0x17a7   :  { %5655 = vrsqrt.f32 %v1229_v57  ;;  %v1191_v28 = vmul.f32 0.03125, %v1177_v52 }
0x17a8   :  { %5657 = vrsqrt.f32 %v1232_v50 }
0x17a9   :  { %v1207_v56 = vsub.f32 %v1191_v28, %v1199_v60 }
0x17aa   :  { %v1142_v11 = vpop.xlane.xlu0 %1141 }
0x17ab   :  { %v1215_v63 = vmax.f32 %v1207_v56, 0.0  ;;  %v1153_v31 = vmul.f32 0.03125, %v1142_v11 }
0x17ad   :  { %v1231_v1 = vadd.f32 1e-05, %v1215_v63  ;;  %v1201_v33 = vmul.f32 %v1153_v31, %v1153_v31  ;;  %v1225_v9 = vsub.f32 %v6252_v5, %v1153_v31 }
0x17af   :  { %5659 = vrsqrt.f32 %v1231_v1 }
0x17b0   :  { %5661 = vrsqrt.f32 %v1234_v26 }
0x17b2   :  { %v5654_v10 = vpop.eup %5653 }
0x17b3   :  { %v1246_v12 = vmul.f32 %v5654_v10, %v1222_v8 }
0x17b4   :  { %v5656_v13 = vpop.eup %5655 }
0x17b5   :  { %v1245_v27 = vmul.f32 %v5656_v13, %v1221_v2  ;;  %v1259_v14 = vmul.f32 %v6121_v19, %v1246_v12  ;;  %v5658_v15 = vpop.eup %5657 }
0x17b6   :  { %v1248_v3 = vmul.f32 %v5658_v15, %v1224_v58 }
0x17b7   :  { %v1258_v6 = vmul.f32 %v6121_v19, %v1245_v27  ;;  %v6275_v17 = vadd.f32 %v6128_v23, %v1259_v14 }
0x17b8   :  { %v1261_v18 = vmul.f32 %v6121_v19, %v1248_v3 }
0x17b9   :  { %v6272_v29 = vadd.f32 %v6128_v23, %v1258_v6 }
0x17ba   :  { %v6288_v20 = vadd.f32 %v6128_v23, %v1261_v18 }
0x17bb   :  { %5236 = vmatprep.mubr.msk.f32.mxu1 %vm177_vm2, %v6272_v29 }
0x17bc   :  { %v5660_v4 = vpop.eup %5659  ;;  %5237 = vmatmul.mubr.msk.f32.gmra.mxu1 %vm177_vm2, %v6275_v17 }
0x17bd   :  { %v1247_v40 = vmul.f32 %v5660_v4, %v1223_v7 }
0x17bf   :  { %v1260_v25 = vmul.f32 %v6121_v19, %v1247_v40 }
0x17c1   :  { %v6285_v55 = vadd.f32 %v6128_v23, %v1260_v25 }
0x17c3   :  { %5239 = vmatprep.mubr.msk.f32.mxu1 %vm177_vm2, %v6285_v55 }
0x17c4   :  { %5240 = vmatmul.mubr.msk.f32.gmra.mxu1 %vm177_vm2, %v6288_v20 }
0x17e7   :  { %v1613_v21 = vpop.permute.xlu0 %1612 }
0x17e8   :  { %v1615_v22 = vmul.f32 %v6233_v61, %v1613_v21  ;;  %v5662_v61 = vpop.eup %5661 }
0x17e9   :  { %v1250_v42 = vmul.f32 %v5662_v61, %v1226_v41 }
0x17ea   :  { %1617 = vrot.lane.b32.xlu0 %v1615_v22, %s5811_s25 }
0x17eb   :  { %v1263_v50 = vmul.f32 %v6121_v19, %v1250_v42 }
0x17ed   :  { %v6304_v28 = vadd.f32 %v6128_v23, %v1263_v50 }
0x181d   :  { %v1183_v32 = vpop.xlane.xlu0 %1182 }
0x181e   :  { %v1193_v34 = vmul.f32 0.03125, %v1183_v32 }
0x1820   :  { %v1209_v35 = vsub.f32 %v1193_v34, %v1201_v33 }
0x1822   :  { %v1217_v38 = vmax.f32 %v1209_v35, 0.0 }
0x1824   :  { %v1233_v39 = vadd.f32 1e-05, %v1217_v38 }
0x1826   :  { %5663 = vrsqrt.f32 %v1233_v39 }
0x1833   :  { %v5664_v36 = vpop.eup %5663 }
0x1834   :  { %v1249_v57 = vmul.f32 %v5664_v36, %v1225_v9 }
0x1836   :  { %v1262_v52 = vmul.f32 %v6121_v19, %v1249_v57 }
0x1838   :  { %v6301_v60 = vadd.f32 %v6128_v23, %v1262_v52 }
0x183a   :  { %5242 = vmatprep.mubr.msk.f32.mxu1 %vm177_vm2, %v6301_v60 }
0x183b   :  { %5243 = vmatmul.mubr.msk.f32.gmra.mxu1 %vm177_vm2, %v6304_v28 }
0x183c   :  { %5275 = vmatprep.mubr.msk.f32.mxu1 %vm5809_vm0, %v5808_v0 }
0x185c   :  { %v1618_v49 = vpop.permute.xlu0 %1617 }
0x185d   :  { %1620 = vst.msk [vmem:[#allocation2 + $0x8] sm:$0xff] %vm177_vm2, %v1618_v49  ;;  %5276 = vmatmul.mubr.msk.f32.vlgmr.msra.gmra.mxu1 %vm177_vm2, %v1618_v49 }
0x185e   :  { %5290 = vmatpush3.msra.mxu1 %v6089_v51  ;;  %5297 = vmatprep.mubr.msk.f32.mxu1 %vm5809_vm0, %v5808_v0 }
0x185f   :  { %5291 = vmatprep.subr.mxu1 %v5808_v0 }
0x1860   :  { %5292 = vmatpush3.msra.mxu1 %v6093_v53 }
0x1861   :  { %5293 = vmatprep.subr.mxu1 %v5808_v0 }
0x1862   :  { %5294 = vmatpush3.msra.mxu1 %v6097_v54 }
0x1863   :  { %5295 = vmatprep.subr.mxu1 %v5808_v0 }
0x1864   :  { %5296 = vmatpush3.msra.mxu1 %v6101_v59 }
0x1865   :  { %5311 = vmatprep.subr.mxu1 %v5808_v0 }
0x187c   :  { %v5238_v19 = vpop.f32.mrf.mxu1 }
0x187e   :  { %v1386_v23 = vpop.f32.mrf.mxu1 }
0x187f   :  { %v1387_v8 = vadd.f32 %v6171_v37, %v1386_v23 }
0x1884   :  { %v6324_v5 = vpop.f32.mrf.mxu1 }
0x1886   :  { %v6326_v56 = vpop.f32.mrf.mxu1 }
0x1887   :  { %v1397_v41 = vadd.f32 %v6171_v37, %v6326_v56 }
0x18fb   :  { %v6328_v63 = vpop.f32.mrf.mxu1 }
0x18fd   :  { %v6330_v1 = vpop.f32.mrf.mxu1 }
0x191d   :  { %v1689_v10 = vpop.f32.mrf.mxu1 }
0x191e   :  { %v1693_v2 = vadd.f32 %v1689_v10, %v1387_v8 }
0x191f   :  { %v5277_v12 = vpop.f32.mrf.mxu1 }
0x1920   :  { %5665 = vtanh.f32 %v1693_v2  ;;  %v4800_v27 = vmul.f32 -1.442695, %v1693_v2 }
0x1922   :  { %5667 = vpow2.f32 %v4800_v27 }
0x192d   :  { %v5666_v13 = vpop.eup %5665 }
0x192e   :  { %1703 = vrot.lane.b32.xlu1 %v5666_v13, %s5810_s24 }
0x192f   :  { %v5668_v14 = vpop.eup %5667 }
0x1930   :  { %v1697_v15 = vadd.f32 1.0, %v5668_v14 }
0x1932   :  { %5669 = vrcp.f32 %v1697_v15  ;;  %v1402_v15 = vadd.f32 %v6324_v5, %v6171_v37 }
0x193f   :  { %v5670_v6 = vpop.eup %5669 }
0x1940   :  { %v1701_v7 = vmul.f32 %v5670_v6, %v6259_v16  ;;  %v1392_v16 = vadd.f32 %v5238_v19, %v6171_v37 }
0x19a0   :  { %v1704_v58 = vpop.permute.xlu1 %1703 }
0x19a1   :  { %v1706_v3 = vmul.f32 %v5670_v6, %v1704_v58 }
0x19a3   :  { %1708 = vrot.lane.b32.xlu1 %v1706_v3, %s5811_s25 }
0x1a15   :  { %v1709_v4 = vpop.permute.xlu1 %1708 }
0x1a16   :  { %v1711_v40 = vadd.f32 %v1709_v4, %v1701_v7 }
0x1a18   :  { %5671 = vtanh.f32 %v1711_v40 }
0x1a25   :  { %v5672_v18 = vpop.eup %5671 }
0x1a26   :  { %1714 = vrot.lane.b32.xlu0 %v5672_v18, %s5810_s24 }
0x1a98   :  { %v1715_v25 = vpop.permute.xlu0 %1714 }
0x1a99   :  { %v1717_v11 = vmul.f32 %v5670_v6, %v1715_v25 }
0x1a9b   :  { %1719 = vrot.lane.b32.xlu1 %v1717_v11, %s5811_s25  ;;  %v2244_v11 = vld [vmem:[#allocation3 + $0x88] sm:$0xff] }
0x1b0d   :  { %v1720_v21 = vpop.permute.xlu1 %1719 }
0x1b0e   :  { %1722 = vst.msk [vmem:[#allocation2 + $0x10] sm:$0xff] %vm177_vm2, %v1720_v21  ;;  %5287 = vmatmul.mubr.msk.f32.vlgmr.msra.gmra.mxu0 %vm177_vm2, %v1720_v21 }
0x1b0f   :  { %5301 = vmatpush3.msra.mxu0 %v6089_v51  ;;  %5308 = vmatprep.mubr.msk.f32.mxu0 %vm5809_vm0, %v5808_v0 }
0x1b10   :  { %5302 = vmatprep.subr.mxu0 %v5808_v0 }
0x1b11   :  { %5303 = vmatpush3.msra.mxu0 %v6093_v53 }
0x1b12   :  { %5304 = vmatprep.subr.mxu0 %v5808_v0 }
0x1b13   :  { %5305 = vmatpush3.msra.mxu0 %v6097_v54 }
0x1b14   :  { %5306 = vmatprep.subr.mxu0 %v5808_v0 }
0x1b15   :  { %5307 = vmatpush3.msra.mxu0 %v6101_v59 }
0x1b16   :  { %5322 = vmatprep.subr.mxu0 %v5808_v0 }
0x1bce   :  { %v1791_v22 = vpop.f32.mrf.mxu0 }
0x1bcf   :  { %v1795_v62 = vadd.f32 %v1791_v22, %v1392_v16 }
0x1bd0   :  { %v5288_v43 = vpop.f32.mrf.mxu0 }
0x1bd1   :  { %5673 = vtanh.f32 %v1795_v62  ;;  %v4802_v46 = vmul.f32 -1.442695, %v1795_v62  ;;  %v2243_v43 = vld [vmem:[#allocation3 + $0x80] sm:$0xff] }
0x1bd3   :  { %5675 = vpow2.f32 %v4802_v46  ;;  %v2241_v46 = vld [vmem:[#allocation3 + $0x70] sm:$0xff] }
0x1bde   :  { %v5674_v45 = vpop.eup %5673 }
0x1bdf   :  { %1805 = vrot.lane.b32.xlu0 %v5674_v45, %s5810_s24  ;;  %v2242_v45 = vld [vmem:[#allocation3 + $0x78] sm:$0xff] }
0x1be0   :  { %v5676_v24 = vpop.eup %5675 }
0x1be1   :  { %v1799_v48 = vadd.f32 1.0, %v5676_v24 }
0x1be3   :  { %5677 = vrcp.f32 %v1799_v48 }
0x1bf0   :  { %v5678_v30 = vpop.eup %5677 }
0x1bf1   :  { %v1803_v32 = vmul.f32 %v5678_v30, %v1711_v40 }
0x1c51   :  { %v1806_v31 = vpop.permute.xlu0 %1805 }
0x1c52   :  { %v1808_v26 = vmul.f32 %v5678_v30, %v1806_v31 }
0x1c54   :  { %1810 = vrot.lane.b32.xlu1 %v1808_v26, %s5811_s25 }
0x1cc6   :  { %v1811_v33 = vpop.permute.xlu1 %1810 }
0x1cc7   :  { %v1813_v34 = vadd.f32 %v1811_v33, %v1803_v32 }
0x1cc9   :  { %5679 = vtanh.f32 %v1813_v34 }
0x1cd6   :  { %v5680_v35 = vpop.eup %5679 }
0x1cd7   :  { %1816 = vrot.lane.b32.xlu0 %v5680_v35, %s5810_s24 }
0x1d49   :  { %v1817_v38 = vpop.permute.xlu0 %1816 }
0x1d4a   :  { %v1819_v39 = vmul.f32 %v5678_v30, %v1817_v38 }
0x1d4c   :  { %1821 = vrot.lane.b32.xlu1 %v1819_v39, %s5811_s25 }
0x1dbe   :  { %v1822_v61 = vpop.permute.xlu1 %1821 }
0x1dbf   :  { %1824 = vst.msk [vmem:[#allocation2 + $0x18] sm:$0xff] %vm177_vm2, %v1822_v61  ;;  %5298 = vmatmul.mubr.msk.f32.vlgmr.msra.gmra.mxu1 %vm177_vm2, %v1822_v61 }
0x1dc0   :  { %5312 = vmatpush3.msra.mxu1 %v6089_v51  ;;  %5319 = vmatprep.mubr.msk.f32.mxu1 %vm5809_vm0, %v5808_v0 }
0x1dc1   :  { %5313 = vmatprep.subr.mxu1 %v5808_v0 }
0x1dc2   :  { %5314 = vmatpush3.msra.mxu1 %v6093_v53 }
0x1dc3   :  { %5315 = vmatprep.subr.mxu1 %v5808_v0 }
0x1dc4   :  { %5316 = vmatpush3.msra.mxu1 %v6097_v54 }
0x1dc5   :  { %5317 = vmatprep.subr.mxu1 %v5808_v0 }
0x1dc6   :  { %5318 = vmatpush3.msra.mxu1 %v6101_v59 }
0x1dc7   :  { %5333 = vmatprep.subr.mxu1 %v2244_v11 }
0x1e7f   :  { %v1893_v42 = vpop.f32.mrf.mxu1 }
0x1e80   :  { %v1897_v9 = vadd.f32 %v1893_v42, %v1397_v41 }
0x1e81   :  { %v5299_v36 = vpop.f32.mrf.mxu1 }
0x1e82   :  { %5681 = vtanh.f32 %v1897_v9  ;;  %v4804_v50 = vmul.f32 -1.442695, %v1897_v9 }
0x1e84   :  { %5683 = vpow2.f32 %v4804_v50 }
0x1e8f   :  { %v5682_v57 = vpop.eup %5681 }
0x1e90   :  { %1907 = vrot.lane.b32.xlu0 %v5682_v57, %s5810_s24 }
0x1e91   :  { %v5684_v52 = vpop.eup %5683 }
0x1e92   :  { %v1901_v49 = vadd.f32 1.0, %v5684_v52  ;;  %v1412_v52 = vadd.f32 %v6328_v63, %v6171_v37 }
0x1e94   :  { %5685 = vrcp.f32 %v1901_v49 }
0x1ea1   :  { %v5686_v19 = vpop.eup %5685 }
0x1ea2   :  { %v1905_v10 = vmul.f32 %v5686_v19, %v1813_v34 }
0x1f02   :  { %v1908_v23 = vpop.permute.xlu0 %1907 }
0x1f03   :  { %v1910_v8 = vmul.f32 %v5686_v19, %v1908_v23 }
0x1f05   :  { %1912 = vrot.lane.b32.xlu1 %v1910_v8, %s5811_s25 }
0x1f77   :  { %v1913_v2 = vpop.permute.xlu1 %1912 }
0x1f78   :  { %v1915_v56 = vadd.f32 %v1913_v2, %v1905_v10 }
0x1f7a   :  { %5687 = vtanh.f32 %v1915_v56 }
0x1f87   :  { %v5688_v12 = vpop.eup %5687 }
0x1f88   :  { %1918 = vrot.lane.b32.xlu0 %v5688_v12, %s5810_s24 }
0x1ffa   :  { %v1919_v13 = vpop.permute.xlu0 %1918 }
0x1ffb   :  { %v1921_v27 = vmul.f32 %v5686_v19, %v1919_v13 }
0x1ffd   :  { %1923 = vrot.lane.b32.xlu1 %v1921_v27, %s5811_s25 }
0x206f   :  { %v1924_v14 = vpop.permute.xlu1 %1923 }
0x2070   :  { %1926 = vst.msk [vmem:[#allocation2 + $0x20] sm:$0xff] %vm177_vm2, %v1924_v14  ;;  %5309 = vmatmul.mubr.msk.f32.vlgmr.msra.gmra.mxu0 %vm177_vm2, %v1924_v14 }
0x2071   :  { %5323 = vmatpush3.msra.mxu0 %v6089_v51  ;;  %5330 = vmatprep.mubr.msk.f32.mxu0 %vm5809_vm0, %v5808_v0 }
0x2072   :  { %5324 = vmatprep.subr.mxu0 %v5808_v0 }
0x2073   :  { %5325 = vmatpush3.msra.mxu0 %v6093_v53 }
0x2074   :  { %5326 = vmatprep.subr.mxu0 %v5808_v0 }
0x2075   :  { %5327 = vmatpush3.msra.mxu0 %v6097_v54 }
0x2076   :  { %5328 = vmatprep.subr.mxu0 %v5808_v0 }
0x2077   :  { %5329 = vmatpush3.msra.mxu0 %v6101_v59 }
0x2130   :  { %v1995_v6 = vpop.f32.mrf.mxu0 }
0x2131   :  { %v1999_v51 = vadd.f32 %v1995_v6, %v1402_v15 }
0x2132   :  { %v5310_v58 = vpop.f32.mrf.mxu0 }
0x2133   :  { %5689 = vtanh.f32 %v1999_v51  ;;  %v4806_v7 = vmul.f32 -1.442695, %v1999_v51  ;;  %v2233_v51 = vld [vmem:[#allocation2] sm:$0xff] }
0x2135   :  { %5691 = vpow2.f32 %v4806_v7  ;;  %v2235_v7 = vld [vmem:[#allocation2 + $0x10] sm:$0xff] }
0x2140   :  { %v5690_v3 = vpop.eup %5689 }
0x2141   :  { %2009 = vrot.lane.b32.xlu0 %v5690_v3, %s5810_s24 }
0x2142   :  { %v5692_v53 = vpop.eup %5691 }
0x2143   :  { %v2003_v4 = vadd.f32 1.0, %v5692_v53 }
0x2145   :  { %5693 = vrcp.f32 %v2003_v4 }
0x2152   :  { %v5694_v54 = vpop.eup %5693 }
0x2153   :  { %v2007_v59 = vmul.f32 %v5694_v54, %v1915_v56 }
0x21b3   :  { %v2010_v40 = vpop.permute.xlu0 %2009 }
0x21b4   :  { %v2012_v18 = vmul.f32 %v5694_v54, %v2010_v40  ;;  %v2236_v40 = vld [vmem:[#allocation2 + $0x18] sm:$0xff] }
0x21b6   :  { %2014 = vrot.lane.b32.xlu1 %v2012_v18, %s5811_s25 }
0x2228   :  { %v2015_v25 = vpop.permute.xlu1 %2014 }
0x2229   :  { %v2017_v5 = vadd.f32 %v2015_v25, %v2007_v59 }
0x222b   :  { %5695 = vtanh.f32 %v2017_v5 }
0x2238   :  { %v5696_v21 = vpop.eup %5695 }
0x2239   :  { %2020 = vrot.lane.b32.xlu0 %v5696_v21, %s5810_s24 }
0x22ab   :  { %v2021_v16 = vpop.permute.xlu0 %2020 }
0x22ac   :  { %v2023_v22 = vmul.f32 %v5694_v54, %v2021_v16 }
0x22ae   :  { %2025 = vrot.lane.b32.xlu1 %v2023_v22, %s5811_s25 }
0x2320   :  { %v2026_v62 = vpop.permute.xlu1 %2025 }
0x2321   :  { %2028 = vst.msk [vmem:[#allocation2 + $0x28] sm:$0xff] %vm177_vm2, %v2026_v62  ;;  %5320 = vmatmul.mubr.msk.f32.vlgmr.msra.gmra.mxu1 %vm177_vm2, %v2026_v62 }
0x2322   :  { %5334 = vmatpush3.msra.mxu1 %v2244_v11  ;;  %5341 = vmatprep.mubr.msk.f32.mxu1 %vm177_vm2, %v6131_v44  ;;  %v1407_v44 = vadd.f32 %v6171_v37, %v6330_v1  ;;  %v2234_v11 = vld [vmem:[#allocation2 + $0x8] sm:$0xff] }
0x2323   :  { %5335 = vmatprep.subr.mxu1 %v2243_v43 }
0x2324   :  { %5336 = vmatpush3.msra.mxu1 %v2243_v43 }
0x2325   :  { %5337 = vmatprep.subr.mxu1 %v2242_v45 }
0x2326   :  { %5338 = vmatpush3.msra.mxu1 %v2242_v45 }
0x2327   :  { %5339 = vmatprep.subr.mxu1 %v2241_v46 }
0x2328   :  { %5340 = vmatpush3.msra.mxu1 %v2241_v46  ;;  %v2238_v21 = vld [vmem:[#allocation2 + $0x28] sm:$0xff] }
0x2329   :  { %5342 = vmatmul.mubr.msk.f32.vlgmr.msra.gmra.mxu1 %vm177_vm2, %v6139_v47 }
0x232a   :  { %5344 = vmatprep.mubr.msk.f32.mxu1 %vm177_vm2, %v6272_v29 }
0x232d   :  { %5345 = vmatmul.mubr.msk.f32.gmra.mxu1 %vm177_vm2, %v6275_v17 }
0x232e   :  { %5347 = vmatprep.mubr.msk.f32.mxu1 %vm177_vm2, %v6285_v55 }
0x2331   :  { %5348 = vmatmul.mubr.msk.f32.gmra.mxu1 %vm177_vm2, %v6288_v20 }
0x2332   :  { %5350 = vmatprep.mubr.msk.f32.mxu1 %vm177_vm2, %v6301_v60 }
0x2335   :  { %5351 = vmatmul.mubr.msk.f32.gmra.mxu1 %vm177_vm2, %v6304_v28  ;;  %v6417_v28 = vld [vmem:[%s6770_s2 + $0x5] ss:$0 sm:$0xff] }
0x23e1   :  { %v2097_v47 = vpop.f32.mrf.mxu1 }
0x23e2   :  { %v2101_v29 = vadd.f32 %v2097_v47, %v1407_v44 }
0x23e3   :  { %v5321_v24 = vpop.f32.mrf.mxu1 }
0x23e4   :  { %5697 = vtanh.f32 %v2101_v29  ;;  %v4808_v32 = vmul.f32 -1.442695, %v2101_v29 }
0x23e6   :  { %5699 = vpow2.f32 %v4808_v32 }
0x23e9   :  { %v6409_v17 = vpop.f32.mrf.mxu1 }
0x23ea   :  { %v2322_v18 = vadd.f32 %v6409_v17, %v6417_v28 }
0x23eb   :  { %v2316_v48 = vpop.f32.mrf.mxu1 }
0x23ec   :  { %v2317_v6 = vadd.f32 %v6417_v28, %v2316_v48  ;;  %v6448_v16 = vadd.f32 %v2322_v18, %v2234_v11 }
0x23ed   :  { %v5346_v55 = vpop.f32.mrf.mxu1 }
0x23ee   :  { %v6433_v58 = vadd.f32 %v2317_v6, %v2233_v51  ;;  %v2332_v53 = vadd.f32 %v5346_v55, %v6417_v28  ;;  %v2396_v45 = vmul.f32 %v6448_v16, %v6448_v16 }
0x23ef   :  { %v2326_v30 = vpop.f32.mrf.mxu1 }
0x23f0   :  { %v2327_v3 = vadd.f32 %v6417_v28, %v2326_v30  ;;  %v2363_v54 = vsel %vm177_vm2, %v6433_v58, 0.0  ;;  %v6443_v59 = vadd.f32 %v2332_v53, %v2236_v40  ;;  %v2406_v46 = vsel %vm177_vm2, %v2396_v45, 0.0  ;;  %v2237_v30 = vld [vmem:[#allocation2 + $0x20] sm:$0xff] }
0x23f1   :  { %v5698_v31 = vpop.eup %5697  ;;  %v5349_v20 = vpop.f32.mrf.mxu1  ;;  %v6499_v53 = vld [vmem:[%s6770_s2 + $0x6] ss:$0 sm:$0xff]  ;;  %v6504_v40 = vld [vmem:[%s6770_s2 + $0x7] ss:$0 sm:$0xff] }
0x23f2   :  { %2111 = vrot.lane.b32.xlu0 %v5698_v31, %s5810_s24  ;;  %v6437_v4 = vadd.f32 %v2327_v3, %v2235_v7  ;;  %v2342_v25 = vadd.f32 %v5349_v20, %v6417_v28  ;;  %v2372_v62 = vsel %vm177_vm2, %v6443_v59, 0.0  ;;  %v2398_v44 = vmul.f32 %v6443_v59, %v6443_v59 }
0x23f3   :  { %v6412_v60 = vpop.f32.mrf.mxu1  ;;  %v5700_v33 = vpop.eup %5699 }
0x23f4   :  { %v2105_v34 = vadd.f32 1.0, %v5700_v33  ;;  %v6450_v22 = vadd.f32 %v2342_v25, %v2238_v21  ;;  %v2412_v47 = vsel %vm177_vm2, %v2398_v44, 0.0  ;;  %v2337_v55 = vadd.f32 %v6417_v28, %v6412_v60 }
0x23f5   :  { %v5352_v1 = vpop.f32.mrf.mxu1 }
0x23f6   :  { %v6420_v26 = vadd.f32 %v5352_v1, %v6417_v28  ;;  %5701 = vrcp.f32 %v2105_v34  ;;  %v2378_v43 = vsel %vm177_vm2, %v6450_v22, 0.0  ;;  %v2400_v29 = vmul.f32 %v6450_v22, %v6450_v22 }
0x23f7   :  { %v2346_v31 = vpop.f32.mrf.mxu1  ;;  %v6468_v20 = vadd.f32 %v2337_v55, %v2237_v30  ;;  %v2366_v1 = vsel %vm177_vm2, %v6448_v16, 0.0 }
0x23f8   :  { %v2418_v24 = vsel %vm177_vm2, %v2400_v29, 0.0  ;;  %v2347_v33 = vadd.f32 %v6417_v28, %v2346_v31  ;;  %v2535_v29 = vld [vmem:[#allocation3 + $0xa8] sm:$0xff] }
0x23f9   :  { %v2375_v34 = vsel %vm177_vm2, %v6468_v20, 0.0  ;;  %5353 = vmatprep.subr.mxu0 %v2535_v29 }
0x2403   :  { %v5702_v35 = vpop.eup %5701 }
0x2404   :  { %v2109_v61 = vmul.f32 %v5702_v35, %v2017_v5  ;;  %v2369_v5 = vsel %vm177_vm2, %v6437_v4, 0.0 }
0x2464   :  { %v2112_v38 = vpop.permute.xlu0 %2111 }
0x2465   :  { %v2114_v39 = vmul.f32 %v5702_v35, %v2112_v38  ;;  %v2395_v38 = vmul.f32 %v6433_v58, %v6433_v58 }
0x2467   :  { %2116 = vrot.lane.b32.xlu1 %v2114_v39, %s5811_s25  ;;  %v2403_v39 = vsel %vm177_vm2, %v2395_v38, 0.0  ;;  %v2714_v38 = vld [vmem:[#allocation3 + $0x130] sm:$0xff] }
0x24d9   :  { %v2117_v41 = vpop.permute.xlu1 %2116 }
0x24da   :  { %v2119_v42 = vadd.f32 %v2117_v41, %v2109_v61  ;;  %v2397_v61 = vmul.f32 %v6437_v4, %v6437_v4 }
0x24dc   :  { %5703 = vtanh.f32 %v2119_v42  ;;  %v2409_v41 = vsel %vm177_vm2, %v2397_v61, 0.0 }
0x24e9   :  { %v5704_v9 = vpop.eup %5703 }
0x24ea   :  { %2122 = vrot.lane.b32.xlu0 %v5704_v9, %s5810_s24 }
0x255c   :  { %v2123_v36 = vpop.permute.xlu0 %2122 }
0x255d   :  { %v2125_v57 = vmul.f32 %v5702_v35, %v2123_v36 }
0x255f   :  { %2127 = vrot.lane.b32.xlu1 %v2125_v57, %s5811_s25 }
0x25d1   :  { %v2128_v50 = vpop.permute.xlu1 %2127 }
0x25d2   :  { %2130 = vst.msk [vmem:[#allocation2 + $0x30] sm:$0xff] %vm177_vm2, %v2128_v50  ;;  %5331 = vmatmul.mubr.msk.f32.vlgmr.msra.gmra.mxu0 %vm177_vm2, %v2128_v50 }
0x25d3   :  { %5354 = vmatpush3.msra.mxu0 %v2535_v29 }
0x25d9   :  { %v2239_v32 = vld [vmem:[#allocation2 + $0x30] sm:$0xff] }
0x25da   :  { %v6475_v35 = vadd.f32 %v2347_v33, %v2239_v32  ;;  %v2715_v33 = vld [vmem:[#allocation3 + $0x138] sm:$0xff] }
0x25db   :  { %5375 = vmatprep.subr.mxu1 %v2715_v33 }
0x25dc   :  { %v2381_v60 = vsel %vm177_vm2, %v6475_v35, 0.0  ;;  %v2401_v57 = vmul.f32 %v6475_v35, %v6475_v35  ;;  %5376 = vmatpush3.msra.mxu1 %v2715_v33 }
0x25dd   :  { %5377 = vmatprep.subr.mxu1 %v2714_v38 }
0x25de   :  { %5378 = vmatpush3.msra.mxu1 %v2714_v38 }
0x2692   :  { %v2199_v49 = vpop.f32.mrf.mxu0 }
0x2693   :  { %v2203_v19 = vadd.f32 %v2199_v49, %v1412_v52  ;;  %v2421_v52 = vsel %vm177_vm2, %v2401_v57, 0.0 }
0x2694   :  { %v5332_v23 = vpop.f32.mrf.mxu0 }
0x2695   :  { %5705 = vtanh.f32 %v2203_v19  ;;  %v4810_v10 = vmul.f32 -1.442695, %v2203_v19 }
0x2697   :  { %5707 = vpow2.f32 %v4810_v10 }
0x26a2   :  { %v5706_v8 = vpop.eup %5705 }
0x26a3   :  { %2213 = vrot.lane.b32.xlu0 %v5706_v8, %s5810_s24 }
0x26a4   :  { %v5708_v2 = vpop.eup %5707 }
0x26a5   :  { %v2207_v56 = vadd.f32 1.0, %v5708_v2 }
0x26a7   :  { %5709 = vrcp.f32 %v2207_v56 }
0x26b4   :  { %v5710_v12 = vpop.eup %5709 }
0x26b5   :  { %v2211_v14 = vmul.f32 %v5710_v12, %v2119_v42  ;;  %v2399_v42 = vmul.f32 %v6468_v20, %v6468_v20 }
0x26b7   :  { %v2415_v36 = vsel %vm177_vm2, %v2399_v42, 0.0 }
0x2715   :  { %v2214_v13 = vpop.permute.xlu0 %2213 }
0x2716   :  { %v2216_v27 = vmul.f32 %v5710_v12, %v2214_v13 }
0x2718   :  { %2218 = vrot.lane.b32.xlu1 %v2216_v27, %s5811_s25 }
0x278a   :  { %v2219_v15 = vpop.permute.xlu1 %2218 }
0x278b   :  { %v2221_v37 = vadd.f32 %v2219_v15, %v2211_v14 }
0x278d   :  { %5711 = vtanh.f32 %v2221_v37 }
0x279a   :  { %v5712_v63 = vpop.eup %5711 }
0x279b   :  { %2224 = vrot.lane.b32.xlu0 %v5712_v63, %s5810_s24 }
0x27ba   :  { %2364 = vadd.xlane.f32.xlu0 %v2363_v54 }
0x27be   :  { %2370 = vadd.xlane.f32.xlu0 %v2369_v5 }
0x27c2   :  { %2373 = vadd.xlane.f32.xlu0 %v2372_v62 }
0x27c6   :  { %2379 = vadd.xlane.f32.xlu0 %v2378_v43 }
0x27ca   :  { %2407 = vadd.xlane.f32.xlu0 %v2406_v46 }
0x27ce   :  { %2413 = vadd.xlane.f32.xlu0 %v2412_v47 }
0x27d2   :  { %2419 = vadd.xlane.f32.xlu0 %v2418_v24  ;;  %v2534_v24 = vld [vmem:[#allocation3 + $0xa0] sm:$0xff] }
0x27d3   :  { %5355 = vmatprep.subr.mxu0 %v2534_v24 }
0x27d4   :  { %5356 = vmatpush3.msra.mxu0 %v2534_v24 }
0x280d   :  { %v2225_v17 = vpop.permute.xlu0 %2224 }
0x280e   :  { %v2227_v48 = vmul.f32 %v5710_v12, %v2225_v17  ;;  %v2533_v17 = vld [vmem:[#allocation3 + $0x98] sm:$0xff] }
0x280f   :  { %5357 = vmatprep.subr.mxu0 %v2533_v17 }
0x2810   :  { %2229 = vrot.lane.b32.xlu1 %v2227_v48, %s5811_s25  ;;  %v2532_v48 = vld [vmem:[#allocation3 + $0x90] sm:$0xff]  ;;  %5358 = vmatpush3.msra.mxu0 %v2533_v17 }
0x2811   :  { %5359 = vmatprep.subr.mxu0 %v2532_v48 }
0x2812   :  { %5360 = vmatpush3.msra.mxu0 %v2532_v48 }
0x2834   :  { %2367 = vadd.xlane.f32.xlu1 %v2366_v1 }
0x2838   :  { %2376 = vadd.xlane.f32.xlu1 %v2375_v34  ;;  %v6522_v34 = vld [vmem:[#allocation3 + $0xc8] sm:$0xff] }
0x2839   :  { %5364 = vmatprep.subr.mxu0 %v6522_v34 }
0x283c   :  { %2382 = vadd.xlane.f32.xlu1 %v2381_v60 }
0x2840   :  { %2404 = vadd.xlane.f32.xlu1 %v2403_v39 }
0x2843   :  { %v6484_v28 = vpop.xlane.xlu0 %2364 }
0x2844   :  { %2410 = vadd.xlane.f32.xlu1 %v2409_v41  ;;  %v2387_v61 = vmul.f32 0.03125, %v6484_v28 }
0x2847   :  { %v6489_v9 = vpop.xlane.xlu0 %2370 }
0x2848   :  { %2416 = vadd.xlane.f32.xlu1 %v2415_v36  ;;  %v2435_v36 = vmul.f32 %v2387_v61, %v2387_v61  ;;  %v2389_v57 = vmul.f32 0.03125, %v6489_v9 }
0x284b   :  { %v2374_v50 = vpop.xlane.xlu0 %2373 }
0x284c   :  { %2422 = vadd.xlane.f32.xlu1 %v2421_v52  ;;  %v2390_v23 = vmul.f32 0.03125, %v2374_v50 }
0x284e   :  { %v2438_v10 = vmul.f32 %v2390_v23, %v2390_v23  ;;  %v2462_v3 = vsub.f32 %v6443_v59, %v2390_v23 }
0x284f   :  { %v2380_v49 = vpop.xlane.xlu0 %2379 }
0x2850   :  { %v2392_v2 = vmul.f32 0.03125, %v2380_v49 }
0x2852   :  { %v2440_v27 = vmul.f32 %v2392_v2, %v2392_v2  ;;  %v2464_v18 = vsub.f32 %v6450_v22, %v2392_v2 }
0x2853   :  { %v2408_v19 = vpop.xlane.xlu0 %2407 }
0x2854   :  { %v2428_v30 = vmul.f32 0.03125, %v2408_v19  ;;  %v2437_v19 = vmul.f32 %v2389_v57, %v2389_v57 }
0x2857   :  { %v2414_v8 = vpop.xlane.xlu0 %2413 }
0x2858   :  { %v2430_v56 = vmul.f32 0.03125, %v2414_v8 }
0x285a   :  { %v2446_v12 = vsub.f32 %v2430_v56, %v2438_v10 }
0x285b   :  { %v2420_v13 = vpop.xlane.xlu0 %2419 }
0x285c   :  { %v2454_v14 = vmax.f32 %v2446_v12, 0.0  ;;  %v2432_v15 = vmul.f32 0.03125, %v2420_v13 }
0x285e   :  { %v2470_v37 = vadd.f32 1e-05, %v2454_v14  ;;  %v2448_v63 = vsub.f32 %v2432_v15, %v2440_v27 }
0x2860   :  { %5713 = vrsqrt.f32 %v2470_v37  ;;  %v2456_v6 = vmax.f32 %v2448_v63, 0.0 }
0x2862   :  { %v2472_v51 = vadd.f32 1e-05, %v2456_v6 }
0x2864   :  { %5715 = vrsqrt.f32 %v2472_v51 }
0x286d   :  { %v5714_v7 = vpop.eup %5713 }
0x286e   :  { %v2486_v54 = vmul.f32 %v5714_v7, %v2462_v3 }
0x2870   :  { %v2499_v25 = vmul.f32 %v6499_v53, %v2486_v54 }
0x2871   :  { %v5716_v5 = vpop.eup %5715 }
0x2872   :  { %v2512_v11 = vadd.f32 %v6504_v40, %v2499_v25  ;;  %v2488_v59 = vmul.f32 %v5716_v5, %v2464_v18 }
0x2874   :  { %2520 = vst.msk [vmem:[#allocation2 + $0x18] sm:$0xff] %vm177_vm2, %v2512_v11  ;;  %v2501_v21 = vmul.f32 %v6499_v53, %v2488_v59 }
0x2876   :  { %v2514_v62 = vadd.f32 %v6504_v40, %v2501_v21  ;;  %v2459_v21 = vsub.f32 %v6433_v58, %v2387_v61 }
0x2878   :  { %2522 = vst.msk [vmem:[#allocation2 + $0x28] sm:$0xff] %vm177_vm2, %v2514_v62 }
0x2882   :  { %v2230_v43 = vpop.permute.xlu1 %2229 }
0x2883   :  { %2232 = vst.msk [vmem:[#allocation2 + $0x38] sm:$0xff] %vm177_vm2, %v2230_v43 }
0x288a   :  { %v2240_v45 = vld [vmem:[#allocation2 + $0x38] sm:$0xff] }
0x288b   :  { %v6515_v22 = vadd.f32 %v6420_v26, %v2240_v45  ;;  %v2461_v45 = vsub.f32 %v6437_v4, %v2389_v57 }
0x288d   :  { %v2384_v46 = vsel %vm177_vm2, %v6515_v22, 0.0  ;;  %v2402_v44 = vmul.f32 %v6515_v22, %v6515_v22 }
0x288e   :  { %2385 = vadd.xlane.f32.xlu0 %v2384_v46 }
0x288f   :  { %v2424_v47 = vsel %vm177_vm2, %v2402_v44, 0.0 }
0x2892   :  { %2425 = vadd.xlane.f32.xlu0 %v2424_v47 }
0x28bd   :  { %v2368_v26 = vpop.xlane.xlu1 %2367 }
0x28be   :  { %v2388_v55 = vmul.f32 0.03125, %v2368_v26 }
0x28c0   :  { %v2436_v31 = vmul.f32 %v2388_v55, %v2388_v55  ;;  %v2460_v15 = vsub.f32 %v6448_v16, %v2388_v55 }
0x28c1   :  { %v2377_v1 = vpop.xlane.xlu1 %2376 }
0x28c2   :  { %v2444_v32 = vsub.f32 %v2428_v30, %v2436_v31  ;;  %v2391_v23 = vmul.f32 0.03125, %v2377_v1 }
0x28c4   :  { %v2452_v60 = vmax.f32 %v2444_v32, 0.0  ;;  %v2439_v28 = vmul.f32 %v2391_v23, %v2391_v23  ;;  %v2463_v24 = vsub.f32 %v6468_v20, %v2391_v23 }
0x28c5   :  { %v2383_v39 = vpop.xlane.xlu1 %2382 }
0x28c6   :  { %v2468_v41 = vadd.f32 1e-05, %v2452_v60  ;;  %v2393_v12 = vmul.f32 0.03125, %v2383_v39 }
0x28c8   :  { %5717 = vrsqrt.f32 %v2468_v41  ;;  %v2441_v6 = vmul.f32 %v2393_v12, %v2393_v12  ;;  %v2465_v55 = vsub.f32 %v6475_v35, %v2393_v12  ;;  %v2624_v12 = vld [vmem:[#allocation3 + $0xc0] sm:$0xff] }
0x28c9   :  { %v2405_v42 = vpop.xlane.xlu1 %2404 }
0x28ca   :  { %v2427_v50 = vmul.f32 0.03125, %v2405_v42 }
0x28cc   :  { %v2443_v52 = vsub.f32 %v2427_v50, %v2435_v36 }
0x28cd   :  { %v2411_v49 = vpop.xlane.xlu1 %2410 }
0x28ce   :  { %v2451_v8 = vmax.f32 %v2443_v52, 0.0  ;;  %v2429_v10 = vmul.f32 0.03125, %v2411_v49 }
0x28d0   :  { %v2467_v2 = vadd.f32 1e-05, %v2451_v8  ;;  %v2445_v56 = vsub.f32 %v2429_v10, %v2437_v19 }
0x28d1   :  { %v2417_v13 = vpop.xlane.xlu1 %2416 }
0x28d2   :  { %5719 = vrsqrt.f32 %v2467_v2  ;;  %v2453_v27 = vmax.f32 %v2445_v56, 0.0  ;;  %v2431_v14 = vmul.f32 0.03125, %v2417_v13  ;;  %v2712_v13 = vld [vmem:[#allocation3 + $0x120] sm:$0xff] }
0x28d4   :  { %v2469_v37 = vadd.f32 1e-05, %v2453_v27  ;;  %v2447_v63 = vsub.f32 %v2431_v14, %v2439_v28  ;;  %v2799_v28 = vld [vmem:[#allocation3 + $0xe8] sm:$0xff]  ;;  %v2883_v27 = vld [vmem:[#allocation3 + $0x158] sm:$0xff] }
0x28d5   :  { %v5718_v9 = vpop.eup %5717  ;;  %v2423_v51 = vpop.xlane.xlu1 %2422 }
0x28d6   :  { %v2484_v3 = vmul.f32 %v5718_v9, %v2460_v15  ;;  %5721 = vrsqrt.f32 %v2469_v37  ;;  %v2455_v7 = vmax.f32 %v2447_v63, 0.0  ;;  %v2433_v54 = vmul.f32 0.03125, %v2423_v51  ;;  %v2798_v9 = vld [vmem:[#allocation3 + $0xe0] sm:$0xff]  ;;  %v2797_v51 = vld [vmem:[#allocation3 + $0xd8] sm:$0xff] }
0x28d8   :  { %v2497_v18 = vmul.f32 %v6499_v53, %v2484_v3  ;;  %v2471_v25 = vadd.f32 1e-05, %v2455_v7  ;;  %v2449_v5 = vsub.f32 %v2433_v54, %v2441_v6  ;;  %v2882_v6 = vld [vmem:[#allocation3 + $0x150] sm:$0xff]  ;;  %v2881_v3 = vld [vmem:[#allocation3 + $0x148] sm:$0xff]  ;;  %v2880_v54 = vld [vmem:[#allocation3 + $0x140] sm:$0xff] }
0x28d9   :  { %v2796_v7 = vld [vmem:[#allocation3 + $0xd0] sm:$0xff] }
0x28da   :  { %v2510_v11 = vadd.f32 %v6504_v40, %v2497_v18  ;;  %5723 = vrsqrt.f32 %v2471_v25  ;;  %v2457_v59 = vmax.f32 %v2449_v5, 0.0  ;;  %v2967_v18 = vld [vmem:[#allocation3 + $0x108] sm:$0xff]  ;;  %v3051_v25 = vld [vmem:[#allocation3 + $0x178] sm:$0xff]  ;;  %v2966_v5 = vld [vmem:[#allocation3 + $0x100] sm:$0xff] }
0x28dc   :  { %2518 = vst.msk [vmem:[#allocation2 + $0x8] sm:$0xff] %vm177_vm2, %v2510_v11  ;;  %v2473_v16 = vadd.f32 1e-05, %v2457_v59  ;;  %v3050_v11 = vld [vmem:[#allocation3 + $0x170] sm:$0xff]  ;;  %v2965_v59 = vld [vmem:[#allocation3 + $0xf8] sm:$0xff] }
0x28de   :  { %5725 = vrsqrt.f32 %v2473_v16  ;;  %v3049_v16 = vld [vmem:[#allocation3 + $0x168] sm:$0xff] }
0x28df   :  { %v5720_v62 = vpop.eup %5719 }
0x28e0   :  { %v2483_v43 = vmul.f32 %v5720_v62, %v2459_v21  ;;  %v2964_v21 = vld [vmem:[#allocation3 + $0xf0] sm:$0xff]  ;;  %v3048_v62 = vld [vmem:[#allocation3 + $0x160] sm:$0xff] }
0x28e2   :  { %v2496_v46 = vmul.f32 %v6499_v53, %v2483_v43  ;;  %v4825_v43 = vld [vmem:[%s6770_s2 + $0x9] ss:$0 sm:$0xff] }
0x28e3   :  { %v5722_v44 = vpop.eup %5721 }
0x28e4   :  { %v2509_v47 = vadd.f32 %v6504_v40, %v2496_v46  ;;  %v2485_v29 = vmul.f32 %v5722_v44, %v2461_v45  ;;  %v4828_v45 = vld [vmem:[%s6770_s2 + $0xc] ss:$0 sm:$0xff] }
0x28e6   :  { %2517 = vst.msk [vmem:[#allocation2] sm:$0xff] %vm177_vm2, %v2509_v47  ;;  %v2498_v17 = vmul.f32 %v6499_v53, %v2485_v29 }
0x28e7   :  { %v5724_v48 = vpop.eup %5723 }
0x28e8   :  { %v2511_v58 = vadd.f32 %v6504_v40, %v2498_v17  ;;  %v2487_v26 = vmul.f32 %v5724_v48, %v2463_v24  ;;  %v4831_v48 = vld [vmem:[%s6770_s2 + $0xa] ss:$0 sm:$0xff] }
0x28ea   :  { %2519 = vst.msk [vmem:[#allocation2 + $0x10] sm:$0xff] %vm177_vm2, %v2511_v58  ;;  %v2500_v4 = vmul.f32 %v6499_v53, %v2487_v26  ;;  %v4834_v58 = vld [vmem:[%s6770_s2 + $0xd] ss:$0 sm:$0xff] }
0x28eb   :  { %v5726_v30 = vpop.eup %5725 }
0x28ec   :  { %v2513_v31 = vadd.f32 %v6504_v40, %v2500_v4  ;;  %v2489_v1 = vmul.f32 %v5726_v30, %v2465_v55 }
0x28ee   :  { %2521 = vst.msk [vmem:[#allocation2 + $0x20] sm:$0xff] %vm177_vm2, %v2513_v31  ;;  %v2502_v20 = vmul.f32 %v6499_v53, %v2489_v1 }
0x28f0   :  { %v2515_v32 = vadd.f32 %v6504_v40, %v2502_v20 }
0x28f1   :  { %v2525_v19 = vld [vmem:[#allocation2] ss:$8 sm:$0xf]  ;;  %v2529_v23 = vld [vmem:[#allocation2 + $0x1] ss:$8 sm:$0xf] }
0x28f2   :  { %2523 = vst.msk [vmem:[#allocation2 + $0x30] sm:$0xff] %vm177_vm2, %v2515_v32 }
0x2917   :  { %v2386_v33 = vpop.xlane.xlu0 %2385 }
0x2918   :  { %v2394_v60 = vmul.f32 0.03125, %v2386_v33 }
0x291a   :  { %v2442_v35 = vmul.f32 %v2394_v60, %v2394_v60  ;;  %v2466_v36 = vsub.f32 %v6515_v22, %v2394_v60  ;;  %v2713_v22 = vld [vmem:[#allocation3 + $0x128] sm:$0xff] }
0x291b   :  { %v2426_v38 = vpop.xlane.xlu0 %2425  ;;  %5379 = vmatprep.subr.mxu1 %v2713_v22  ;;  %v4837_v60 = vld [vmem:[%s6770_s2 + $0xb] ss:$0 sm:$0xff] }
0x291c   :  { %v2434_v39 = vmul.f32 0.03125, %v2426_v38  ;;  %5380 = vmatpush3.msra.mxu1 %v2713_v22  ;;  %v4840_v38 = vld [vmem:[%s6770_s2 + $0xe] ss:$0 sm:$0xff] }
0x291d   :  { %5381 = vmatprep.subr.mxu1 %v2712_v13 }
0x291e   :  { %v2450_v61 = vsub.f32 %v2434_v39, %v2442_v35  ;;  %5382 = vmatpush3.msra.mxu1 %v2712_v13 }
0x291f   :  { %5397 = vmatprep.subr.mxu1 %v2883_v27 }
0x2920   :  { %v2458_v41 = vmax.f32 %v2450_v61, 0.0 }
0x2922   :  { %v2474_v42 = vadd.f32 1e-05, %v2458_v41 }
0x2924   :  { %5727 = vrsqrt.f32 %v2474_v42 }
0x2931   :  { %v5728_v57 = vpop.eup %5727 }
0x2932   :  { %v2490_v50 = vmul.f32 %v5728_v57, %v2466_v36 }
0x2934   :  { %v2503_v52 = vmul.f32 %v6499_v53, %v2490_v50  ;;  %v2623_v53 = vld [vmem:[#allocation3 + $0xb8] sm:$0xff] }
0x2936   :  { %v2516_v49 = vadd.f32 %v6504_v40, %v2503_v52  ;;  %v2622_v40 = vld [vmem:[#allocation3 + $0xb0] sm:$0xff] }
0x2938   :  { %2524 = vst.msk [vmem:[#allocation2 + $0x38] sm:$0xff] %vm177_vm2, %v2516_v49 }
0x293f   :  { %v2526_v8 = vld [vmem:[#allocation2] ss:$8 sm:$0xf0]  ;;  %v2530_v10 = vld [vmem:[#allocation2 + $0x1] ss:$8 sm:$0xf0] }
0x2940   :  { %v2527_v2 = vor.u32 %v2526_v8, %v2525_v19  ;;  %v2531_v56 = vor.u32 %v2530_v10, %v2529_v23 }
0x2942   :  { %5361 = vmatprep.mubr.msk.f32.mxu0 %vm177_vm2, %v2527_v2 }
0x2943   :  { %5362 = vmatmul.mubr.msk.f32.vlgmr.msra.gmra.mxu0 %vm177_vm2, %v2531_v56 }
0x2944   :  { %5365 = vmatpush3.msra.mxu0 %v6522_v34  ;;  %v4822_v34 = vld [vmem:[%s6770_s2 + $0x8] ss:$0 sm:$0xff] }
0x2945   :  { %5366 = vmatprep.subr.mxu0 %v2624_v12 }
0x2946   :  { %5367 = vmatpush3.msra.mxu0 %v2624_v12 }
0x2947   :  { %5368 = vmatprep.subr.mxu0 %v2623_v53 }
0x2948   :  { %5369 = vmatpush3.msra.mxu0 %v2623_v53 }
0x2949   :  { %5370 = vmatprep.subr.mxu0 %v2622_v40 }
0x294a   :  { %5371 = vmatpush3.msra.mxu0 %v2622_v40 }
0x294b   :  { %5386 = vmatprep.subr.mxu0 %v2799_v28 }
0x2a03   :  { %v5363_v14 = vpop.f32.mrf.mxu0 }
0x2a04   :  { %v6559_v63 = vadd.f32 %v5363_v14, %v4822_v34 }
0x2a05   :  { %v2613_v15 = vpop.f32.mrf.mxu0 }
0x2a06   :  { %v6557_v37 = vadd.f32 %v4822_v34, %v2613_v15 }
0x2a08   :  { %5372 = vmatprep.mubr.msk.f32.mxu0 %vm177_vm2, %v6557_v37  ;;  %5383 = vmatprep.mubr.msk.f32.mxu1 %vm177_vm2, %v6557_v37 }
0x2a09   :  { %5373 = vmatmul.mubr.msk.f32.vlgmr.msra.gmra.mxu0 %vm177_vm2, %v6559_v63  ;;  %5384 = vmatmul.mubr.msk.f32.vlgmr.msra.gmra.mxu1 %vm177_vm2, %v6559_v63 }
0x2a0a   :  { %5387 = vmatpush3.msra.mxu0 %v2799_v28  ;;  %5398 = vmatpush3.msra.mxu1 %v2883_v27 }
0x2a0b   :  { %5388 = vmatprep.subr.mxu0 %v2798_v9  ;;  %5394 = vmatprep.mubr.msk.f32.mxu0 %vm177_vm2, %v6557_v37 }
0x2a0c   :  { %5399 = vmatprep.subr.mxu1 %v2882_v6  ;;  %5405 = vmatprep.mubr.msk.f32.mxu1 %vm177_vm2, %v6557_v37 }
0x2a0d   :  { %5389 = vmatpush3.msra.mxu0 %v2798_v9  ;;  %5400 = vmatpush3.msra.mxu1 %v2882_v6 }
0x2a0e   :  { %5390 = vmatprep.subr.mxu0 %v2797_v51  ;;  %5401 = vmatprep.subr.mxu1 %v2881_v3 }
0x2a0f   :  { %5391 = vmatpush3.msra.mxu0 %v2797_v51  ;;  %5402 = vmatpush3.msra.mxu1 %v2881_v3 }
0x2a10   :  { %5392 = vmatprep.subr.mxu0 %v2796_v7  ;;  %5403 = vmatprep.subr.mxu1 %v2880_v54 }
0x2a11   :  { %5393 = vmatpush3.msra.mxu0 %v2796_v7  ;;  %5404 = vmatpush3.msra.mxu1 %v2880_v54 }
0x2a12   :  { %5395 = vmatmul.mubr.msk.f32.vlgmr.msra.gmra.mxu0 %vm177_vm2, %v6559_v63  ;;  %5406 = vmatmul.mubr.msk.f32.vlgmr.msra.gmra.mxu1 %vm177_vm2, %v6559_v63 }
0x2a13   :  { %5408 = vmatprep.subr.mxu0 %v2967_v18  ;;  %5419 = vmatprep.subr.mxu1 %v3051_v25 }
0x2a14   :  { %5409 = vmatpush3.msra.mxu0 %v2967_v18  ;;  %5416 = vmatprep.mubr.msk.f32.mxu0 %vm177_vm2, %v6557_v37 }
0x2a15   :  { %5420 = vmatpush3.msra.mxu1 %v3051_v25  ;;  %5427 = vmatprep.mubr.msk.f32.mxu1 %vm177_vm2, %v6557_v37  ;;  %v6638_v25 = vld [vmem:[#allocation3 + $0x118] sm:$0xff] }
0x2a16   :  { %5410 = vmatprep.subr.mxu0 %v2966_v5  ;;  %5421 = vmatprep.subr.mxu1 %v3050_v11 }
0x2a17   :  { %5411 = vmatpush3.msra.mxu0 %v2966_v5  ;;  %5422 = vmatpush3.msra.mxu1 %v3050_v11  ;;  %v6641_v5 = vld [vmem:[#allocation3 + $0x110] sm:$0xff]  ;;  %v3135_v11 = vld [vmem:[#allocation3 + $0x188] sm:$0xff] }
0x2a18   :  { %5412 = vmatprep.subr.mxu0 %v2965_v59  ;;  %5423 = vmatprep.subr.mxu1 %v3049_v16 }
0x2a19   :  { %5413 = vmatpush3.msra.mxu0 %v2965_v59  ;;  %5424 = vmatpush3.msra.mxu1 %v3049_v16  ;;  %v3134_v59 = vld [vmem:[#allocation3 + $0x180] sm:$0xff] }
0x2a1a   :  { %5414 = vmatprep.subr.mxu0 %v2964_v21  ;;  %5425 = vmatprep.subr.mxu1 %v3048_v62 }
0x2a1b   :  { %5415 = vmatpush3.msra.mxu0 %v2964_v21  ;;  %5426 = vmatpush3.msra.mxu1 %v3048_v62 }
0x2a1c   :  { %5417 = vmatmul.mubr.msk.f32.vlgmr.msra.gmra.mxu0 %vm177_vm2, %v6559_v63  ;;  %5428 = vmatmul.mubr.msk.f32.vlgmr.msra.gmra.mxu1 %vm177_vm2, %v6559_v63 }
0x2a1d   :  { %5430 = vmatprep.subr.mxu0 %v5808_v0  ;;  %5432 = vmatprep.mubr.msk.f32.mxu0 %vm5809_vm0, %v5808_v0 }
0x2a1e   :  { %5435 = vmatprep.subr.mxu1 %v5808_v0  ;;  %5437 = vmatprep.mubr.msk.f32.mxu1 %vm5809_vm0, %v5808_v0 }
0x2ac9   :  { %v5374_v46 = vpop.f32.mrf.mxu0  ;;  %v5385_v44 = vpop.f32.mrf.mxu1 }
0x2aca   :  { %v6597_v47 = vadd.f32 %v5374_v46, %v4825_v43  ;;  %v6599_v29 = vadd.f32 %v5385_v44, %v4828_v45 }
0x2acb   :  { %v2703_v24 = vpop.f32.mrf.mxu0  ;;  %v2787_v17 = vpop.f32.mrf.mxu1 }
0x2acc   :  { %v2704_v32 = vadd.f32 %v4825_v43, %v2703_v24  ;;  %v2788_v35 = vadd.f32 %v4828_v45, %v2787_v17 }
0x2ad2   :  { %v5396_v26 = vpop.f32.mrf.mxu0  ;;  %v5407_v55 = vpop.f32.mrf.mxu1 }
0x2ad3   :  { %v6607_v4 = vadd.f32 %v5396_v26, %v4831_v48  ;;  %v6609_v30 = vadd.f32 %v5407_v55, %v4834_v58 }
0x2ad4   :  { %v2871_v31 = vpop.f32.mrf.mxu0  ;;  %v2955_v20 = vpop.f32.mrf.mxu1 }
0x2ad5   :  { %v2872_v1 = vadd.f32 %v4831_v48, %v2871_v31  ;;  %v2956_v33 = vadd.f32 %v4834_v58, %v2955_v20 }
0x2ad7   :  { %5431 = vmatpush3.xpose.msk.msra.mxu0 %vm3136_vm3, %v2872_v1 }
0x2ad8   :  { %5440 = vmatprep.subr.mxu0 %v5808_v0 }
0x2ada   :  { %5433 = vmatmul.mubr.msk.f32.vlgmr.msra.gmra.mxu0 %vm3136_vm3, %v2704_v32 }
0x2adb   :  { %5441 = vmatpush3.xpose.msk.msra.mxu0 %vm3136_vm3, %v2956_v33  ;;  %5442 = vmatprep.mubr.msk.f32.mxu0 %vm5809_vm0, %v5808_v0 }
0x2adc   :  { %v5418_v39 = vpop.f32.mrf.mxu0  ;;  %v5429_v61 = vpop.f32.mrf.mxu1  ;;  %5450 = vmatprep.subr.mxu0 %v5808_v0 }
0x2add   :  { %v3045_v41 = vadd.f32 %v5418_v39, %v4837_v60  ;;  %v6624_v42 = vadd.f32 %v5429_v61, %v4840_v38 }
0x2ade   :  { %v3039_v36 = vpop.f32.mrf.mxu0  ;;  %5443 = vmatmul.mubr.msk.f32.vlgmr.msra.gmra.mxu0 %vm3136_vm3, %v2788_v35  ;;  %v3123_v6 = vpop.f32.mrf.mxu1 }
0x2adf   :  { %v3040_v57 = vadd.f32 %v4837_v60, %v3039_v36  ;;  %5454 = vmatprep.mubr.msk.f32.mxu0 %vm5809_vm0, %v5808_v0  ;;  %v3124_v7 = vadd.f32 %v4840_v38, %v3123_v6  ;;  %5451 = vmatpush3.msra.mxu0 %v3135_v11  ;;  %v4859_v38 = vld [vmem:[%s6770_s2 + $0xf] ss:$0 sm:$0xff]  ;;  %v4861_v6 = vld [vmem:[%s6770_s2 + $0x11] ss:$0 sm:$0xff] }
0x2ae0   :  { %5452 = vmatprep.subr.mxu0 %v5808_v0 }
0x2ae1   :  { %5436 = vmatpush3.msra.mxu1 %v3040_v57  ;;  %5453 = vmatpush3.msra.mxu0 %v3134_v59 }
0x2ae2   :  { %5445 = vmatprep.subr.mxu1 %v5808_v0  ;;  %5464 = vmatprep.subr.mxu0 %v5808_v0 }
0x2b9a   :  { %v3209_v50 = vpop.f32.mrf.mxu0 }
0x2b9b   :  { %v3213_v52 = vmul.f32 0.25, %v3209_v50 }
0x2b9c   :  { %v5434_v49 = vpop.f32.mrf.mxu0 }
0x2b9d   :  { %v3214_v19 = vsel %vm43_vm1, %v3213_v52, -inf }
0x2b9e   :  { %3215 = vmax.xlane.f32.xlu1 %v3214_v19  ;;  %v3370_v23 = vpop.f32.mrf.mxu0 }
0x2b9f   :  { %v3374_v8 = vmul.f32 0.25, %v3370_v23 }
0x2ba0   :  { %v5444_v10 = vpop.f32.mrf.mxu0 }
0x2ba1   :  { %v3375_v2 = vsel %vm43_vm1, %v3374_v8, -inf }
0x2ba2   :  { %3376 = vmax.xlane.f32.xlu0 %v3375_v2 }
0x2c27   :  { %v3216_v56 = vpop.xlane.xlu1 %3215 }
0x2c28   :  { %v3217_v12 = vsub.f32 %v3213_v52, %v3216_v56 }
0x2c2a   :  { %v3218_v53 = vmul.f32 1.442695, %v3217_v12 }
0x2c2b   :  { %v3377_v22 = vpop.xlane.xlu0 %3376 }
0x2c2c   :  { %5729 = vpow2.f32 %v3218_v53  ;;  %v3378_v40 = vsub.f32 %v3374_v8, %v3377_v22 }
0x2c2e   :  { %v3379_v13 = vmul.f32 1.442695, %v3378_v40 }
0x2c30   :  { %5731 = vpow2.f32 %v3379_v13 }
0x2c39   :  { %v5730_v28 = vpop.eup %5729 }
0x2c3a   :  { %v3220_v27 = vsel %vm43_vm1, %v5730_v28, 0.0 }
0x2c3b   :  { %3221 = vadd.xlane.f32.xlu1 %v3220_v27 }
0x2c3d   :  { %v5732_v14 = vpop.eup %5731 }
0x2c3e   :  { %v3381_v34 = vsel %vm43_vm1, %v5732_v14, 0.0 }
0x2c3f   :  { %3382 = vadd.xlane.f32.xlu0 %v3381_v34 }
0x2cc4   :  { %v3222_v15 = vpop.xlane.xlu1 %3221 }
0x2cc5   :  { %5733 = vrcp.f32 %v3222_v15  ;;  %v4860_v15 = vld [vmem:[%s6770_s2 + $0x10] ss:$0 sm:$0xff] }
0x2cc8   :  { %v3383_v9 = vpop.xlane.xlu0 %3382 }
0x2cc9   :  { %5735 = vrcp.f32 %v3383_v9 }
0x2cd2   :  { %v5734_v51 = vpop.eup %5733 }
0x2cd3   :  { %v3224_v3 = vmul.f32 %v5734_v51, %v5730_v28 }
0x2cd5   :  { %5438 = vmatmul.mubr.msk.f32.vlgmr.msra.gmra.mxu1 %vm43_vm1, %v3224_v3 }
0x2cd6   :  { %v5736_v54 = vpop.eup %5735  ;;  %5446 = vmatpush3.msra.mxu1 %v3124_v7  ;;  %5447 = vmatprep.mubr.msk.f32.mxu1 %vm5809_vm0, %v5808_v0 }
0x2cd7   :  { %v3385_v18 = vmul.f32 %v5736_v54, %v5732_v14  ;;  %5457 = vmatprep.subr.mxu1 %v5808_v0 }
0x2cd9   :  { %5448 = vmatmul.mubr.msk.f32.vlgmr.msra.gmra.mxu1 %vm43_vm1, %v3385_v18 }
0x2cda   :  { %5458 = vmatpush3.msra.mxu1 %v6638_v25  ;;  %5461 = vmatprep.mubr.msk.f32.mxu1 %vm5809_vm0, %v5808_v0 }
0x2cdb   :  { %5459 = vmatprep.subr.mxu1 %v5808_v0 }
0x2cdc   :  { %5460 = vmatpush3.msra.mxu1 %v6641_v5 }
0x2cdd   :  { %5469 = vmatprep.subr.mxu1 %v5808_v0 }
0x2d95   :  { %v3294_v16 = vpop.f32.mrf.mxu1 }
0x2d96   :  { %5462 = vmatmul.mubr.msk.f32.vlgmr.msra.gmra.mxu1 %vm3136_vm3, %v3294_v16 }
0x2d97   :  { %5470 = vmatpush3.msra.mxu1 %v3045_v41  ;;  %v5439_v21 = vpop.f32.mrf.mxu1  ;;  %5471 = vmatprep.mubr.msk.f32.mxu1 %vm5809_vm0, %v5808_v0 }
0x2d98   :  { %5479 = vmatprep.subr.mxu1 %v5808_v0 }
0x2d99   :  { %v3455_v62 = vpop.f32.mrf.mxu1 }
0x2d9a   :  { %5455 = vmatmul.mubr.msk.f32.vlgmr.msra.gmra.mxu0 %vm3136_vm3, %v3455_v62 }
0x2d9b   :  { %5465 = vmatpush3.xpose.msk.msra.mxu0 %vm3136_vm3, %v6607_v4  ;;  %v5449_v43 = vpop.f32.mrf.mxu1  ;;  %5466 = vmatprep.mubr.msk.f32.mxu0 %vm5809_vm0, %v5808_v0 }
0x2d9c   :  { %5474 = vmatprep.subr.mxu0 %v5808_v0 }
0x2d9e   :  { %5467 = vmatmul.mubr.msk.f32.vlgmr.msra.gmra.mxu0 %vm3136_vm3, %v6597_v47 }
0x2d9f   :  { %5475 = vmatpush3.xpose.msk.msra.mxu0 %vm3136_vm3, %v6609_v30  ;;  %5476 = vmatprep.mubr.msk.f32.mxu0 %vm5809_vm0, %v5808_v0 }
0x2da0   :  { %5484 = vmatprep.subr.mxu0 %v5808_v0 }
0x2da2   :  { %5477 = vmatmul.mubr.msk.f32.vlgmr.msra.gmra.mxu0 %vm3136_vm3, %v6599_v29 }
0x2da3   :  { %5485 = vmatpush3.msra.mxu0 %v3135_v11  ;;  %5488 = vmatprep.mubr.msk.f32.mxu0 %vm5809_vm0, %v5808_v0 }
0x2da4   :  { %5486 = vmatprep.subr.mxu0 %v5808_v0 }
0x2da5   :  { %5487 = vmatpush3.msra.mxu0 %v3134_v59 }
0x2e56   :  { %v3601_v45 = vpop.f32.mrf.mxu1 }
0x2e58   :  { %v5463_v46 = vpop.f32.mrf.mxu1 }
0x2e59   :  { %v4131_v46 = vld [vmem:[#allocation3 + $0x1a8] sm:$0xff] }
0x2e5a   :  { %v3528_v44 = vpop.f32.mrf.mxu0  ;;  %5498 = vmatprep.subr.mxu0 %v4131_v46 }
0x2e5b   :  { %v3602_v47 = vadd.f32 %v3601_v45, %v3528_v44  ;;  %v4130_v44 = vld [vmem:[#allocation3 + $0x1a0] sm:$0xff] }
0x2e5c   :  { %v5456_v24 = vpop.f32.mrf.mxu0 }
0x2e5d   :  { %v4078_v35 = vadd.f32 %v4859_v38, %v3602_v47  ;;  %v4129_v47 = vld [vmem:[#allocation3 + $0x198] sm:$0xff]  ;;  %v4128_v24 = vld [vmem:[#allocation3 + $0x190] sm:$0xff] }
0x2e5e   :  { %v3677_v17 = vpop.f32.mrf.mxu0 }
0x2e5f   :  { %v3681_v48 = vmul.f32 0.25, %v3677_v17  ;;  %v4080_v61 = vadd.f32 %v4078_v35, %v6557_v37  ;;  %v4226_v17 = vld [vmem:[#allocation3 + $0x1e0] sm:$0xff] }
0x2e60   :  { %v5468_v58 = vpop.f32.mrf.mxu0 }
0x2e61   :  { %v3682_v26 = vsel %vm43_vm1, %v3681_v48, -inf  ;;  %v4082_v57 = vsel %vm177_vm2, %v4080_v61, 0.0  ;;  %v4090_v52 = vmul.f32 %v4080_v61, %v4080_v61  ;;  %v4224_v58 = vld [vmem:[#allocation3 + $0x1d0] sm:$0xff] }
0x2e62   :  { %3683 = vmax.xlane.f32.xlu1 %v3682_v26  ;;  %v3838_v55 = vpop.f32.mrf.mxu0 }
0x2e63   :  { %v3842_v29 = vmul.f32 0.25, %v3838_v55  ;;  %v4092_v49 = vsel %vm177_vm2, %v4090_v52, 0.0 }
0x2e64   :  { %v5478_v4 = vpop.f32.mrf.mxu0 }
0x2e65   :  { %v3843_v30 = vsel %vm43_vm1, %v3842_v29, -inf }
0x2e66   :  { %3844 = vmax.xlane.f32.xlu0 %v3843_v30 }
0x2eeb   :  { %v3684_v31 = vpop.xlane.xlu1 %3683 }
0x2eec   :  { %v3685_v1 = vsub.f32 %v3681_v48, %v3684_v31  ;;  %v4225_v48 = vld [vmem:[#allocation3 + $0x1d8] sm:$0xff] }
0x2eee   :  { %v3686_v20 = vmul.f32 1.442695, %v3685_v1 }
0x2eef   :  { %v3845_v32 = vpop.xlane.xlu0 %3844 }
0x2ef0   :  { %5737 = vpow2.f32 %v3686_v20  ;;  %v3846_v33 = vsub.f32 %v3842_v29, %v3845_v32 }
0x2ef2   :  { %v3847_v60 = vmul.f32 1.442695, %v3846_v33 }
0x2ef4   :  { %5739 = vpow2.f32 %v3847_v60 }
0x2efd   :  { %v5738_v39 = vpop.eup %5737 }
0x2efe   :  { %v3688_v41 = vsel %vm43_vm1, %v5738_v39, 0.0 }
0x2eff   :  { %3689 = vadd.xlane.f32.xlu1 %v3688_v41  ;;  %v4221_v41 = vld [vmem:[#allocation3 + $0x1b8] sm:$0xff] }
0x2f01   :  { %v5740_v36 = vpop.eup %5739 }
0x2f02   :  { %v3849_v50 = vsel %vm43_vm1, %v5740_v36, 0.0 }
0x2f03   :  { %4083 = vadd.xlane.f32.xlu1 %v4082_v57  ;;  %3850 = vadd.xlane.f32.xlu0 %v3849_v50  ;;  %v4862_v57 = vld [vmem:[%s6770_s2 + $0x12] ss:$0 sm:$0xff] }
0x2f07   :  { %4093 = vadd.xlane.f32.xlu1 %v4092_v49 }
0x2f88   :  { %v3690_v19 = vpop.xlane.xlu1 %3689 }
0x2f89   :  { %5741 = vrcp.f32 %v3690_v19 }
0x2f8c   :  { %v3851_v23 = vpop.xlane.xlu0 %3850  ;;  %v4084_v56 = vpop.xlane.xlu1 %4083 }
0x2f8d   :  { %5743 = vrcp.f32 %v3851_v23 }
0x2f90   :  { %v4094_v12 = vpop.xlane.xlu1 %4093 }
0x2f91   :  { %v4098_v53 = vmul.f32 0.03125, %v4094_v12 }
0x2f96   :  { %v5742_v8 = vpop.eup %5741 }
0x2f97   :  { %v3692_v37 = vmul.f32 %v5742_v8, %v5738_v39  ;;  %v4223_v39 = vld [vmem:[#allocation3 + $0x1c8] sm:$0xff] }
0x2f99   :  { %5472 = vmatmul.mubr.msk.f32.vlgmr.msra.gmra.mxu1 %vm43_vm1, %v3692_v37  ;;  %v4865_v37 = vld [vmem:[%s6770_s2 + $0x13] ss:$0 sm:$0xff] }
0x2f9a   :  { %v5744_v10 = vpop.eup %5743  ;;  %5480 = vmatpush3.msra.mxu1 %v6624_v42  ;;  %5481 = vmatprep.mubr.msk.f32.mxu1 %vm5809_vm0, %v5808_v0  ;;  %v4088_v42 = vmul.f32 0.03125, %v4084_v56 }
0x2f9b   :  { %v3853_v2 = vmul.f32 %v5744_v10, %v5740_v36  ;;  %5491 = vmatprep.subr.mxu1 %v5808_v0  ;;  %v4220_v36 = vld [vmem:[#allocation3 + $0x1b0] sm:$0xff] }
0x2f9c   :  { %v4100_v22 = vmul.f32 %v4088_v42, %v4088_v42  ;;  %v4106_v14 = vsub.f32 %v4080_v61, %v4088_v42  ;;  %v4222_v61 = vld [vmem:[#allocation3 + $0x1c0] sm:$0xff] }
0x2f9d   :  { %5482 = vmatmul.mubr.msk.f32.vlgmr.msra.gmra.mxu1 %vm43_vm1, %v3853_v2 }
0x2f9e   :  { %5492 = vmatpush3.msra.mxu1 %v6638_v25  ;;  %5495 = vmatprep.mubr.msk.f32.mxu1 %vm5809_vm0, %v5808_v0  ;;  %v4102_v40 = vsub.f32 %v4098_v53, %v4100_v22 }
0x2f9f   :  { %5493 = vmatprep.subr.mxu1 %v5808_v0 }
0x2fa0   :  { %5494 = vmatpush3.msra.mxu1 %v6641_v5  ;;  %v4104_v13 = vmax.f32 %v4102_v40, 0.0 }
0x2fa2   :  { %v4108_v28 = vadd.f32 1e-05, %v4104_v13 }
0x2fa4   :  { %5745 = vrsqrt.f32 %v4108_v28 }
0x2fb1   :  { %v5746_v27 = vpop.eup %5745 }
0x2fb2   :  { %v4112_v34 = vmul.f32 %v5746_v27, %v4106_v14 }
0x2fb4   :  { %v4119_v0 = vmul.f32 %v4860_v15, %v4112_v34  ;;  %v4366_v34 = vld [vmem:[#allocation3 + $0x208] sm:$0xff] }
0x2fb6   :  { %v6701_v7 = vadd.f32 %v4861_v6, %v4119_v0  ;;  %v4363_v0 = vld [vmem:[#allocation3 + $0x1f0] sm:$0xff] }
0x3059   :  { %v3762_v9 = vpop.f32.mrf.mxu1 }
0x305a   :  { %5496 = vmatmul.mubr.msk.f32.vlgmr.msra.gmra.mxu1 %vm3136_vm3, %v3762_v9  ;;  %v4364_v9 = vld [vmem:[#allocation3 + $0x1f8] sm:$0xff] }
0x305b   :  { %v5473_v51 = vpop.f32.mrf.mxu1 }
0x305d   :  { %v3923_v3 = vpop.f32.mrf.mxu1 }
0x305e   :  { %5489 = vmatmul.mubr.msk.f32.vlgmr.msra.gmra.mxu0 %vm3136_vm3, %v3923_v3 }
0x305f   :  { %v5483_v54 = vpop.f32.mrf.mxu1  ;;  %5506 = vmatprep.mubr.msk.f32.mxu0 %vm177_vm2, %v6701_v7  ;;  %5499 = vmatpush3.msra.mxu0 %v4131_v46 }
0x3060   :  { %5500 = vmatprep.subr.mxu0 %v4130_v44 }
0x3061   :  { %5501 = vmatpush3.msra.mxu0 %v4130_v44 }
0x3062   :  { %5502 = vmatprep.subr.mxu0 %v4129_v47 }
0x3063   :  { %5503 = vmatpush3.msra.mxu0 %v4129_v47 }
0x3064   :  { %5504 = vmatprep.subr.mxu0 %v4128_v24 }
0x3065   :  { %5505 = vmatpush3.msra.mxu0 %v4128_v24 }
0x3066   :  { %5528 = vmatprep.subr.mxu0 %v4366_v34 }
0x311a   :  { %v4069_v18 = vpop.f32.mrf.mxu1 }
0x311c   :  { %v5497_v25 = vpop.f32.mrf.mxu1 }
0x311e   :  { %v3996_v5 = vpop.f32.mrf.mxu0 }
0x311f   :  { %v4070_v11 = vadd.f32 %v4069_v18, %v3996_v5 }
0x3120   :  { %v5490_v59 = vpop.f32.mrf.mxu0 }
0x3121   :  { %v4079_v16 = vadd.f32 %v4859_v38, %v4070_v11 }
0x3123   :  { %v4081_v21 = vadd.f32 %v4079_v16, %v6559_v63  ;;  %v4227_v63 = vld [vmem:[#allocation3 + $0x1e8] sm:$0xff] }
0x3124   :  { %5509 = vmatprep.subr.mxu1 %v4227_v63 }
0x3125   :  { %v4085_v62 = vsel %vm177_vm2, %v4081_v21, 0.0  ;;  %v4091_v43 = vmul.f32 %v4081_v21, %v4081_v21  ;;  %5510 = vmatpush3.msra.mxu1 %v4227_v63 }
0x3126   :  { %4086 = vadd.xlane.f32.xlu0 %v4085_v62  ;;  %5511 = vmatprep.subr.mxu1 %v4226_v17 }
0x3127   :  { %v4095_v45 = vsel %vm177_vm2, %v4091_v43, 0.0  ;;  %5512 = vmatpush3.msra.mxu1 %v4226_v17  ;;  %v4868_v17 = vld [vmem:[%s6770_s2 + $0x14] ss:$0 sm:$0xff] }
0x3128   :  { %5513 = vmatprep.subr.mxu1 %v4225_v48 }
0x3129   :  { %5514 = vmatpush3.msra.mxu1 %v4225_v48 }
0x312a   :  { %4096 = vadd.xlane.f32.xlu0 %v4095_v45  ;;  %5515 = vmatprep.subr.mxu1 %v4224_v58 }
0x312b   :  { %5516 = vmatpush3.msra.mxu1 %v4224_v58 }
0x312c   :  { %5517 = vmatprep.subr.mxu1 %v4223_v39 }
0x312d   :  { %5518 = vmatpush3.msra.mxu1 %v4223_v39 }
0x312e   :  { %5519 = vmatprep.subr.mxu1 %v4222_v61 }
0x312f   :  { %5520 = vmatpush3.msra.mxu1 %v4222_v61 }
0x3130   :  { %5521 = vmatprep.subr.mxu1 %v4221_v41 }
0x3131   :  { %5522 = vmatpush3.msra.mxu1 %v4221_v41 }
0x3132   :  { %5523 = vmatprep.subr.mxu1 %v4220_v36 }
0x3133   :  { %5524 = vmatpush3.msra.mxu1 %v4220_v36 }
0x31af   :  { %v4087_v26 = vpop.xlane.xlu0 %4086 }
0x31b0   :  { %v4089_v55 = vmul.f32 0.03125, %v4087_v26 }
0x31b2   :  { %v4101_v4 = vmul.f32 %v4089_v55, %v4089_v55  ;;  %v4107_v32 = vsub.f32 %v4081_v21, %v4089_v55 }
0x31b3   :  { %v4097_v29 = vpop.xlane.xlu0 %4096 }
0x31b4   :  { %v4099_v30 = vmul.f32 0.03125, %v4097_v29  ;;  %v4869_v29 = vld [vmem:[%s6770_s2 + $0x15] ss:$0 sm:$0xff] }
0x31b6   :  { %v4103_v31 = vsub.f32 %v4099_v30, %v4101_v4 }
0x31b8   :  { %v4105_v1 = vmax.f32 %v4103_v31, 0.0  ;;  %v4870_v31 = vld [vmem:[%s6770_s2 + $0x16] ss:$0 sm:$0xff] }
0x31ba   :  { %v4109_v20 = vadd.f32 1e-05, %v4105_v1 }
0x31bc   :  { %5747 = vrsqrt.f32 %v4109_v20 }
0x31c9   :  { %v5748_v33 = vpop.eup %5747 }
0x31ca   :  { %v4113_v60 = vmul.f32 %v5748_v33, %v4107_v32 }
0x31cc   :  { %v4120_v38 = vmul.f32 %v4860_v15, %v4113_v60  ;;  %v4365_v15 = vld [vmem:[#allocation3 + $0x200] sm:$0xff] }
0x31ce   :  { %v4127_v35 = vadd.f32 %v4861_v6, %v4120_v38 }
0x31d0   :  { %5507 = vmatmul.mubr.msk.f32.vlgmr.msra.gmra.mxu0 %vm177_vm2, %v4127_v35 }
0x31d1   :  { %5529 = vmatpush3.msra.mxu0 %v4366_v34 }
0x31d2   :  { %5530 = vmatprep.subr.mxu0 %v4365_v15 }
0x31d3   :  { %5531 = vmatpush3.msra.mxu0 %v4365_v15 }
0x31d4   :  { %5532 = vmatprep.subr.mxu0 %v4364_v9 }
0x31d5   :  { %5533 = vmatpush3.msra.mxu0 %v4364_v9 }
0x31d6   :  { %5534 = vmatprep.subr.mxu0 %v4363_v0 }
0x31d7   :  { %5535 = vmatpush3.msra.mxu0 %v4363_v0  ;;  %v4873_v0 = vld [vmem:[%s6770_s2 + $0x17] ss:$0 sm:$0xff] }
0x3290   :  { %v5508_v50 = vpop.f32.mrf.mxu0 }
0x3291   :  { %v4215_v52 = vadd.f32 %v5508_v50, %v4862_v57  ;;  %v4506_v50 = vld [vmem:[#allocation3 + $0x228] sm:$0xff] }
0x3292   :  { %v4209_v49 = vpop.f32.mrf.mxu0  ;;  %5539 = vmatprep.subr.mxu0 %v4506_v50 }
0x3293   :  { %v4210_v19 = vadd.f32 %v4862_v57, %v4209_v49  ;;  %v4219_v8 = vmax.f32 %v4215_v52, 0.0  ;;  %v4505_v52 = vld [vmem:[#allocation3 + $0x220] sm:$0xff]  ;;  %v4504_v49 = vld [vmem:[#allocation3 + $0x218] sm:$0xff] }
0x3295   :  { %v4218_v23 = vmax.f32 %v4210_v19, 0.0  ;;  %v4503_v19 = vld [vmem:[#allocation3 + $0x210] sm:$0xff] }
0x3297   :  { %5525 = vmatprep.mubr.msk.f32.mxu1 %vm4233_vm4, %v4218_v23 }
0x3298   :  { %5526 = vmatmul.mubr.msk.f32.vlgmr.msra.gmra.mxu1 %vm4233_vm4, %v4219_v8 }
0x3358   :  { %v5527_v10 = vpop.f32.mrf.mxu1 }
0x3359   :  { %v4312_v2 = vadd.f32 %v5527_v10, %v4865_v37 }
0x335a   :  { %v4306_v56 = vpop.f32.mrf.mxu1 }
0x335b   :  { %v4316_v12 = vadd.f32 %v4312_v2, %v4127_v35  ;;  %v4307_v42 = vadd.f32 %v4865_v37, %v4306_v56 }
0x335d   :  { %v4315_v53 = vadd.f32 %v4307_v42, %v6701_v7  ;;  %v4320_v22 = vsel %vm177_vm2, %v4316_v12, 0.0  ;;  %v4326_v40 = vmul.f32 %v4316_v12, %v4316_v12 }
0x335e   :  { %4321 = vadd.xlane.f32.xlu0 %v4320_v22 }
0x335f   :  { %v4317_v13 = vsel %vm177_vm2, %v4315_v53, 0.0  ;;  %v4325_v28 = vmul.f32 %v4315_v53, %v4315_v53  ;;  %v4330_v27 = vsel %vm177_vm2, %v4326_v40, 0.0 }
0x3360   :  { %4318 = vadd.xlane.f32.xlu1 %v4317_v13 }
0x3361   :  { %v4327_v14 = vsel %vm177_vm2, %v4325_v28, 0.0 }
0x3362   :  { %4331 = vadd.xlane.f32.xlu0 %v4330_v27 }
0x3364   :  { %4328 = vadd.xlane.f32.xlu1 %v4327_v14 }
0x33e7   :  { %v4322_v6 = vpop.xlane.xlu0 %4321 }
0x33e8   :  { %v4324_v51 = vmul.f32 0.03125, %v4322_v6 }
0x33e9   :  { %v4319_v3 = vpop.xlane.xlu1 %4318 }
0x33ea   :  { %v4323_v7 = vmul.f32 0.03125, %v4319_v3  ;;  %v4336_v18 = vmul.f32 %v4324_v51, %v4324_v51  ;;  %v4342_v44 = vsub.f32 %v4316_v12, %v4324_v51 }
0x33eb   :  { %v4332_v54 = vpop.xlane.xlu0 %4331 }
0x33ec   :  { %v4334_v25 = vmul.f32 0.03125, %v4332_v54  ;;  %v4335_v11 = vmul.f32 %v4323_v7, %v4323_v7  ;;  %v4341_v24 = vsub.f32 %v4315_v53, %v4323_v7 }
0x33ed   :  { %v4329_v5 = vpop.xlane.xlu1 %4328 }
0x33ee   :  { %v4338_v59 = vsub.f32 %v4334_v25, %v4336_v18  ;;  %v4333_v16 = vmul.f32 0.03125, %v4329_v5  ;;  %v4874_v18 = vld [vmem:[%s6770_s2 + $0x18] ss:$0 sm:$0xff] }
0x33f0   :  { %v4340_v21 = vmax.f32 %v4338_v59, 0.0  ;;  %v4337_v62 = vsub.f32 %v4333_v16, %v4335_v11 }
0x33f2   :  { %v4344_v43 = vadd.f32 1e-05, %v4340_v21  ;;  %v4339_v45 = vmax.f32 %v4337_v62, 0.0  ;;  %v4875_v21 = vld [vmem:[%s6770_s2 + $0x19] ss:$0 sm:$0xff] }
0x33f4   :  { %5749 = vrsqrt.f32 %v4344_v43  ;;  %v4343_v46 = vadd.f32 1e-05, %v4339_v45 }
0x33f6   :  { %5751 = vrsqrt.f32 %v4343_v46 }
0x3401   :  { %v5750_v47 = vpop.eup %5749 }
0x3402   :  { %v4348_v63 = vmul.f32 %v5750_v47, %v4342_v44 }
0x3403   :  { %v5752_v48 = vpop.eup %5751 }
0x3404   :  { %v4347_v58 = vmul.f32 %v5752_v48, %v4341_v24  ;;  %v4355_v26 = vmul.f32 %v4868_v17, %v4348_v63 }
0x3406   :  { %v4354_v55 = vmul.f32 %v4868_v17, %v4347_v58  ;;  %v4362_v30 = vadd.f32 %v4869_v29, %v4355_v26 }
0x3408   :  { %v4361_v4 = vadd.f32 %v4869_v29, %v4354_v55  ;;  %v4646_v55 = vld [vmem:[#allocation3 + $0x248] sm:$0xff]  ;;  %v4645_v29 = vld [vmem:[#allocation3 + $0x240] sm:$0xff] }
0x3409   :  { %5550 = vmatprep.subr.mxu1 %v4646_v55 }
0x340a   :  { %5536 = vmatprep.mubr.msk.f32.mxu0 %vm177_vm2, %v4361_v4  ;;  %5551 = vmatpush3.msra.mxu1 %v4646_v55 }
0x340b   :  { %5537 = vmatmul.mubr.msk.f32.vlgmr.msra.gmra.mxu0 %vm177_vm2, %v4362_v30  ;;  %5552 = vmatprep.subr.mxu1 %v4645_v29 }
0x340c   :  { %5540 = vmatpush3.msra.mxu0 %v4506_v50  ;;  %5553 = vmatpush3.msra.mxu1 %v4645_v29 }
0x340d   :  { %5541 = vmatprep.subr.mxu0 %v4505_v52 }
0x340e   :  { %5542 = vmatpush3.msra.mxu0 %v4505_v52 }
0x340f   :  { %5543 = vmatprep.subr.mxu0 %v4504_v49 }
0x3410   :  { %5544 = vmatpush3.msra.mxu0 %v4504_v49 }
0x3411   :  { %5545 = vmatprep.subr.mxu0 %v4503_v19 }
0x3412   :  { %5546 = vmatpush3.msra.mxu0 %v4503_v19 }
0x34cb   :  { %v5538_v1 = vpop.f32.mrf.mxu0 }
0x34cc   :  { %v4450_v20 = vadd.f32 %v5538_v1, %v4870_v31 }
0x34cd   :  { %v4444_v32 = vpop.f32.mrf.mxu0 }
0x34ce   :  { %v4454_v33 = vadd.f32 %v4450_v20, %v4362_v30  ;;  %v4445_v60 = vadd.f32 %v4870_v31, %v4444_v32  ;;  %v4643_v30 = vld [vmem:[#allocation3 + $0x230] sm:$0xff] }
0x34d0   :  { %v4453_v38 = vadd.f32 %v4445_v60, %v4361_v4  ;;  %v4458_v35 = vsel %vm177_vm2, %v4454_v33, 0.0  ;;  %v4464_v39 = vmul.f32 %v4454_v33, %v4454_v33  ;;  %v4644_v4 = vld [vmem:[#allocation3 + $0x238] sm:$0xff] }
0x34d1   :  { %4459 = vadd.xlane.f32.xlu0 %v4458_v35  ;;  %5554 = vmatprep.subr.mxu1 %v4644_v4 }
0x34d2   :  { %v4455_v61 = vsel %vm177_vm2, %v4453_v38, 0.0  ;;  %v4463_v41 = vmul.f32 %v4453_v38, %v4453_v38  ;;  %v4468_v36 = vsel %vm177_vm2, %v4464_v39, 0.0  ;;  %5555 = vmatpush3.msra.mxu1 %v4644_v4 }
0x34d3   :  { %4456 = vadd.xlane.f32.xlu1 %v4455_v61  ;;  %5556 = vmatprep.subr.mxu1 %v4643_v30 }
0x34d4   :  { %v4465_v57 = vsel %vm177_vm2, %v4463_v41, 0.0  ;;  %5557 = vmatpush3.msra.mxu1 %v4643_v30 }
0x34d5   :  { %4469 = vadd.xlane.f32.xlu0 %v4468_v36 }
0x34d7   :  { %4466 = vadd.xlane.f32.xlu1 %v4465_v57 }
0x355a   :  { %v4460_v23 = vpop.xlane.xlu0 %4459 }
0x355b   :  { %v4462_v8 = vmul.f32 0.03125, %v4460_v23 }
0x355c   :  { %v4457_v37 = vpop.xlane.xlu1 %4456 }
0x355d   :  { %v4461_v10 = vmul.f32 0.03125, %v4457_v37  ;;  %v4474_v56 = vmul.f32 %v4462_v8, %v4462_v8  ;;  %v4480_v15 = vsub.f32 %v4454_v33, %v4462_v8  ;;  %v4878_v8 = vld [vmem:[%s6770_s2 + $0x1a] ss:$0 sm:$0xff] }
0x355e   :  { %v4470_v2 = vpop.xlane.xlu0 %4469 }
0x355f   :  { %v4472_v12 = vmul.f32 0.03125, %v4470_v2  ;;  %v4473_v53 = vmul.f32 %v4461_v10, %v4461_v10  ;;  %v4479_v6 = vsub.f32 %v4453_v38, %v4461_v10 }
0x3560   :  { %v4467_v42 = vpop.xlane.xlu1 %4466 }
0x3561   :  { %v4476_v22 = vsub.f32 %v4472_v12, %v4474_v56  ;;  %v4471_v40 = vmul.f32 0.03125, %v4467_v42  ;;  %v4879_v42 = vld [vmem:[%s6770_s2 + $0x1b] ss:$0 sm:$0xff] }
0x3563   :  { %v4478_v13 = vmax.f32 %v4476_v22, 0.0  ;;  %v4475_v28 = vsub.f32 %v4471_v40, %v4473_v53 }
0x3565   :  { %v4482_v27 = vadd.f32 1e-05, %v4478_v13  ;;  %v4477_v14 = vmax.f32 %v4475_v28, 0.0 }
0x3567   :  { %5753 = vrsqrt.f32 %v4482_v27  ;;  %v4481_v34 = vadd.f32 1e-05, %v4477_v14  ;;  %v4880_v27 = vld [vmem:[%s6770_s2 + $0x1c] ss:$0 sm:$0xff] }
0x3569   :  { %5755 = vrsqrt.f32 %v4481_v34 }
0x3574   :  { %v5754_v9 = vpop.eup %5753 }
0x3575   :  { %v4486_v51 = vmul.f32 %v5754_v9, %v4480_v15 }
0x3576   :  { %v5756_v3 = vpop.eup %5755 }
0x3577   :  { %v4485_v7 = vmul.f32 %v5756_v3, %v4479_v6  ;;  %v4493_v54 = vmul.f32 %v4873_v0, %v4486_v51 }
0x3579   :  { %v4492_v25 = vmul.f32 %v4873_v0, %v4485_v7  ;;  %v4500_v5 = vadd.f32 %v4874_v18, %v4493_v54 }
0x357b   :  { %v4499_v11 = vadd.f32 %v4874_v18, %v4492_v25  ;;  %v4502_v16 = vmax.f32 %v4500_v5, 0.0 }
0x357d   :  { %v4501_v59 = vmax.f32 %v4499_v11, 0.0 }
0x357f   :  { %5547 = vmatprep.mubr.msk.f32.mxu0 %vm177_vm2, %v4501_v59 }
0x3580   :  { %5548 = vmatmul.mubr.msk.f32.vlgmr.msra.gmra.mxu0 %vm177_vm2, %v4502_v16 }
0x3640   :  { %v5549_v62 = vpop.f32.mrf.mxu0 }
0x3641   :  { %v4590_v43 = vadd.f32 %v5549_v62, %v4875_v21 }
0x3642   :  { %v4584_v45 = vpop.f32.mrf.mxu0 }
0x3643   :  { %v4594_v46 = vadd.f32 %v4590_v43, %v4502_v16  ;;  %v4585_v44 = vadd.f32 %v4875_v21, %v4584_v45 }
0x3645   :  { %v4593_v47 = vadd.f32 %v4585_v44, %v4501_v59  ;;  %v4598_v24 = vsel %vm177_vm2, %v4594_v46, 0.0  ;;  %v4604_v63 = vmul.f32 %v4594_v46, %v4594_v46 }
0x3646   :  { %4599 = vadd.xlane.f32.xlu0 %v4598_v24 }
0x3647   :  { %v4595_v17 = vsel %vm177_vm2, %v4593_v47, 0.0  ;;  %v4603_v48 = vmul.f32 %v4593_v47, %v4593_v47  ;;  %v4608_v58 = vsel %vm177_vm2, %v4604_v63, 0.0 }
0x3648   :  { %4596 = vadd.xlane.f32.xlu1 %v4595_v17 }
0x3649   :  { %v4605_v26 = vsel %vm177_vm2, %v4603_v48, 0.0 }
0x364a   :  { %4609 = vadd.xlane.f32.xlu0 %v4608_v58 }
0x364c   :  { %4606 = vadd.xlane.f32.xlu1 %v4605_v26 }
0x36cf   :  { %v4600_v31 = vpop.xlane.xlu0 %4599 }
0x36d0   :  { %v4602_v1 = vmul.f32 0.03125, %v4600_v31 }
0x36d1   :  { %v4597_v20 = vpop.xlane.xlu1 %4596 }
0x36d2   :  { %v4601_v32 = vmul.f32 0.03125, %v4597_v20  ;;  %v4614_v60 = vmul.f32 %v4602_v1, %v4602_v1  ;;  %v4620_v19 = vsub.f32 %v4594_v46, %v4602_v1 }
0x36d3   :  { %v4610_v33 = vpop.xlane.xlu0 %4609 }
0x36d4   :  { %v4612_v38 = vmul.f32 0.03125, %v4610_v33  ;;  %v4613_v39 = vmul.f32 %v4601_v32, %v4601_v32  ;;  %v4619_v37 = vsub.f32 %v4593_v47, %v4601_v32 }
0x36d5   :  { %v4607_v35 = vpop.xlane.xlu1 %4606 }
0x36d6   :  { %v4616_v61 = vsub.f32 %v4612_v38, %v4614_v60  ;;  %v4611_v41 = vmul.f32 0.03125, %v4607_v35 }
0x36d8   :  { %v4618_v36 = vmax.f32 %v4616_v61, 0.0  ;;  %v4615_v57 = vsub.f32 %v4611_v41, %v4613_v39 }
0x36da   :  { %v4622_v50 = vadd.f32 1e-05, %v4618_v36  ;;  %v4617_v52 = vmax.f32 %v4615_v57, 0.0 }
0x36dc   :  { %5757 = vrsqrt.f32 %v4622_v50  ;;  %v4621_v49 = vadd.f32 1e-05, %v4617_v52 }
0x36de   :  { %5759 = vrsqrt.f32 %v4621_v49 }
0x36e9   :  { %v5758_v23 = vpop.eup %5757 }
0x36ea   :  { %v4626_v10 = vmul.f32 %v5758_v23, %v4620_v19 }
0x36eb   :  { %v5760_v2 = vpop.eup %5759 }
0x36ec   :  { %v4625_v56 = vmul.f32 %v5760_v2, %v4619_v37  ;;  %v4633_v12 = vmul.f32 %v4878_v8, %v4626_v10 }
0x36ee   :  { %v4632_v53 = vmul.f32 %v4878_v8, %v4625_v56  ;;  %v4640_v22 = vadd.f32 %v4879_v42, %v4633_v12 }
0x36f0   :  { %v4639_v40 = vadd.f32 %v4879_v42, %v4632_v53  ;;  %v4642_v28 = vmax.f32 %v4640_v22, 0.0 }
0x36f2   :  { %v4641_v13 = vmax.f32 %v4639_v40, 0.0 }
0x36f4   :  { %5558 = vmatprep.mubr.msk.f32.mxu1 %vm177_vm2, %v4641_v13 }
0x36f5   :  { %5559 = vmatmul.mubr.msk.f32.vlgmr.msra.gmra.mxu1 %vm177_vm2, %v4642_v28 }
0x37b5   :  { %v5560_v14 = vpop.f32.mrf.mxu1 }
0x37b6   :  { %v4730_v34 = vadd.f32 %v5560_v14, %v4880_v27 }
0x37b7   :  { %v4724_v15 = vpop.f32.mrf.mxu1 }
0x37b8   :  { %4734 = vst [vmem:[#allocation6 + $0x8] sm:$0xff] %v4730_v34  ;;  %v4725_v9 = vadd.f32 %v4880_v27, %v4724_v15 }
0x37ba   :  { %4733 = vst [vmem:[#allocation6] sm:$0xff] %v4725_v9 }
0x37bb   :  { %5792 = shalt.err (!%p5789_p9)
}
0x37bc   :  { %4746 = dma.vmem_to_hbm [thread:$0]  %s4741_s13, 256, %s6771_s3, [#allocation5], %s5806_s15, %s5806_s15, %s5807_s16  }
0x37bd   :  { %5803 = dma.done.wait [#allocation5], 256  }
0x37be   :  { %5804 = vsyncadd [#allocation5], 4294967040 }
0x37bf   :  { %4750 = vsyncpa [#allocation4], 1 }
0x37c0   :  { %4751 = vsyncpa [#allocation5], 1 }

</bundles_post_ra>
